<compile_context>
chip_gen: v7x
topology: tpu7x:2x2x1
jax: 0.10.0
libtpu: 0.0.40
codegen_flags: <defaults>
</compile_context>

<pallas_src>
import functools

import jax
import jax.numpy as jnp
from jax.experimental import pallas as pl
from jax.experimental.pallas import tpu as pltpu

OMEGA_0 = 30.0
_SUBLANE = 8


def _cdiv(a, b):
    return (a + b - 1) // b


def _round_up(n, m):
    return _cdiv(n, m) * m


def _vmem_capacity_bytes():
    try:
        info = pltpu.get_tpu_info()
        cap = getattr(info, "vmem_capacity_bytes", None)
        if cap:
            return int(cap)
    except Exception:
        pass
    return 64 << 20  # conservative fallback (v7x per-TC VMEM)


def _resnet_block_kernel(has_shortcut, n_sub, sub_rows, *refs):
    # refs: x, wa1, ba1, w0, b0, wa2, ba2, w1, b1, [ws], out
    # Weights are pre-transposed to (K, N) and OMEGA_0-folded in the wrapper.
    if has_shortcut:
        (x_ref, wa1_ref, ba1_ref, w0_ref, b0_ref,
         wa2_ref, ba2_ref, w1_ref, b1_ref, ws_ref, o_ref) = refs
    else:
        (x_ref, wa1_ref, ba1_ref, w0_ref, b0_ref,
         wa2_ref, ba2_ref, w1_ref, b1_ref, o_ref) = refs
        ws_ref = None

    # Loop-invariant weight / bias reads hoisted out of the sub-chunk loop
    # (JAX does not CSE these; with a fori_loop they are materialized once).
    wa1 = wa1_ref[...]
    ba1 = ba1_ref[...]
    w0 = w0_ref[...]
    b0 = b0_ref[...]
    wa2 = wa2_ref[...]
    ba2 = ba2_ref[...]
    w1 = w1_ref[...]
    b1 = b1_ref[...]
    ws = ws_ref[...] if has_shortcut else None

    def chunk(r0):
        rows = pl.ds(r0, sub_rows)
        x = x_ref[rows, :]
        # actvn_1: sin(omega*(x W + b)); omega already folded into wa1/ba1.
        a1 = jnp.sin(jnp.dot(x, wa1, preferred_element_type=jnp.float32) + ba1)
        # Stage the shortcut term into o_ref immediately so x's live range ends here.
        if has_shortcut:
            x_s = jnp.dot(x.astype(ws.dtype), ws, preferred_element_type=jnp.float32)
        else:
            x_s = x  # identity shortcut (size_in == size_out)
        o_ref[rows, :] = x_s.astype(o_ref.dtype)
        # fc_0 -> actvn_2 -> fc_1
        net = jnp.dot(a1, w0, preferred_element_type=jnp.float32) + b0
        a2 = jnp.sin(jnp.dot(net, wa2, preferred_element_type=jnp.float32) + ba2)
        dx = jnp.dot(a2.astype(w1.dtype), w1, preferred_element_type=jnp.float32) + b1
        o_ref[rows, :] = (o_ref[rows, :] + dx).astype(o_ref.dtype)

    if n_sub == 1:
        chunk(0)
    else:
        def body(j, carry):
            chunk(pl.multiple_of(j * sub_rows, sub_rows))
            return carry
        jax.lax.fori_loop(0, n_sub, body, 0)


@functools.partial(jax.jit, static_argnames=("tm", "sub_rows", "mxu_bf16_nonsine"))
def resnet_block_fc(x, params, *, tm=None, sub_rows=256, mxu_bf16_nonsine=False):
    """x: (N, size_in) float32. params: PyTorch nn.Linear convention weights."""
    N, size_in = x.shape
    size_h = params["w0"].shape[0]
    size_out = params["w1"].shape[0]
    has_shortcut = "ws" in params
    if not has_shortcut and size_in != size_out:
        raise ValueError("identity shortcut requires size_in == size_out")

    f32 = jnp.float32
    # bf16 is only ever used for the two matmuls with no downstream sin (fc_1,
    # shortcut); SineLayer matmuls must stay f32 (omega_0=30 amplifies rounding).
    w_dt = jnp.bfloat16 if mxu_bf16_nonsine else f32

    # Pre-transpose once (K, N layout) and fold OMEGA_0 into the SineLayer affines.
    wa1_t = (OMEGA_0 * params["wa1"]).T.astype(f32)
    ba1_r = (OMEGA_0 * params["ba1"]).reshape(1, -1).astype(f32)
    w0_t = params["w0"].T.astype(f32)
    b0_r = params["b0"].reshape(1, -1).astype(f32)
    wa2_t = (OMEGA_0 * params["wa2"]).T.astype(f32)
    ba2_r = (OMEGA_0 * params["ba2"]).reshape(1, -1).astype(f32)
    w1_t = params["w1"].T.astype(w_dt)
    b1_r = params["b1"].reshape(1, -1).astype(f32)
    ws_t = params["ws"].T.astype(w_dt) if has_shortcut else None

    x = x.astype(f32)

    # Generation-aware VMEM budget and tile sizing.
    vmem_cap = _vmem_capacity_bytes()
    budget = int(vmem_cap) * 7 // 8          # headroom for compiler internals
    if tm is None:
        tm = 1024 if vmem_cap >= (96 << 20) else 512   # v5e/v6e vs v7x

    # Guarantee >= 2 grid steps so v7x's two TensorCores both get work
    # (costs only one extra ~0.35us grid step on 1-TC chips).
    tm = max(_SUBLANE, min(tm, _round_up(_cdiv(N, 2), _SUBLANE)))

    # Resident-weight + bias VMEM (single-buffered via pl.Buffered(1)).
    wbytes = 4 * (size_in * size_in + size_in * size_h + size_h * size_h)
    wbytes += w1_t.dtype.itemsize * size_h * size_out
    if has_shortcut:
        wbytes += ws_t.dtype.itemsize * size_in * size_out
    wbytes += 4 * (2 * size_in + 2 * size_h + size_out)
    fixed = wbytes + (4 << 20)               # + margin for internal scratch
    if fixed > budget:
        # TODO(synk): tile the weights over a K-reduction grid axis when size_h is
        # large enough that resident weights alone exceed VMEM.
        raise ValueError("resident weights exceed VMEM budget; K-tiling not implemented")

    def io_bytes(rows):
        return 2 * rows * 4 * (size_in + size_out)   # double-buffered x / out tiles

    while tm > _SUBLANE and fixed + io_bytes(tm) > budget:
        tm = max(_SUBLANE, _round_up(tm // 2, _SUBLANE))
    vmem_limit = int(min(max(fixed + io_bytes(tm), 32 << 20), budget))

    # In-kernel row sub-chunking (a real fori_loop -> bounded vreg live ranges).
    if tm % sub_rows == 0:
        sub, n_sub = sub_rows, tm // sub_rows
    elif tm % 128 == 0:
        sub, n_sub = 128, tm // 128
    else:
        sub, n_sub = tm, 1

    n_blocks = _cdiv(N, tm)

    def wspec(shape):
        # Constant-index blocks: fetched once; single-buffer to halve their VMEM.
        return pl.BlockSpec(shape, lambda i: (0, 0), pipeline_mode=pl.Buffered(1))

    in_specs = [
        pl.BlockSpec((tm, size_in), lambda i: (i, 0)),     # x tile (native width)
        wspec((size_in, size_in)), wspec((1, size_in)),    # wa1, ba1 (omega-folded)
        wspec((size_in, size_h)), wspec((1, size_h)),      # w0, b0
        wspec((size_h, size_h)), wspec((1, size_h)),       # wa2, ba2 (omega-folded)
        wspec((size_h, size_out)), wspec((1, size_out)),   # w1, b1
    ]
    args = [x, wa1_t, ba1_r, w0_t, b0_r, wa2_t, ba2_r, w1_t, b1_r]
    if has_shortcut:
        in_specs.append(wspec((size_in, size_out)))
        args.append(ws_t)

    kernel = functools.partial(_resnet_block_kernel, has_shortcut, n_sub, sub)

    return pl.pallas_call(
        kernel,
        out_shape=jax.ShapeDtypeStruct((N, size_out), f32),
        grid_spec=pltpu.PrefetchScalarGridSpec(
            num_scalar_prefetch=0,
            grid=(n_blocks,),
            in_specs=in_specs,
            out_specs=pl.BlockSpec((tm, size_out), lambda i: (i, 0)),
        ),
        compiler_params=pltpu.CompilerParams(
            dimension_semantics=("parallel",),
            vmem_limit_bytes=vmem_limit,
        ),
    )(*args)


def _torch_linear_init(key, out_f, in_f, bias=True):
    """Deterministic init mimicking nn.Linear default (uniform +/- 1/sqrt(in_f))."""
    kw, kb = jax.random.split(key)
    bound = 1.0 / jnp.sqrt(jnp.float32(in_f))
    w = jax.random.uniform(kw, (out_f, in_f), jnp.float32, -bound, bound)
    if not bias:
        return w, None
    b = jax.random.uniform(kb, (out_f,), jnp.float32, -bound, bound)
    return w, b


def make_params(key, size_in, size_out=None, size_h=None):
    if size_out is None:
        size_out = size_in
    if size_h is None:
        size_h = min(size_in, size_out)
    keys = jax.random.split(key, 5)
    wa1, ba1 = _torch_linear_init(keys[0], size_in, size_in)
    w0, b0 = _torch_linear_init(keys[1], size_h, size_in)
    wa2, ba2 = _torch_linear_init(keys[2], size_h, size_h)
    w1, b1 = _torch_linear_init(keys[3], size_out, size_h)
    w1 = jnp.zeros_like(w1)  # nn.init.zeros_(self.fc_1.weight)
    params = dict(wa1=wa1, ba1=ba1, w0=w0, b0=b0, wa2=wa2, ba2=ba2, w1=w1, b1=b1)
    if size_in != size_out:
        ws, _ = _torch_linear_init(keys[4], size_out, size_in, bias=False)
        params["ws"] = ws
    return params


def reference(x, params):
    lin = lambda v, w, b: v @ w.T + (b if b is not None else 0.0)
    a1 = jnp.sin(OMEGA_0 * lin(x, params["wa1"], params["ba1"]))
    net = lin(a1, params["w0"], params["b0"])
    a2 = jnp.sin(OMEGA_0 * lin(net, params["wa2"], params["ba2"]))
    dx = lin(a2, params["w1"], params["b1"])
    x_s = x @ params["ws"].T if "ws" in params else x
    return x_s + dx


if __name__ == "__main__":
    key = jax.random.PRNGKey(0)
    k_x, k_p1, k_p2 = jax.random.split(key, 3)

    N, size_in = 256, 32
    x = jax.random.normal(k_x, (N, size_in), jnp.float32)

    # Case 1: size_out == size_in (identity shortcut)
    params1 = make_params(k_p1, size_in)                 # size_out = size_h = 32
    out1 = jax.block_until_ready(resnet_block_fc(x, params1))
    ref1 = reference(x, params1)

    # Case 2: size_out != size_in (linear shortcut, no bias)
    params2 = make_params(k_p2, size_in, size_out=64)    # size_h = min(32, 64) = 32
    out2 = jax.block_until_ready(resnet_block_fc(x, params2))
    ref2 = reference(x, params2)

    # Case 3: N not a multiple of the row tile -> exercises masked output stores.
    x3 = x[:100]
    out3 = jax.block_until_ready(resnet_block_fc(x3, params2))
    ref3 = reference(x3, params2)

    # Case 4: bf16 operands only for the non-sine matmuls (fc_1 / shortcut).
    out2b = jax.block_until_ready(resnet_block_fc(x, params2, mxu_bf16_nonsine=True))

    assert out1.shape == (N, 32) and out2.shape == (N, 64) and out3.shape == (100, 64)
    assert jnp.allclose(out1, ref1, atol=1e-4, rtol=1e-4)
    assert jnp.allclose(out2, ref2, atol=1e-4, rtol=1e-4)
    assert jnp.allclose(out3, ref3, atol=1e-4, rtol=1e-4)
    assert jnp.allclose(out2b, ref2, atol=3e-2, rtol=3e-2)
    print("KERNEL_OK")
</pallas_src>

<mosaic_0001>
module attributes {stable_mosaic.version = 11 : i64} {
  func.func @_resnet_block_kernel(%arg0: i32, %arg1: memref<128x32xf32, #tpu.memory_space<vmem>>, %arg2: memref<32x32xf32, #tpu.memory_space<vmem>>, %arg3: memref<1x32xf32, #tpu.memory_space<vmem>>, %arg4: memref<32x32xf32, #tpu.memory_space<vmem>>, %arg5: memref<1x32xf32, #tpu.memory_space<vmem>>, %arg6: memref<32x32xf32, #tpu.memory_space<vmem>>, %arg7: memref<1x32xf32, #tpu.memory_space<vmem>>, %arg8: memref<32x32xf32, #tpu.memory_space<vmem>>, %arg9: memref<1x32xf32, #tpu.memory_space<vmem>>, %arg10: memref<128x32xf32, #tpu.memory_space<vmem>>) attributes {dimension_semantics = [#tpu.dimension_semantics<parallel>], iteration_bounds = array<i64: 2>, scalar_prefetch = 0 : i64, scratch_operands = 0 : i64, tpu.core_type = #tpu.core_type<tc>, window_params = [{transform_indices = @transform_0, window_bounds = array<i64: 128, 32>}, {pipeline_mode = #tpu.pipeline_mode<synchronous>, transform_indices = @transform_1, window_bounds = array<i64: 32, 32>}, {pipeline_mode = #tpu.pipeline_mode<synchronous>, transform_indices = @transform_2, window_bounds = array<i64: 1, 32>}, {pipeline_mode = #tpu.pipeline_mode<synchronous>, transform_indices = @transform_3, window_bounds = array<i64: 32, 32>}, {pipeline_mode = #tpu.pipeline_mode<synchronous>, transform_indices = @transform_4, window_bounds = array<i64: 1, 32>}, {pipeline_mode = #tpu.pipeline_mode<synchronous>, transform_indices = @transform_5, window_bounds = array<i64: 32, 32>}, {pipeline_mode = #tpu.pipeline_mode<synchronous>, transform_indices = @transform_6, window_bounds = array<i64: 1, 32>}, {pipeline_mode = #tpu.pipeline_mode<synchronous>, transform_indices = @transform_7, window_bounds = array<i64: 32, 32>}, {pipeline_mode = #tpu.pipeline_mode<synchronous>, transform_indices = @transform_8, window_bounds = array<i64: 1, 32>}, {transform_indices = @transform_9, window_bounds = array<i64: 128, 32>}]} {
    %c0 = arith.constant 0 : index
    %c0_0 = arith.constant 0 : index
    %0 = vector.load %arg2[%c0, %c0_0] : memref<32x32xf32, #tpu.memory_space<vmem>>, vector<32x32xf32>
    %c0_1 = arith.constant 0 : index
    %c0_2 = arith.constant 0 : index
    %1 = vector.load %arg3[%c0_1, %c0_2] : memref<1x32xf32, #tpu.memory_space<vmem>>, vector<1x32xf32>
    %c0_3 = arith.constant 0 : index
    %c0_4 = arith.constant 0 : index
    %2 = vector.load %arg4[%c0_3, %c0_4] : memref<32x32xf32, #tpu.memory_space<vmem>>, vector<32x32xf32>
    %c0_5 = arith.constant 0 : index
    %c0_6 = arith.constant 0 : index
    %3 = vector.load %arg5[%c0_5, %c0_6] : memref<1x32xf32, #tpu.memory_space<vmem>>, vector<1x32xf32>
    %c0_7 = arith.constant 0 : index
    %c0_8 = arith.constant 0 : index
    %4 = vector.load %arg6[%c0_7, %c0_8] : memref<32x32xf32, #tpu.memory_space<vmem>>, vector<32x32xf32>
    %c0_9 = arith.constant 0 : index
    %c0_10 = arith.constant 0 : index
    %5 = vector.load %arg7[%c0_9, %c0_10] : memref<1x32xf32, #tpu.memory_space<vmem>>, vector<1x32xf32>
    %c0_11 = arith.constant 0 : index
    %c0_12 = arith.constant 0 : index
    %6 = vector.load %arg8[%c0_11, %c0_12] : memref<32x32xf32, #tpu.memory_space<vmem>>, vector<32x32xf32>
    %c0_13 = arith.constant 0 : index
    %c0_14 = arith.constant 0 : index
    %7 = vector.load %arg9[%c0_13, %c0_14] : memref<1x32xf32, #tpu.memory_space<vmem>>, vector<1x32xf32>
    %c0_15 = arith.constant 0 : index
    %c0_16 = arith.constant 0 : index
    %8 = vector.load %arg1[%c0_15, %c0_16] : memref<128x32xf32, #tpu.memory_space<vmem>>, vector<128x32xf32>
    %cst = arith.constant dense<0.000000e+00> : vector<128x32xf32>
    %9 = tpu.matmul %8, %0, %cst {dimension_numbers = #tpu.dot_dimension_numbers<[1], [0], [0], [1], [0, 0, 1, 1], [], []>} : vector<128x32xf32>, vector<32x32xf32>, vector<128x32xf32> -> vector<128x32xf32>
    %10 = vector.broadcast %1 : vector<1x32xf32> to vector<128x32xf32>
    %11 = arith.addf %9, %10 : vector<128x32xf32>
    %12 = math.sin %11 : vector<128x32xf32>
    %c0_17 = arith.constant 0 : index
    %c0_18 = arith.constant 0 : index
    %13 = vector.load %arg10[%c0_17, %c0_18] : memref<128x32xf32, #tpu.memory_space<vmem>>, vector<128x32xf32>
    tpu.vector_store %arg10[%c0_17, %c0_18], %8 {strides = array<i32>} : memref<128x32xf32, #tpu.memory_space<vmem>>, vector<128x32xf32>,
    %cst_19 = arith.constant dense<0.000000e+00> : vector<128x32xf32>
    %14 = tpu.matmul %12, %2, %cst_19 {dimension_numbers = #tpu.dot_dimension_numbers<[1], [0], [0], [1], [0, 0, 1, 1], [], []>} : vector<128x32xf32>, vector<32x32xf32>, vector<128x32xf32> -> vector<128x32xf32>
    %15 = vector.broadcast %3 : vector<1x32xf32> to vector<128x32xf32>
    %16 = arith.addf %14, %15 : vector<128x32xf32>
    %cst_20 = arith.constant dense<0.000000e+00> : vector<128x32xf32>
    %17 = tpu.matmul %16, %4, %cst_20 {dimension_numbers = #tpu.dot_dimension_numbers<[1], [0], [0], [1], [0, 0, 1, 1], [], []>} : vector<128x32xf32>, vector<32x32xf32>, vector<128x32xf32> -> vector<128x32xf32>
    %18 = vector.broadcast %5 : vector<1x32xf32> to vector<128x32xf32>
    %19 = arith.addf %17, %18 : vector<128x32xf32>
    %20 = math.sin %19 : vector<128x32xf32>
    %cst_21 = arith.constant dense<0.000000e+00> : vector<128x32xf32>
    %21 = tpu.matmul %20, %6, %cst_21 {dimension_numbers = #tpu.dot_dimension_numbers<[1], [0], [0], [1], [0, 0, 1, 1], [], []>} : vector<128x32xf32>, vector<32x32xf32>, vector<128x32xf32> -> vector<128x32xf32>
    %22 = vector.broadcast %7 : vector<1x32xf32> to vector<128x32xf32>
    %23 = arith.addf %21, %22 : vector<128x32xf32>
    %c0_22 = arith.constant 0 : index
    %c0_23 = arith.constant 0 : index
    %24 = vector.load %arg10[%c0_22, %c0_23] : memref<128x32xf32, #tpu.memory_space<vmem>>, vector<128x32xf32>
    %25 = arith.addf %24, %23 : vector<128x32xf32>
    %c0_24 = arith.constant 0 : index
    %c0_25 = arith.constant 0 : index
    %26 = vector.load %arg10[%c0_24, %c0_25] : memref<128x32xf32, #tpu.memory_space<vmem>>, vector<128x32xf32>
    tpu.vector_store %arg10[%c0_24, %c0_25], %25 {strides = array<i32>} : memref<128x32xf32, #tpu.memory_space<vmem>>, vector<128x32xf32>,
    return
  }
  func.func @transform_0(%arg0: i32) -> (i32, i32) {
    %c0_i32 = arith.constant 0 : i32
    %c0_i32_0 = arith.constant 0 : i32
    return %arg0, %c0_i32 : i32, i32
  }
  func.func @transform_1(%arg0: i32) -> (i32, i32) {
    %c0_i32 = arith.constant 0 : i32
    %c0_i32_0 = arith.constant 0 : i32
    %c0_i32_1 = arith.constant 0 : i32
    return %c0_i32, %c0_i32_0 : i32, i32
  }
  func.func @transform_2(%arg0: i32) -> (i32, i32) {
    %c0_i32 = arith.constant 0 : i32
    %c0_i32_0 = arith.constant 0 : i32
    %c0_i32_1 = arith.constant 0 : i32
    return %c0_i32, %c0_i32_0 : i32, i32
  }
  func.func @transform_3(%arg0: i32) -> (i32, i32) {
    %c0_i32 = arith.constant 0 : i32
    %c0_i32_0 = arith.constant 0 : i32
    %c0_i32_1 = arith.constant 0 : i32
    return %c0_i32, %c0_i32_0 : i32, i32
  }
  func.func @transform_4(%arg0: i32) -> (i32, i32) {
    %c0_i32 = arith.constant 0 : i32
    %c0_i32_0 = arith.constant 0 : i32
    %c0_i32_1 = arith.constant 0 : i32
    return %c0_i32, %c0_i32_0 : i32, i32
  }
  func.func @transform_5(%arg0: i32) -> (i32, i32) {
    %c0_i32 = arith.constant 0 : i32
    %c0_i32_0 = arith.constant 0 : i32
    %c0_i32_1 = arith.constant 0 : i32
    return %c0_i32, %c0_i32_0 : i32, i32
  }
  func.func @transform_6(%arg0: i32) -> (i32, i32) {
    %c0_i32 = arith.constant 0 : i32
    %c0_i32_0 = arith.constant 0 : i32
    %c0_i32_1 = arith.constant 0 : i32
    return %c0_i32, %c0_i32_0 : i32, i32
  }
  func.func @transform_7(%arg0: i32) -> (i32, i32) {
    %c0_i32 = arith.constant 0 : i32
    %c0_i32_0 = arith.constant 0 : i32
    %c0_i32_1 = arith.constant 0 : i32
    return %c0_i32, %c0_i32_0 : i32, i32
  }
  func.func @transform_8(%arg0: i32) -> (i32, i32) {
    %c0_i32 = arith.constant 0 : i32
    %c0_i32_0 = arith.constant 0 : i32
    %c0_i32_1 = arith.constant 0 : i32
    return %c0_i32, %c0_i32_0 : i32, i32
  }
  func.func @transform_9(%arg0: i32) -> (i32, i32) {
    %c0_i32 = arith.constant 0 : i32
    %c0_i32_0 = arith.constant 0 : i32
    return %arg0, %c0_i32 : i32, i32
  }
}

</mosaic_0001>

<bundles_post_ra>
// kernel: resnet_block_fc.1
= control target key start
LH: loop header
LB: loop body
LE: loop exit
PB: predicated region body
PF: predicated region fallthrough
CT: control target
= control target key end

     0   :  { %s5401_s30 = smov 0   ;;  %s8713_s0 = inlined_call_operand.vmem [shape: f32[256,32], index: 0, kind: input, shape index: {}]   ;;  %s8714_s1 = inlined_call_operand.vmem [shape: f32[32,32], index: 1, kind: input, shape index: {}]   ;;  %s8715_s2 = inlined_call_operand.vmem [shape: f32[1,32], index: 2, kind: input, shape index: {}]   ;;  %s8716_s3 = inlined_call_operand.vmem [shape: f32[32,32], index: 3, kind: input, shape index: {}]   ;;  %s8717_s4 = inlined_call_operand.vmem [shape: f32[1,32], index: 4, kind: input, shape index: {}]   ;;  %s8718_s5 = inlined_call_operand.vmem [shape: f32[32,32], index: 5, kind: input, shape index: {}]   ;;  %s8719_s6 = inlined_call_operand.vmem [shape: f32[1,32], index: 6, kind: input, shape index: {}]   ;;  %s8720_s7 = inlined_call_operand.vmem [shape: f32[32,32], index: 7, kind: input, shape index: {}]   ;;  %s8721_s8 = inlined_call_operand.vmem [shape: f32[1,32], index: 8, kind: input, shape index: {}]   ;;  %s8722_s9 = inlined_call_operand.vmem [shape: f32[256,32], index: 9, kind: output, shape index: {}]  }
   0x1 LB: > { %s4617_s10 = sadd.s32 4294967295, %s5343_s30   ;;  %p4621_p0 = scmp.ge.s32.totalorder %s5343_s30, 1  ;;  %s5343_s30 = sphi %s5401_s30, %s19_s30  }
   0x2   : > { %p288_p1 = scmp.lt.s32.totalorder %s5343_s30, 3 }
   0x4   : > { %p289_p2 = pnand %p4621_p0, %p288_p1 }
   0x6   : > { %292 = sbr.rel (%p289_p2) target bundleno = 1693 (0x69d), region = 56 }
   0xd   : > { %v336_v0 = vld [vmem:[%s8714_s1] sm:$0xff]  ;;  %v337_v1 = vld [vmem:[%s8714_s1 + $0x8] sm:$0xff]  ;;  %v338_v2 = vld [vmem:[%s8714_s1 + $0x10] sm:$0xff]  ;;  %s4622_s17 = sshll.u32 %s4617_s10, 4  ;;  %vm8781_vm0 = vcmask 261120  }
   0xe   : > { %v5032_v3 = vpack.c.bf16 %v337_v1, %v336_v0  ;;  %v339_v4 = vld [vmem:[%s8714_s1 + $0x18] sm:$0xff]  ;;  %p325_p3 = scmp.lt.s32.totalorder %s4622_s17, 31  ;;  %v5498_v22 = vld [vmem:[%s8715_s2] ss:$0 sm:$0xff]  ;;  %v8739_v53 = vmov 683565275  }
   0xf   : > { %v5036_v5 = vpack.c.bf16 %v339_v4, %v338_v2  ;;  %v8737_v55 = vmov 2475754826   ;;  %v8735_v60 = vmov 2131351028   ;;  %v8732_v63 = vmov 2102212464  }
  0x10   : > { %5033 = vmatprep.subr.bf16.mxu0 %v5032_v3  ;;  %s9303_s17 = smov (!%p325_p3, %s4622_s17), 31  ;;  %v8730_v2 = vmov 920167782  }
  0x11   : > { %5035 = vmatpush3.bf16.msra.mxu0 %v5032_v3  ;;  %s4623_s20 = sshll.u32 %s9303_s17, 3 }
  0x12   : > { %5037 = vmatprep.subr.bf16.mxu0 %v5036_v5  ;;  %s5424_s23 = scalar_lea.vmem %s8713_s0, %s4623_s20  ;;  %s5429_s26 = scalar_lea.vmem %s8722_s9, %s4623_s20 }
  0x13   : > { %v356_v6 = vld [vmem:[%s5424_s23] sm:$0xff]  ;;  %v357_v7 = vld [vmem:[%s5424_s23 + $0x8] sm:$0xff]  ;;  %v358_v8 = vld [vmem:[%s5424_s23 + $0x10] sm:$0xff] }
  0x14   : > { %4912 = vmatprep.mubr.msk.f32.mxu0 %vm8781_vm0, %v356_v6  ;;  %2236 = vst.msk [vmem:[%s5429_s26] sm:$0xff] %vm8781_vm0, %v356_v6  ;;  %2237 = vst.msk [vmem:[%s5429_s26 + $0x8] sm:$0xff] %vm8781_vm0, %v357_v7  ;;  %v359_v9 = vld [vmem:[%s5424_s23 + $0x18] sm:$0xff]  ;;  %v360_v10 = vld [vmem:[%s5424_s23 + $0x20] sm:$0xff] }
  0x15   : > { %5039 = vmatpush3.bf16.msra.mxu0 %v5036_v5  ;;  %2238 = vst.msk [vmem:[%s5429_s26 + $0x10] sm:$0xff] %vm8781_vm0, %v358_v8  ;;  %v361_v11 = vld [vmem:[%s5424_s23 + $0x28] sm:$0xff]  ;;  %2239 = vst.msk [vmem:[%s5429_s26 + $0x18] sm:$0xff] %vm8781_vm0, %v359_v9  ;;  %v362_v12 = vld [vmem:[%s5424_s23 + $0x30] sm:$0xff]  ;;  %v8728_v5 = vmov 1326507024  }
  0x16   : > { %2240 = vst.msk [vmem:[%s5429_s26 + $0x20] sm:$0xff] %vm8781_vm0, %v360_v10  ;;  %2241 = vst.msk [vmem:[%s5429_s26 + $0x28] sm:$0xff] %vm8781_vm0, %v361_v11  ;;  %v363_v13 = vld [vmem:[%s5424_s23 + $0x38] sm:$0xff]  ;;  %v364_v14 = vld [vmem:[%s5424_s23 + $0x40] sm:$0xff] }
  0x17   : > { %2242 = vst.msk [vmem:[%s5429_s26 + $0x30] sm:$0xff] %vm8781_vm0, %v362_v12  ;;  %2243 = vst.msk [vmem:[%s5429_s26 + $0x38] sm:$0xff] %vm8781_vm0, %v363_v13  ;;  %v365_v15 = vld [vmem:[%s5424_s23 + $0x48] sm:$0xff]  ;;  %v366_v16 = vld [vmem:[%s5424_s23 + $0x50] sm:$0xff] }
  0x18   : > { %2244 = vst.msk [vmem:[%s5429_s26 + $0x40] sm:$0xff] %vm8781_vm0, %v364_v14  ;;  %v367_v17 = vld [vmem:[%s5424_s23 + $0x58] sm:$0xff]  ;;  %4913 = vmatmul.mubr.msk.f32.vlgmr.msra.gmra.mrb[0].mxu0 %vm8781_vm0, %v357_v7  ;;  %2245 = vst.msk [vmem:[%s5429_s26 + $0x48] sm:$0xff] %vm8781_vm0, %v365_v15  ;;  %v368_v18 = vld [vmem:[%s5424_s23 + $0x60] sm:$0xff] }
  0x19   : > { %2246 = vst.msk [vmem:[%s5429_s26 + $0x50] sm:$0xff] %vm8781_vm0, %v366_v16  ;;  %2247 = vst.msk [vmem:[%s5429_s26 + $0x58] sm:$0xff] %vm8781_vm0, %v367_v17  ;;  %v369_v19 = vld [vmem:[%s5424_s23 + $0x68] sm:$0xff]  ;;  %v370_v20 = vld [vmem:[%s5424_s23 + $0x70] sm:$0xff]  ;;  %4915 = vmatprep.mubr.msk.f32.mxu0 %vm8781_vm0, %v358_v8 }
  0x1a   : > { %2248 = vst.msk [vmem:[%s5429_s26 + $0x60] sm:$0xff] %vm8781_vm0, %v368_v18  ;;  %2249 = vst.msk [vmem:[%s5429_s26 + $0x68] sm:$0xff] %vm8781_vm0, %v369_v19  ;;  %v371_v21 = vld [vmem:[%s5424_s23 + $0x78] sm:$0xff] }
  0x1b   : > { %2250 = vst.msk [vmem:[%s5429_s26 + $0x70] sm:$0xff] %vm8781_vm0, %v370_v20  ;;  %2251 = vst.msk [vmem:[%s5429_s26 + $0x78] sm:$0xff] %vm8781_vm0, %v371_v21 }
  0x1c   : > { %4916 = vmatmul.mubr.msk.f32.gmra.mrb[2].mxu0 %vm8781_vm0, %v359_v9 }
  0x1d   : > { %4918 = vmatprep.mubr.msk.f32.mxu0 %vm8781_vm0, %v360_v10 }
  0x20   : > { %4919 = vmatmul.mubr.msk.f32.gmra.mrb[4].mxu0 %vm8781_vm0, %v361_v11 }
  0x21   : > { %4921 = vmatprep.mubr.msk.f32.mxu0 %vm8781_vm0, %v362_v12 }
  0x24   : > { %4922 = vmatmul.mubr.msk.f32.gmra.mrb[6].mxu0 %vm8781_vm0, %v363_v13 }
  0x25   : > { %4924 = vmatprep.mubr.msk.f32.mxu0 %vm8781_vm0, %v364_v14 }
  0x28   : > { %4925 = vmatmul.mubr.msk.f32.gmra.mrb[8].mxu0 %vm8781_vm0, %v365_v15 }
  0x29   : > { %4927 = vmatprep.mubr.msk.f32.mxu0 %vm8781_vm0, %v366_v16 }
  0x2c   : > { %4928 = vmatmul.mubr.msk.f32.gmra.mrb[10].mxu0 %vm8781_vm0, %v367_v17 }
  0x2d   : > { %4930 = vmatprep.mubr.msk.f32.mxu0 %vm8781_vm0, %v368_v18 }
  0x30   : > { %4931 = vmatmul.mubr.msk.f32.gmra.mrb[12].mxu0 %vm8781_vm0, %v369_v19 }
  0x31   : > { %4933 = vmatprep.mubr.msk.f32.mxu0 %vm8781_vm0, %v370_v20 }
  0x34   : > { %4934 = vmatmul.mubr.msk.f32.gmra.mrb[14].mxu0 %vm8781_vm0, %v371_v21 }
  0xeb   : > { %v4914_v23 = vpop.f32.mrb[0].mxu0 }
  0xec   : > { %v5501_v24 = vadd.f32 %v4914_v23, %v5498_v22  ;;  %v5503_v25 = vpop.f32.mrb[1].mxu0 }
  0xee   : > { %8913 = vst [vmem:[#allocation2_spill] sm:$0xff] %v5501_v24  ;;  %v8727_v26 = vand.u32 2147483647, %v5501_v24  ;;  %v679_v27 = vand.u32 2139095040, %v5501_v24 }
  0xef   : > { %v4917_v28 = vpop.f32.mrb[2].mxu0 }
  0xf0   : > { %v680_v29 = vshrl.u32 %v679_v27, 23  ;;  %v5508_v30 = vadd.f32 %v4917_v28, %v5498_v22  ;;  %v503_v31 = vpop.f32.mrb[3].mxu0  ;;  %v683_v33 = vand.u32 8388607, %v8727_v26 }
  0xf1   : > { %v5513_v34 = vadd.f32 %v5498_v22, %v503_v31 }
  0xf2   : > { %8914 = vst [vmem:[#allocation3_spill] sm:$0xff] %v5508_v30  ;;  %v4647_v32 = vadd.s32 4294967169, %v680_v29  ;;  %v887_v35 = vand.u32 2139095040, %v5508_v30  ;;  %v684_v40 = vor.u32 8388608, %v683_v33  ;;  %v8726_v41 = vand.u32 2147483647, %v5508_v30 }
  0xf3   : > { %8915 = vst [vmem:[#allocation4_spill] sm:$0xff] %v5513_v34  ;;  %v5516_v36 = vpop.f32.mrb[4].mxu0  ;;  %v783_v42 = vand.u32 2139095040, %v5513_v34 }
  0xf4   : > { %v686_v37 = vadd.s32 1, %v4647_v32  ;;  %v888_v38 = vshrl.u32 %v887_v35, 23  ;;  %v5518_v39 = vpop.f32.mrb[5].mxu0  ;;  %v5526_v49 = vshll.u32 %v684_v40, 8  ;;  %v891_v50 = vand.u32 8388607, %v8726_v41 }
  0xf5   : > { %v784_v51 = vshrl.u32 %v783_v42, 23 }
  0xf6   : > { %vm687_vm1 = vcmp.gt.s32.totalorder %v686_v37, 0  ;;  %v4655_v44 = vadd.s32 4294967169, %v888_v38  ;;  %v892_v31 = vor.u32 8388608, %v891_v50 }
  0xf7   : > { %v688_v43 = vsel %vm687_vm1, %v686_v37, 0  ;;  %v5522_v45 = vpop.f32.mrb[6].mxu0  ;;  %v4651_v10 = vadd.s32 4294967169, %v784_v51 }
  0xf8   : > { %v690_v46 = vand.u32 31, %v688_v43  ;;  %v5524_v47 = vpop.f32.mrb[7].mxu0  ;;  %v689_v52 = vshrl.u32 %v688_v43, 5  ;;  %v894_v57 = vadd.s32 1, %v4655_v44 }
  0xf9   : > { %v790_v42 = vadd.s32 1, %v4651_v10 }
  0xfa   : > { %v691_v48 = vsub.s32 32, %v690_v46  ;;  %v693_v54 = vshll.u32 %v8739_v53, %v690_v46  ;;  %v696_v56 = vshll.u32 %v8737_v55, %v690_v46  ;;  %v699_v62 = vshll.u32 %v8735_v60, %v690_v46 }
  0xfb   : > { %v5532_v58 = vpop.f32.mrb[8].mxu0  ;;  %v702_v1 = vshll.u32 %v8732_v63, %v690_v46  ;;  %v705_v4 = vshll.u32 %v8730_v2, %v690_v46  ;;  %vm708_vm2 = vcmp.lt.s32.totalorder %v689_v52, 1  ;;  %vm711_vm3 = vcmp.lt.s32.totalorder %v689_v52, 4 }
  0xfc   : > { %v694_v59 = vshrl.u32 %v8737_v55, %v691_v48  ;;  %v697_v61 = vshrl.u32 %v8735_v60, %v691_v48  ;;  %v700_v0 = vshrl.u32 %v8732_v63, %v691_v48  ;;  %v703_v3 = vshrl.u32 %v8730_v2, %v691_v48  ;;  %v5542_v13 = vpop.f32.mrb[9].mxu0 }
  0xfd   : > { %v706_v6 = vshrl.u32 %v8728_v5, %v691_v48  ;;  %v692_v14 = vshrl.u32 %v8739_v53, %v691_v48  ;;  %vm709_vm4 = vcmp.lt.s32.totalorder %v689_v52, 2  ;;  %vm710_vm5 = vcmp.lt.s32.totalorder %v689_v52, 3 }
  0xfe   : > { %v695_v7 = vor.u32 %v694_v59, %v693_v54  ;;  %v698_v8 = vor.u32 %v697_v61, %v696_v56  ;;  %v701_v9 = vor.u32 %v700_v0, %v699_v62  ;;  %v704_v11 = vor.u32 %v703_v3, %v702_v1 }
  0xff   : > { %v707_v12 = vor.u32 %v706_v6, %v705_v4  ;;  %vm895_vm6 = vcmp.gt.s32.totalorder %v894_v57, 0  ;;  %v5554_v46 = vshll.u32 %v892_v31, 8  ;;  %vm791_vm8 = vcmp.gt.s32.totalorder %v790_v42, 0  ;;  %v5582_v31 = vpop.f32.mrb[10].mxu0 }
 0x100   : > { %v713_v15 = vsel %vm711_vm3, %v701_v9, 2102212464  ;;  %v716_v16 = vsel %vm708_vm2, %v695_v7, %v698_v8  ;;  %v720_v17 = vsel %vm708_vm2, %v698_v8, %v701_v9  ;;  %v717_v18 = vsel %vm711_vm3, %v704_v11, 920167782 }
 0x101   : > { %v721_v19 = vsel %vm711_vm3, %v707_v12, 1326507024  ;;  %v712_v20 = vsel %vm708_vm2, %v692_v14, %v695_v7  ;;  %v714_v21 = vsel %vm710_vm5, %v698_v8, %v713_v15  ;;  %v718_v23 = vsel %vm710_vm5, %v701_v9, %v717_v18 }
 0x102   : > { %v722_v27 = vsel %vm710_vm5, %v704_v11, %v721_v19  ;;  %v719_v28 = vsel %vm709_vm4, %v716_v16, %v718_v23  ;;  %v715_v38 = vsel %vm709_vm4, %v712_v20, %v714_v21  ;;  %v896_v40 = vsel %vm895_vm6, %v894_v57, 0 }
 0x103   : > { %v723_v29 = vsel %vm709_vm4, %v720_v17, %v722_v27  ;;  %v5550_v35 = vmul.u32.u64.low %v5526_v49, %v719_v28  ;;  %v5551_v37 = vmul.u32.u64.high %v5526_v49, %v719_v28, %v5550_v35  ;;  %v897_v43 = vshrl.u32 %v896_v40, 5 }
 0x104   : > { %v5546_v32 = vmul.u32.u64.low %v5526_v49, %v723_v29  ;;  %v5547_v33 = vmul.u32.u64.high %v5526_v49, %v723_v29, %v5546_v32  ;;  %v898_v44 = vand.u32 31, %v896_v40  ;;  %v731_v48 = vmul.u32 %v5526_v49, %v715_v38 }
 0x105   : > { %v734_v50 = vadd.s32 1, %v5551_v37  ;;  %vm916_vm9 = vcmp.lt.s32.totalorder %v897_v43, 1  ;;  %vm917_vm10 = vcmp.lt.s32.totalorder %v897_v43, 2  ;;  %vm918_vm11 = vcmp.lt.s32.totalorder %v897_v43, 3 }
 0x106   : > { %vm733_vm7 = vc.u32 %v5547_v33, %v5550_v35  ;;  %v899_v51 = vsub.s32 32, %v898_v44  ;;  %v901_v52 = vshll.u32 %v8739_v53, %v898_v44  ;;  %v904_v54 = vshll.u32 %v8737_v55, %v898_v44 }
 0x107   : > { %v907_v56 = vshll.u32 %v8735_v60, %v898_v44  ;;  %v735_v57 = vsel %vm733_vm7, %v734_v50, %v5551_v37  ;;  %v910_v59 = vshll.u32 %v8732_v63, %v898_v44  ;;  %v913_v61 = vshll.u32 %v8730_v2, %v898_v44 }
 0x108   : > { %v736_v49 = vadd.s32 %v735_v57, %v731_v48  ;;  %v900_v62 = vshrl.u32 %v8739_v53, %v899_v51  ;;  %v902_v0 = vshrl.u32 %v8737_v55, %v899_v51  ;;  %v905_v1 = vshrl.u32 %v8735_v60, %v899_v51 }
 0x109   : > { %v908_v3 = vshrl.u32 %v8732_v63, %v899_v51  ;;  %v911_v4 = vshrl.u32 %v8730_v2, %v899_v51  ;;  %v914_v6 = vshrl.u32 %v8728_v5, %v899_v51  ;;  %vm919_vm12 = vcmp.lt.s32.totalorder %v897_v43, 4 }
 0x10a   : > { %v737_v7 = vadd.s32 536870912, %v736_v49  ;;  %v903_v8 = vor.u32 %v902_v0, %v901_v52  ;;  %v906_v9 = vor.u32 %v905_v1, %v904_v54  ;;  %v792_v17 = vsel %vm791_vm8, %v790_v42, 0 }
 0x10b   : > { %v909_v10 = vor.u32 %v908_v3, %v907_v56  ;;  %v912_v11 = vor.u32 %v911_v4, %v910_v59  ;;  %v915_v12 = vor.u32 %v914_v6, %v913_v61  ;;  %v8725_v38 = vand.u32 2147483647, %v5513_v34 }
 0x10c   : > { %v5572_v14 = vshrl.u32 %v737_v7, 30  ;;  %v920_v15 = vsel %vm916_vm9, %v900_v62, %v903_v8  ;;  %v924_v16 = vsel %vm916_vm9, %v903_v8, %v906_v9  ;;  %v794_v52 = vand.u32 31, %v792_v17 }
 0x10d   : > { %v921_v18 = vsel %vm919_vm12, %v909_v10, 2102212464  ;;  %v925_v19 = vsel %vm919_vm12, %v912_v11, 920167782  ;;  %v928_v20 = vsel %vm916_vm9, %v906_v9, %v909_v10  ;;  %v929_v21 = vsel %vm919_vm12, %v915_v12, 1326507024 }
 0x10e   : > { %8916 = vst [vmem:[#allocation5_spill] sm:$0xff] %v5572_v14  ;;  %v739_v23 = vshll.u32 %v5572_v14, 30  ;;  %v922_v27 = vsel %vm918_vm11, %v906_v9, %v921_v18  ;;  %v926_v28 = vsel %vm918_vm11, %v909_v10, %v925_v19  ;;  %v930_v29 = vsel %vm918_vm11, %v912_v11, %v929_v21 }
 0x10f   : > { %v927_v32 = vsel %vm917_vm10, %v924_v16, %v926_v28  ;;  %v931_v37 = vsel %vm917_vm10, %v928_v20, %v930_v29  ;;  %v923_v42 = vsel %vm917_vm10, %v920_v15, %v922_v27  ;;  %v787_v57 = vand.u32 8388607, %v8725_v38 }
 0x110   : > { %v5587_v40 = vsub.s32 %v736_v49, %v739_v23  ;;  %v5591_v44 = vmul.u32.u64.low %v5554_v46, %v931_v37  ;;  %v5592_v48 = vmul.u32.u64.high %v5554_v46, %v931_v37, %v5591_v44  ;;  %v939_v56 = vmul.u32 %v5554_v46, %v923_v42 }
 0x111   : > { %v5595_v50 = vmul.u32.u64.low %v5554_v46, %v927_v32  ;;  %v5596_v51 = vmul.u32.u64.high %v5554_v46, %v927_v32, %v5595_v50  ;;  %v793_v59 = vshrl.u32 %v792_v17, 5  ;;  %v795_v43 = vsub.s32 32, %v794_v52 }
 0x112   : > { %v742_v54 = vsub.s32 0, %v5587_v40  ;;  %v797_v61 = vshll.u32 %v8739_v53, %v794_v52  ;;  %v800_v49 = vshll.u32 %v8737_v55, %v794_v52  ;;  %v803_v62 = vshll.u32 %v8735_v60, %v794_v52 }
 0x113   : > { %vm941_vm13 = vc.u32 %v5592_v48, %v5595_v50  ;;  %v942_v1 = vadd.s32 1, %v5596_v51  ;;  %v798_v46 = vshrl.u32 %v8737_v55, %v795_v43  ;;  %v801_v3 = vshrl.u32 %v8735_v60, %v795_v43 }
 0x114   : > { %v4648_v0 = vmin.u32 %v742_v54, %v5587_v40  ;;  %v804_v4 = vshrl.u32 %v8732_v63, %v795_v43  ;;  %v806_v6 = vshll.u32 %v8732_v63, %v794_v52  ;;  %v807_v7 = vshrl.u32 %v8730_v2, %v795_v43 }
 0x115   : > { %v809_v8 = vshll.u32 %v8730_v2, %v794_v52  ;;  %v943_v9 = vsel %vm941_vm13, %v942_v1, %v5596_v51  ;;  %v799_v10 = vor.u32 %v798_v46, %v797_v61  ;;  %v802_v11 = vor.u32 %v801_v3, %v800_v49 }
 0x116   : > { %v810_v12 = vshrl.u32 %v8728_v5, %v795_v43  ;;  %v944_v15 = vadd.s32 %v943_v9, %v939_v56  ;;  %v788_v16 = vor.u32 8388608, %v787_v57  ;;  %v805_v17 = vor.u32 %v804_v4, %v803_v62 }
 0x117   : > { %v808_v18 = vor.u32 %v807_v7, %v806_v6  ;;  %vm812_vm14 = vcmp.lt.s32.totalorder %v793_v59, 1  ;;  %vm814_vm15 = vcmp.lt.s32.totalorder %v793_v59, 3  ;;  %vm815_vm1 = vcmp.lt.s32.totalorder %v793_v59, 4 }
 0x118   : > { %v811_v19 = vor.u32 %v810_v12, %v809_v8  ;;  %v744_v20 = vclz %v4648_v0  ;;  %v945_v21 = vadd.s32 536870912, %v944_v15  ;;  %v820_v23 = vsel %vm812_vm14, %v799_v10, %v802_v11 }
 0x119   : > { %v821_v27 = vsel %vm815_vm1, %v808_v18, 920167782  ;;  %vm813_vm2 = vcmp.lt.s32.totalorder %v793_v59, 2  ;;  %v5622_v29 = vadd.f32 %v5516_v36, %v5498_v22  ;;  %v796_v37 = vshrl.u32 %v8739_v53, %v795_v43 }
 0x11a   : > { %v822_v28 = vsel %vm814_vm15, %v805_v17, %v821_v27  ;;  %v5624_v32 = vshrl.u32 %v945_v21, 30  ;;  %v817_v42 = vsel %vm815_vm1, %v805_v17, 2102212464  ;;  %v824_v44 = vsel %vm812_vm14, %v802_v11, %v805_v17 }
 0x11b   : > { %8917 = vst [vmem:[#allocation6_spill] sm:$0xff] %v5622_v29  ;;  %v823_v51 = vsel %vm813_vm2, %v820_v23, %v822_v28  ;;  %v825_v52 = vsel %vm815_vm1, %v811_v19, 1326507024  ;;  %v828_v54 = vshll.u32 %v788_v16, 8  ;;  %v4649_v56 = vadd.s32 4294967294, %v744_v20 }
 0x11c   : > { %8918 = vst [vmem:[#allocation7_spill] sm:$0xff] %v5624_v32  ;;  %v947_v57 = vshll.u32 %v5624_v32, 30  ;;  %v816_v61 = vsel %vm812_vm14, %v796_v37, %v799_v10  ;;  %v826_v49 = vsel %vm814_vm15, %v808_v18, %v825_v52  ;;  %v818_v36 = vsel %vm814_vm15, %v802_v11, %v817_v42 }
 0x11d   : > { %v827_v62 = vsel %vm813_vm2, %v824_v44, %v826_v49  ;;  %v5634_v0 = vmul.u32.u64.low %v828_v54, %v823_v51  ;;  %v5635_v43 = vmul.u32.u64.high %v828_v54, %v823_v51, %v5634_v0  ;;  %v1095_v46 = vand.u32 2139095040, %v5622_v29 }
 0x11e   : > { %v5638_v1 = vsub.s32 %v944_v15, %v947_v57  ;;  %v5643_v3 = vadd.f32 %v5498_v22, %v5503_v25  ;;  %v5645_v4 = vmul.u32.u64.low %v828_v54, %v827_v62  ;;  %v5646_v6 = vmul.u32.u64.high %v828_v54, %v827_v62, %v5645_v4  ;;  %v5655_v15 = vpop.f32.mrb[11].mxu0 }
 0x11f   : > { %v819_v8 = vsel %vm813_vm2, %v816_v61, %v818_v36  ;;  %v1096_v9 = vshrl.u32 %v1095_v46, 23  ;;  %vm4650_vm3 = vcmp.lt.s32.totalorder %v4649_v56, 0  ;;  %v838_v10 = vadd.s32 1, %v5635_v43 }
 0x120   : > { %8919 = vst [vmem:[#allocation8_spill] sm:$0xff] %v5643_v3  ;;  %v950_v7 = vsub.s32 0, %v5638_v1  ;;  %v5653_v11 = vadd.f32 %v5498_v22, %v5518_v39  ;;  %v575_v25 = vand.u32 2139095040, %v5643_v3  ;;  %v835_v16 = vmul.u32 %v828_v54, %v819_v8 }
 0x121   : > { %v4663_v12 = vadd.s32 4294967169, %v1096_v9  ;;  %vm837_vm4 = vc.u32 %v5646_v6, %v5634_v0  ;;  %v8724_v59 = vand.u32 2147483647, %v5622_v29  ;;  %v747_v17 = vsel %vm4650_vm3, 0, %v4649_v56 }
 0x122   : > { %v4656_v18 = vmin.u32 %v950_v7, %v5638_v1  ;;  %v839_v19 = vsel %vm837_vm4, %v838_v10, %v5635_v43  ;;  %v991_v39 = vand.u32 2139095040, %v5653_v11  ;;  %v748_v23 = vsub.s32 32, %v747_v17 }
 0x123   : > { %v1102_v20 = vadd.s32 1, %v4663_v12  ;;  %v840_v21 = vadd.s32 %v839_v19, %v835_v16  ;;  %v576_v27 = vshrl.u32 %v575_v25, 23  ;;  %v752_v42 = vsub.s32 4294967266, %v747_v17 }
 0x124   : > { %v952_v44 = vclz %v4656_v18  ;;  %v1099_v51 = vand.u32 8388607, %v8724_v59  ;;  %v992_v56 = vshrl.u32 %v991_v39, 23  ;;  %v732_v57 = vadd.s32 %v5550_v35, %v5547_v33 }
 0x125   : > { %vm1103_vm5 = vcmp.gt.s32.totalorder %v1102_v20, 0  ;;  %v841_v28 = vadd.s32 536870912, %v840_v21  ;;  %v749_v61 = vshll.u32 %v5587_v40, %v747_v17  ;;  %v4643_v49 = vadd.s32 4294967169, %v576_v27 }
 0x126   : > { %v1104_v37 = vsel %vm1103_vm5, %v1102_v20, 0  ;;  %v750_v43 = vshrl.u32 %v732_v57, %v748_v23  ;;  %v753_v46 = vadd.s32 127, %v752_v42  ;;  %v4657_v4 = vadd.s32 4294967294, %v952_v44 }
 0x127   : > { %v1106_v52 = vand.u32 31, %v1104_v37  ;;  %v5666_v54 = vshrl.u32 %v841_v28, 30  ;;  %v1100_v7 = vor.u32 8388608, %v1099_v51  ;;  %v4659_v12 = vadd.s32 4294967169, %v992_v56 }
 0x128   : > { %v1105_v17 = vshrl.u32 %v1104_v37, 5  ;;  %v5683_v20 = vor.u32 %v750_v43, %v749_v61  ;;  %v754_v51 = vshll.u32 %v753_v46, 23  ;;  %vm4658_vm6 = vcmp.lt.s32.totalorder %v4657_v4, 0 }
 0x129   : > { %8920 = vst [vmem:[#allocation9_spill] sm:$0xff] %v5666_v54  ;;  %v843_v36 = vshll.u32 %v5666_v54, 30  ;;  %v1107_v62 = vsub.s32 32, %v1106_v52  ;;  %v1109_v25 = vshll.u32 %v8739_v53, %v1106_v52  ;;  %v1112_v33 = vshll.u32 %v8737_v55, %v1106_v52 }
 0x12a   : > { %v1115_v35 = vshll.u32 %v8735_v60, %v1106_v52  ;;  %v1118_v18 = vshll.u32 %v8732_v63, %v1106_v52  ;;  %v1121_v42 = vshll.u32 %v8730_v2, %v1106_v52  ;;  %v1140_v56 = vshll.u32 %v1100_v7, 8 }
 0x12b   : > { %v5672_v8 = vsub.s32 %v840_v21, %v843_v36  ;;  %v1110_v9 = vshrl.u32 %v8737_v55, %v1107_v62  ;;  %v1113_v10 = vshrl.u32 %v8735_v60, %v1107_v62  ;;  %v1116_v40 = vshrl.u32 %v8732_v63, %v1107_v62 }
 0x12c   : > { %v1119_v19 = vshrl.u32 %v8730_v2, %v1107_v62  ;;  %v1122_v44 = vshrl.u32 %v8728_v5, %v1107_v62  ;;  %v998_v37 = vadd.s32 1, %v4659_v12  ;;  %v1108_v57 = vshrl.u32 %v8739_v53, %v1107_v62 }
 0x12d   : > { %v846_v16 = vsub.s32 0, %v5672_v8  ;;  %v1111_v21 = vor.u32 %v1110_v9, %v1109_v25  ;;  %v1114_v39 = vor.u32 %v1113_v10, %v1112_v33  ;;  %v1117_v23 = vor.u32 %v1116_v40, %v1115_v35 }
 0x12e   : > { %v1120_v28 = vor.u32 %v1119_v19, %v1118_v18  ;;  %v1123_v36 = vor.u32 %v1122_v44, %v1121_v42  ;;  %vm1124_vm7 = vcmp.lt.s32.totalorder %v1105_v17, 1  ;;  %vm1127_vm8 = vcmp.lt.s32.totalorder %v1105_v17, 4  ;;  %v5701_v18 = vpop.f32.mrb[12].mxu0 }
 0x12f   : > { %v4652_v27 = vmin.u32 %v846_v16, %v5672_v8  ;;  %vm1126_vm9 = vcmp.lt.s32.totalorder %v1105_v17, 3  ;;  %v1132_v43 = vsel %vm1124_vm7, %v1111_v21, %v1114_v39  ;;  %vm1125_vm10 = vcmp.lt.s32.totalorder %v1105_v17, 2 }
 0x130   : > { %v1133_v9 = vsel %vm1127_vm8, %v1120_v28, 920167782  ;;  %v1129_v10 = vsel %vm1127_vm8, %v1117_v23, 2102212464  ;;  %v1136_v52 = vsel %vm1124_vm7, %v1114_v39, %v1117_v23  ;;  %v5690_v33 = vor.u32 4788187, %v754_v51 }
 0x131   : > { %v848_v61 = vclz %v4652_v27  ;;  %v1134_v25 = vsel %vm1126_vm9, %v1117_v23, %v1133_v9  ;;  %v5693_v46 = vsel %vm4658_vm6, 0, %v4657_v4  ;;  %v1137_v62 = vsel %vm1127_vm8, %v1123_v36, 1326507024 }
 0x132   : > { %v1135_v7 = vsel %vm1125_vm10, %v1132_v43, %v1134_v25  ;;  %v1128_v12 = vsel %vm1124_vm7, %v1108_v57, %v1111_v21  ;;  %v1138_v35 = vsel %vm1126_vm9, %v1120_v28, %v1137_v62  ;;  %v1130_v23 = vsel %vm1126_vm9, %v1114_v39, %v1129_v10 }
 0x133   : > { %v5697_v40 = vmul.u32.u64.low %v1140_v56, %v1135_v7  ;;  %v5698_v16 = vmul.u32.u64.high %v1140_v56, %v1135_v7, %v5697_v40  ;;  %v4653_v19 = vadd.s32 4294967294, %v848_v61  ;;  %v1139_v27 = vsel %vm1125_vm10, %v1136_v52, %v1138_v35 }
 0x134   : > { %vm999_vm11 = vcmp.gt.s32.totalorder %v998_v37, 0  ;;  %v8723_v4 = vand.u32 2147483647, %v5653_v11  ;;  %v5706_v42 = vadd.s32 1, %v4643_v49  ;;  %v940_v51 = vadd.s32 %v5595_v50, %v5592_v48 }
 0x135   : > { %v5708_v44 = vmul.u32.u64.low %v1140_v56, %v1139_v27  ;;  %v5709_v21 = vmul.u32.u64.high %v1140_v56, %v1139_v27, %v5708_v44  ;;  %v1000_v28 = vsel %vm999_vm11, %v998_v37, 0  ;;  %v960_v57 = vsub.s32 4294967266, %v5693_v46 }
 0x136   : > { %v1131_v36 = vsel %vm1125_vm10, %v1128_v12, %v1130_v23  ;;  %v1150_v39 = vadd.s32 1, %v5698_v16  ;;  %v756_v61 = vand.u32 2147483647, %v5690_v33  ;;  %v758_v43 = vcvt.s32.f32 %v5683_v20 }
 0x137   : > { %vm4654_vm12 = vcmp.lt.s32.totalorder %v4653_v19, 0  ;;  %v1002_v49 = vand.u32 31, %v1000_v28  ;;  %v836_v9 = vadd.s32 %v5634_v0, %v5646_v6  ;;  %v995_v37 = vand.u32 8388607, %v8723_v4 }
 0x138   : > { %v5724_v48 = vadd.f32 %v5522_v45, %v5498_v22  ;;  %v5728_v50 = vadd.f32 %v5498_v22, %v5524_v47  ;;  %v956_v17 = vsub.s32 32, %v5693_v46  ;;  %v1147_v10 = vmul.u32 %v1140_v56, %v1131_v36 }
 0x139   : > { %vm1149_vm13 = vc.u32 %v5709_v21, %v5697_v40  ;;  %v1003_v25 = vsub.s32 32, %v1002_v49  ;;  %v5733_v52 = vadd.s32 127, %v960_v57  ;;  %v5735_v0 = vsel %vm4654_vm12, 0, %v4653_v19 }
 0x13a   : > { %8921 = vst [vmem:[#allocation10_spill] sm:$0xff] %v5724_v48  ;;  %8922 = vst [vmem:[#allocation11_spill] sm:$0xff] %v5728_v50  ;;  %v1151_v6 = vsel %vm1149_vm13, %v1150_v39, %v5698_v16  ;;  %v1005_v45 = vshll.u32 %v8739_v53, %v1002_v49  ;;  %v1008_v47 = vshll.u32 %v8737_v55, %v1002_v49  ;;  %v1001_v56 = vshrl.u32 %v1000_v28, 5 }
 0x13b   : > { %v1152_v7 = vadd.s32 %v1151_v6, %v1147_v10  ;;  %v1006_v62 = vshrl.u32 %v8737_v55, %v1003_v25  ;;  %v1009_v12 = vshrl.u32 %v8735_v60, %v1003_v25  ;;  %v1011_v35 = vshll.u32 %v8735_v60, %v1002_v49 }
 0x13c   : > { %v1012_v23 = vshrl.u32 %v8732_v63, %v1003_v25  ;;  %v1014_v27 = vshll.u32 %v8732_v63, %v1002_v49  ;;  %v1015_v16 = vshrl.u32 %v8730_v2, %v1003_v25  ;;  %vm583_vm14 = vcmp.gt.s32.totalorder %v5706_v42, 0 }
 0x13d   : > { %v1153_v19 = vadd.s32 536870912, %v1152_v7  ;;  %v1007_v44 = vor.u32 %v1006_v62, %v1005_v45  ;;  %v1010_v57 = vor.u32 %v1009_v12, %v1008_v47  ;;  %v996_v36 = vor.u32 8388608, %v995_v37 }
 0x13e   : > { %v1013_v39 = vor.u32 %v1012_v23, %v1011_v35  ;;  %v1017_v10 = vshll.u32 %v8730_v2, %v1002_v49  ;;  %v1018_v6 = vshrl.u32 %v8728_v5, %v1003_v25  ;;  %v958_v28 = vshrl.u32 %v940_v51, %v956_v17 }
 0x13f   : > { %v962_v4 = vshll.u32 %v5733_v52, 23  ;;  %v5750_v59 = vshrl.u32 %v1153_v19, 30  ;;  %v1016_v38 = vor.u32 %v1015_v16, %v1014_v27  ;;  %v852_v41 = vsub.s32 32, %v5735_v0 }
 0x140   : > { %v856_v45 = vsub.s32 4294967266, %v5735_v0  ;;  %v1019_v62 = vor.u32 %v1018_v6, %v1017_v10  ;;  %vm1020_vm15 = vcmp.lt.s32.totalorder %v1001_v56, 1  ;;  %vm1023_vm1 = vcmp.lt.s32.totalorder %v1001_v56, 4 }
 0x141   : > { %8923 = vst [vmem:[#allocation12_spill] sm:$0xff] %v5750_v59  ;;  %v1155_v47 = vshll.u32 %v5750_v59, 30  ;;  %v1028_v37 = vsel %vm1020_vm15, %v1007_v44, %v1010_v57  ;;  %v1303_v49 = vand.u32 2139095040, %v5724_v48  ;;  %v1004_v51 = vshrl.u32 %v8739_v53, %v1003_v25 }
 0x142   : > { %vm1022_vm2 = vcmp.lt.s32.totalorder %v1001_v56, 3  ;;  %v1025_v17 = vsel %vm1023_vm1, %v1013_v39, 2102212464  ;;  %v1029_v52 = vsel %vm1023_vm1, %v1016_v38, 920167782  ;;  %vm1021_vm3 = vcmp.lt.s32.totalorder %v1001_v56, 2 }
 0x143   : > { %v5758_v12 = vsub.s32 %v1152_v7, %v1155_v47  ;;  %v1030_v35 = vsel %vm1022_vm2, %v1013_v39, %v1029_v52  ;;  %v1032_v23 = vsel %vm1020_vm15, %v1010_v57, %v1013_v39  ;;  %v854_v27 = vshrl.u32 %v836_v9, %v852_v41 }
 0x144   : > { %v1031_v19 = vsel %vm1021_vm3, %v1028_v37, %v1030_v35  ;;  %v1033_v16 = vsel %vm1023_vm1, %v1019_v62, 1326507024  ;;  %v1036_v10 = vshll.u32 %v996_v36, 8  ;;  %v1024_v26 = vsel %vm1020_vm15, %v1004_v51, %v1007_v44 }
 0x145   : > { %v1158_v6 = vsub.s32 0, %v5758_v12  ;;  %v1026_v5 = vsel %vm1022_vm2, %v1010_v57, %v1025_v17  ;;  %v1034_v25 = vsel %vm1022_vm2, %v1016_v38, %v1033_v16  ;;  %v1304_v47 = vshrl.u32 %v1303_v49, 23 }
 0x146   : > { %v1035_v2 = vsel %vm1021_vm3, %v1032_v23, %v1034_v25  ;;  %v5765_v63 = vmul.u32.u64.low %v1036_v10, %v1031_v19  ;;  %v5766_v7 = vmul.u32.u64.high %v1036_v10, %v1031_v19, %v5765_v63  ;;  %v857_v52 = vadd.s32 127, %v856_v45 }
 0x147   : > { %v4664_v41 = vmin.u32 %v1158_v6, %v5758_v12  ;;  %v5770_v9 = vmul.u32.u64.low %v1036_v10, %v1035_v2  ;;  %v5771_v39 = vmul.u32.u64.high %v1036_v10, %v1035_v2, %v5770_v9  ;;  %v957_v36 = vshll.u32 %v5638_v1, %v5693_v46  ;;  %v5790_v46 = vpop.f32.mrb[13].mxu0 }
 0x148   : > { %v1027_v44 = vsel %vm1021_vm3, %v1024_v26, %v1026_v5  ;;  %v8734_v38 = vand.u32 2147483647, %v5724_v48  ;;  %v4671_v57 = vadd.s32 4294967169, %v1304_v47  ;;  %v5781_v62 = vmul.f32 %v758_v43, %v756_v61 }
 0x149   : > { %v5786_v45 = vsel %vm583_vm14, %v5706_v42, 0  ;;  %v853_v2 = vshll.u32 %v5672_v8, %v5735_v0  ;;  %v1160_v1 = vclz %v4664_v41  ;;  %v5792_v26 = vor.u32 %v958_v28, %v957_v36 }
 0x14a   : > { %v5794_v5 = vor.u32 4788187, %v962_v4  ;;  %v1046_v33 = vadd.s32 1, %v5766_v7  ;;  %v1310_v20 = vadd.s32 1, %v4671_v57  ;;  %v858_v43 = vshll.u32 %v857_v52, 23 }
 0x14b   : > { %v5797_v61 = vor.u32 %v854_v27, %v853_v2  ;;  %v1043_v56 = vmul.u32 %v1036_v10, %v1027_v44  ;;  %vm1045_vm4 = vc.u32 %v5771_v39, %v5765_v63  ;;  %v1307_v8 = vand.u32 8388607, %v8734_v38 }
 0x14c   : > { %v1047_v42 = vsel %vm1045_vm4, %v1046_v33, %v5766_v7  ;;  %vm1311_vm5 = vcmp.gt.s32.totalorder %v1310_v20, 0  ;;  %v1199_v0 = vand.u32 2139095040, %v5728_v50  ;;  %v4665_v4 = vadd.s32 4294967294, %v1160_v1 }
 0x14d   : > { %v1048_v28 = vadd.s32 %v1047_v42, %v1043_v56  ;;  %v1312_v37 = vsel %vm1311_vm5, %v1310_v20, 0  ;;  %v5807_v51 = vand.u32 31, %v5786_v45  ;;  %v964_v35 = vand.u32 2147483647, %v5794_v5 }
 0x14e   : > { %v1314_v17 = vand.u32 31, %v1312_v37  ;;  %v966_v23 = vcvt.s32.f32 %v5792_v26  ;;  %v5811_v27 = vor.u32 4788187, %v858_v43  ;;  %v862_v16 = vcvt.s32.f32 %v5797_v61 }
 0x14f   : > { %8924 = vst [vmem:[#allocation13_spill] sm:$0xff] %v5807_v51  ;;  %v1049_v19 = vadd.s32 536870912, %v1048_v28  ;;  %v1308_v10 = vor.u32 8388608, %v1307_v8  ;;  %v1200_v25 = vshrl.u32 %v1199_v0, 23  ;;  %vm4666_vm6 = vcmp.lt.s32.totalorder %v4665_v4, 0 }
 0x150   : > { %v1315_v6 = vsub.s32 32, %v1314_v17  ;;  %v1317_v47 = vshll.u32 %v8739_v53, %v1314_v17  ;;  %v1320_v52 = vshll.u32 %v8737_v55, %v1314_v17  ;;  %v1323_v36 = vshll.u32 %v8735_v60, %v1314_v17 }
 0x151   : > { %v5814_v7 = vshrl.u32 %v1049_v19, 30  ;;  %v8926_v44 = vmov 2102212464   ;;  %v1313_v1 = vshrl.u32 %v1312_v37, 5  ;;  %v8927_v5 = vmov 920167782  }
 0x152   : > { %v1318_v41 = vshrl.u32 %v8737_v55, %v1315_v6  ;;  %v1321_v9 = vshrl.u32 %v8735_v60, %v1315_v6  ;;  %v1324_v57 = vshrl.u32 %v8926_v44, %v1315_v6  ;;  %v1326_v26 = vshll.u32 %v8926_v44, %v1314_v17 }
 0x153   : > { %8925 = vst [vmem:[#allocation14_spill] sm:$0xff] %v5814_v7  ;;  %v1051_v2 = vshll.u32 %v5814_v7, 30  ;;  %v1327_v33 = vshrl.u32 %v8927_v5, %v1315_v6  ;;  %v860_v20 = vand.u32 2147483647, %v5811_v27  ;;  %v1348_v0 = vshll.u32 %v1308_v10, 8 }
 0x154   : > { %v1319_v61 = vor.u32 %v1318_v41, %v1317_v47  ;;  %v1322_v43 = vor.u32 %v1321_v9, %v1320_v52  ;;  %v1325_v56 = vor.u32 %v1324_v57, %v1323_v36  ;;  %v8741_v19 = vand.u32 2147483647, %v5728_v50 }
 0x155   : > { %v5826_v42 = vsub.s32 %v1048_v28, %v1051_v2  ;;  %v1328_v8 = vor.u32 %v1327_v33, %v1326_v26  ;;  %v5830_v38 = vsel %vm4666_vm6, 0, %v4665_v4  ;;  %v1329_v37 = vshll.u32 %v8927_v5, %v1314_v17 }
 0x156   : > { %v8928_v60 = vmov 1326507024   ;;  %v4667_v49 = vadd.s32 4294967169, %v1200_v25  ;;  %vm1332_vm7 = vcmp.lt.s32.totalorder %v1313_v1, 1  ;;  %vm1334_vm8 = vcmp.lt.s32.totalorder %v1313_v1, 3 }
 0x157   : > { %v1330_v55 = vshrl.u32 %v8928_v60, %v1315_v6  ;;  %v1054_v53 = vsub.s32 0, %v5826_v42  ;;  %vm1335_vm9 = vcmp.lt.s32.totalorder %v1313_v1, 4  ;;  %vm8814_vm10 = vcmp.lt.s32.totalorder %v5501_v24, 0 }
 0x158   : > { %v1337_v27 = vsel %vm1335_vm9, %v1325_v56, 2102212464  ;;  %v1340_v10 = vsel %vm1332_vm7, %v1319_v61, %v1322_v43  ;;  %v1341_v47 = vsel %vm1335_vm9, %v1328_v8, 920167782  ;;  %v1168_v4 = vsub.s32 4294967266, %v5830_v38 }
 0x159   : > { %v1331_v28 = vor.u32 %v1330_v55, %v1329_v37  ;;  %v8929_v52 = vmov 683565275   ;;  %vm1333_vm11 = vcmp.lt.s32.totalorder %v1313_v1, 2  ;;  %v1342_v17 = vsel %vm1334_vm8, %v1325_v56, %v1341_v47 }
 0x15a   : > { %v1316_v41 = vshrl.u32 %v8929_v52, %v1315_v6  ;;  %v4660_v25 = vmin.u32 %v1054_v53, %v5826_v42  ;;  %v1343_v9 = vsel %vm1333_vm11, %v1340_v10, %v1342_v17  ;;  %v1344_v36 = vsel %vm1332_vm7, %v1322_v43, %v1325_v56 }
 0x15b   : > { %v1345_v57 = vsel %vm1335_vm9, %v1331_v28, 1326507024  ;;  %v1338_v2 = vsel %vm1334_vm8, %v1322_v43, %v1337_v27  ;;  %v1203_v33 = vand.u32 8388607, %v8741_v19  ;;  %v1206_v53 = vadd.s32 1, %v4667_v49 }
 0x15c   : > { %v1336_v55 = vsel %vm1332_vm7, %v1316_v41, %v1319_v61  ;;  %v1346_v26 = vsel %vm1334_vm8, %v1328_v8, %v1345_v57  ;;  %v5849_v37 = vmul.u32.u64.low %v1348_v0, %v1343_v9  ;;  %v5850_v47 = vmul.u32.u64.high %v1348_v0, %v1343_v9, %v5849_v37  ;;  %v5857_v61 = vpop.f32.mrb[14].mxu0 }
 0x15d   : > { %v1347_v6 = vsel %vm1333_vm11, %v1344_v36, %v1346_v26  ;;  %v1164_v10 = vsub.s32 32, %v5830_v38  ;;  %v1169_v56 = vadd.s32 127, %v1168_v4  ;;  %v5860_v43 = vshrl.u32 %v5786_v45, 5 }
 0x15e   : > { %v5854_v28 = vmul.u32.u64.low %v1348_v0, %v1347_v6  ;;  %v5855_v17 = vmul.u32.u64.high %v1348_v0, %v1347_v6, %v5854_v28  ;;  %v5862_v8 = vmul.f32 %v966_v23, %v964_v35  ;;  %v1056_v27 = vclz %v4660_v25 }
 0x15f   : > { %vm1207_vm12 = vcmp.gt.s32.totalorder %v1206_v53, 0  ;;  %v5864_v41 = vmul.f32 %v862_v16, %v860_v20  ;;  %v1148_v49 = vadd.s32 %v5697_v40, %v5709_v21  ;;  %v1339_v9 = vsel %vm1333_vm11, %v1336_v55, %v1338_v2 }
 0x160   : > { %v1208_v4 = vsel %vm1207_vm12, %v1206_v53, 0  ;;  %v5870_v36 = vsub.s32 32, %v5807_v51  ;;  %v5874_v57 = vshll.u32 %v8926_v44, %v5807_v51  ;;  %v5878_v45 = vshll.u32 %v8927_v5, %v5807_v51 }
 0x161   : > { %v1358_v35 = vadd.s32 1, %v5850_v47  ;;  %v8931_v23 = vxor.u32 2147483648, %v5781_v62  ;;  %v1166_v21 = vshrl.u32 %v1148_v49, %v1164_v10  ;;  %v1170_v16 = vshll.u32 %v1169_v56, 23 }
 0x162   : > { %8930 = vst [vmem:[#allocation15_spill] sm:$0xff] %v5870_v36  ;;  %v1204_v1 = vor.u32 8388608, %v1203_v33  ;;  %v5888_v20 = vadd.s32 4294967294, %v1056_v27  ;;  %v1355_v25 = vmul.u32 %v1348_v0, %v1339_v9  ;;  %vm1357_vm13 = vc.u32 %v5855_v17, %v5849_v37 }
 0x163   : > { %v5886_v40 = vsel %vm8814_vm10, %v8931_v23, %v5781_v62  ;;  %v1210_v55 = vand.u32 31, %v1208_v4  ;;  %v968_v2 = vxor.u32 2147483648, %v5862_v8  ;;  %v1165_v6 = vshll.u32 %v5758_v12, %v5830_v38 }
 0x164   : > { %v1359_v62 = vsel %vm1357_vm13, %v1358_v35, %v5850_v47  ;;  %v1209_v10 = vshrl.u32 %v1208_v4, 5  ;;  %v5899_v33 = vadd.f32 %v5532_v58, %v5498_v22  ;;  %v5903_v28 = vor.u32 4788187, %v1170_v16 }
 0x165   : > { %v1360_v53 = vadd.s32 %v1359_v62, %v1355_v25  ;;  %v1211_v56 = vsub.s32 32, %v1210_v55  ;;  %v5901_v0 = vor.u32 %v1166_v21, %v1165_v6  ;;  %v1213_v27 = vshll.u32 %v8929_v52, %v1210_v55 }
 0x166   : > { %v5906_v49 = vshll.u32 %v1204_v1, 8  ;;  %vm4662_vm14 = vcmp.lt.s32.totalorder %v5888_v20, 0  ;;  %v8932_v38 = vmov 2475754826   ;;  %v8933_v4 = vmov 2131351028  }
 0x167   : > { %v1361_v12 = vadd.s32 536870912, %v1360_v53  ;;  %v1214_v47 = vshrl.u32 %v8932_v38, %v1211_v56  ;;  %v1216_v9 = vshll.u32 %v8932_v38, %v1210_v55  ;;  %v1217_v35 = vshrl.u32 %v8933_v4, %v1211_v56 }
 0x168   : > { %vm8796_vm15 = vcmp.lt.s32.totalorder %v5508_v30, 0  ;;  %v1219_v22 = vshll.u32 %v8933_v4, %v1210_v55  ;;  %v1220_v58 = vshrl.u32 %v8926_v44, %v1211_v56  ;;  %v1222_v23 = vshll.u32 %v8926_v44, %v1210_v55 }
 0x169   : > { %v1223_v21 = vshrl.u32 %v8927_v5, %v1211_v56  ;;  %v5917_v16 = vshrl.u32 %v1361_v12, 30  ;;  %v1215_v1 = vor.u32 %v1214_v47, %v1213_v27  ;;  %v1218_v25 = vor.u32 %v1217_v35, %v1216_v9 }
 0x16a   : > { %vm1228_vm1 = vcmp.lt.s32.totalorder %v1209_v10, 1  ;;  %v8935_v6 = vand.u32 2147483647, %v5501_v24  ;;  %v8936_v62 = vmov 0  ;;  %v1221_v19 = vor.u32 %v1220_v58, %v1219_v22 }
 0x16b   : > { %8934 = vst [vmem:[#allocation16_spill] sm:$0xff] %v5917_v16  ;;  %v1224_v26 = vor.u32 %v1223_v21, %v1222_v23  ;;  %v1225_v59 = vshll.u32 %v8927_v5, %v1210_v55  ;;  %v1226_v7 = vshrl.u32 %v8928_v60, %v1211_v56  ;;  %vm8809_vm3 = vcmp.lt.s32.totalorder %v5513_v34, 0 }
 0x16c   : > { %vm5921_vm2 = vcmp.le.f32.partialorder %v8935_v6, 0.7853982  ;;  %v1363_v12 = vshll.u32 %v5917_v16, 30  ;;  %vm1230_vm4 = vcmp.lt.s32.totalorder %v1209_v10, 3  ;;  %vm1231_vm5 = vcmp.lt.s32.totalorder %v1209_v10, 4 }
 0x16d   : > { %v8937_v62 = vsel %vm5921_vm2, 4294967295, %v8936_v62  ;;  %v1236_v27 = vsel %vm1228_vm1, %v1215_v1, %v1218_v25  ;;  %v8939_v47 = vand.u32 2147483647, %v5508_v30  ;;  %v8940_v9 = vmov 0 }
 0x16e   : > { %8938 = vst [vmem:[#allocation17_spill] sm:$0xff] %v8937_v62  ;;  %v1212_v35 = vshrl.u32 %v8929_v52, %v1211_v56  ;;  %v1227_v22 = vor.u32 %v1226_v7, %v1225_v59  ;;  %v1233_v55 = vsel %vm1231_vm5, %v1221_v19, 2102212464  ;;  %v1237_v58 = vsel %vm1231_vm5, %v1224_v26, 920167782 }
 0x16f   : > { %vm5932_vm6 = vcmp.le.f32.partialorder %v8939_v47, 0.7853982  ;;  %v5937_v23 = vsub.s32 %v1360_v53, %v1363_v12  ;;  %vm1229_vm7 = vcmp.lt.s32.totalorder %v1209_v10, 2  ;;  %v1238_v21 = vsel %vm1230_vm4, %v1221_v19, %v1237_v58 }
 0x170   : > { %v8941_v9 = vsel %vm5932_vm6, 4294967295, %v8940_v9  ;;  %v1240_v6 = vsel %vm1228_vm1, %v1218_v25, %v1221_v19  ;;  %v8943_v16 = vand.u32 2147483647, %v5513_v34  ;;  %v8944_v32 = vmov 0 }
 0x171   : > { %8942 = vst [vmem:[#allocation18_spill] sm:$0xff] %v8941_v9  ;;  %v1232_v47 = vsel %vm1228_vm1, %v1212_v35, %v1215_v1  ;;  %v1234_v56 = vsel %vm1230_vm4, %v1218_v25, %v1233_v55  ;;  %v1239_v59 = vsel %vm1229_vm7, %v1236_v27, %v1238_v21  ;;  %v1241_v7 = vsel %vm1231_vm5, %v1227_v22, 1326507024  ;;  %v5963_v25 = vld [vmem:[%s8715_s2] ss:$0 sm:$0xff] }
 0x172   : > { %vm5943_vm8 = vcmp.le.f32.partialorder %v8943_v16, 0.7853982  ;;  %v1366_v53 = vsub.s32 0, %v5937_v23  ;;  %v1242_v12 = vsel %vm1230_vm4, %v1224_v26, %v1241_v7  ;;  %v1172_v16 = vand.u32 2147483647, %v5903_v28  ;;  %v5969_v26 = vpop.f32.mrb[15].mxu0 }
 0x173   : > { %v8945_v32 = vsel %vm5943_vm8, 4294967295, %v8944_v32  ;;  %v5953_v58 = vmul.u32.u64.low %v5906_v49, %v1239_v59  ;;  %v5954_v19 = vmul.u32.u64.high %v5906_v49, %v1239_v59, %v5953_v58  ;;  %v1243_v54 = vsel %vm1229_vm7, %v1240_v6, %v1242_v12 }
 0x174   : > { %8946 = vst [vmem:[#allocation19_spill] sm:$0xff] %v8945_v32  ;;  %v1511_v1 = vand.u32 2139095040, %v5899_v33  ;;  %v5967_v27 = vadd.f32 %v5963_v25, %v5542_v13  ;;  %v969_v35 = vsel %vm8796_vm15, %v968_v2, %v5862_v8  ;;  %v4672_v28 = vmin.u32 %v1366_v53, %v5937_v23 }
 0x175   : > { %v5976_v22 = vmul.u32.u64.low %v5906_v49, %v1243_v54  ;;  %v5977_v55 = vmul.u32.u64.high %v5906_v49, %v1243_v54, %v5976_v22  ;;  %v1174_v21 = vcvt.s32.f32 %v5901_v0  ;;  %v5983_v6 = vsel %vm4662_vm14, 0, %v5888_v20 }
 0x176   : > { %v1235_v13 = vsel %vm1229_vm7, %v1232_v47, %v1234_v56  ;;  %v1512_v59 = vshrl.u32 %v1511_v1, 23  ;;  %v764_v8 = vsel %vm5921_vm2, %v5501_v24, %v5886_v40  ;;  %v599_v2 = vshrl.u32 %v8927_v5, %v5870_v36 }
 0x177   : > { %v1368_v54 = vclz %v4672_v28  ;;  %v1254_v7 = vadd.s32 1, %v5954_v19  ;;  %v8947_v0 = vxor.u32 2147483648, %v5864_v41  ;;  %v1175_v10 = vmul.f32 %v1174_v21, %v1172_v16 }
 0x178   : > { %v4679_v47 = vadd.s32 4294967169, %v1512_v59  ;;  %v1407_v56 = vand.u32 2139095040, %v5967_v27  ;;  %v972_v40 = vsel %vm5932_vm6, %v5508_v30, %v969_v35  ;;  %v1064_v53 = vsub.s32 4294967266, %v5983_v6 }
 0x179   : > { %v865_v20 = vsel %vm8809_vm3, %v8947_v0, %v5864_v41  ;;  %v1251_v12 = vmul.u32 %v5906_v49, %v1235_v13  ;;  %vm1253_vm9 = vc.u32 %v5977_v55, %v5953_v58  ;;  %5206 = vcosq.f32 %v764_v8 }
 0x17a   : > { %v1255_v1 = vsel %vm1253_vm9, %v1254_v7, %v5954_v19  ;;  %v1518_v28 = vadd.s32 1, %v4679_v47  ;;  %v1408_v41 = vshrl.u32 %v1407_v56, 23  ;;  %5208 = vsinq.f32 %v764_v8 }
 0x17b   : > { %v868_v16 = vsel %vm5943_vm8, %v5513_v34, %v865_v20  ;;  %v4673_v22 = vadd.s32 4294967294, %v1368_v54  ;;  %v1256_v21 = vadd.s32 %v1255_v1, %v1251_v12  ;;  %v6012_v35 = vshrl.u32 %v8928_v60, %v5870_v36 }
 0x17c   : > { %5210 = vcosq.f32 %v972_v40  ;;  %v1176_v49 = vxor.u32 2147483648, %v1175_v10  ;;  %vm1519_vm11 = vcmp.gt.s32.totalorder %v1518_v28, 0  ;;  %v1065_v13 = vadd.s32 127, %v1064_v53 }
 0x17d   : > { %5212 = vsinq.f32 %v972_v40  ;;  %v1257_v59 = vadd.s32 536870912, %v1256_v21  ;;  %v8752_v19 = vand.u32 2147483647, %v5899_v33  ;;  %v6016_v8 = vor.u32 %v599_v2, %v5874_v57 }
 0x17e   : > { %5214 = vcosq.f32 %v868_v16  ;;  %v1520_v7 = vsel %vm1519_vm11, %v1518_v28, 0  ;;  %v4675_v0 = vadd.s32 4294967169, %v1408_v41  ;;  %vm8794_vm12 = vcmp.lt.s32.totalorder %v5622_v29, 0 }
 0x17f   : > { %5216 = vsinq.f32 %v868_v16  ;;  %vm4674_vm13 = vcmp.lt.s32.totalorder %v4673_v22, 0  ;;  %v6019_v54 = vshrl.u32 %v1257_v59, 30  ;;  %v6023_v20 = vsel %vm8794_vm12, %v1176_v49, %v1175_v10 }
 0x180   : > { %v1044_v47 = vadd.s32 %v5765_v63, %v5771_v39  ;;  %v1060_v56 = vsub.s32 32, %v5983_v6  ;;  %v1522_v57 = vand.u32 31, %v1520_v7  ;;  %v1061_v2 = vshll.u32 %v5826_v42, %v5983_v6 }
 0x181   : > { %8948 = vst [vmem:[#allocation20_spill] sm:$0xff] %v6019_v54  ;;  %v1066_v40 = vshll.u32 %v1065_v13, 23  ;;  %v1259_v53 = vshll.u32 %v6019_v54, 30  ;;  %v1515_v12 = vand.u32 8388607, %v8752_v19  ;;  %v6033_v1 = vsel %vm4674_vm13, 0, %v4673_v22 }
 0x182   : > { %v1523_v28 = vsub.s32 32, %v1522_v57  ;;  %v1414_v41 = vadd.s32 1, %v4675_v0  ;;  %v6038_v63 = vshrl.u32 %v1520_v7, 5  ;;  %v1525_v39 = vshll.u32 %v8929_v52, %v1522_v57 }
 0x183   : > { %v6036_v16 = vsub.s32 %v1256_v21, %v1259_v53  ;;  %v1528_v42 = vshll.u32 %v8932_v38, %v1522_v57  ;;  %v6042_v6 = vpop.eup %5206  ;;  %v1531_v22 = vshll.u32 %v8933_v4, %v1522_v57  ;;  %v1534_v7 = vshll.u32 %v8926_v44, %v1522_v57 }
 0x184   : > { %8949 = vst [vmem:[#allocation21_spill] sm:$0xff] %v6042_v6  ;;  %v1526_v49 = vshrl.u32 %v8932_v38, %v1523_v28  ;;  %v1529_v13 = vshrl.u32 %v8933_v4, %v1523_v28  ;;  %v1532_v59 = vshrl.u32 %v8926_v44, %v1523_v28  ;;  %v6048_v19 = vpop.eup %5208  ;;  %v1535_v0 = vshrl.u32 %v8927_v5, %v1523_v28 }
 0x185   : > { %8950 = vst [vmem:[#allocation22_spill] sm:$0xff] %v6048_v19  ;;  %v1262_v21 = vsub.s32 0, %v6036_v16  ;;  %v1537_v53 = vshll.u32 %v8927_v5, %v1522_v57  ;;  %v1538_v30 = vshrl.u32 %v8928_v60, %v1523_v28  ;;  %v1062_v34 = vshrl.u32 %v1044_v47, %v1060_v56 }
 0x186   : > { %v6054_v10 = vpop.eup %5210  ;;  %v1527_v54 = vor.u32 %v1526_v49, %v1525_v39  ;;  %v1530_v9 = vor.u32 %v1529_v13, %v1528_v42  ;;  %v1533_v6 = vor.u32 %v1532_v59, %v1531_v22  ;;  %v1067_v62 = vor.u32 4788187, %v1066_v40 }
 0x187   : > { %8951 = vst [vmem:[#allocation23_spill] sm:$0xff] %v6054_v10  ;;  %v6057_v32 = vpop.eup %5212  ;;  %v4668_v19 = vmin.u32 %v1262_v21, %v6036_v16  ;;  %v1536_v24 = vor.u32 %v1535_v0, %v1534_v7  ;;  %v1376_v36 = vsub.s32 4294967266, %v6033_v1  ;;  %v1516_v51 = vor.u32 8388608, %v1515_v12 }
 0x188   : > { %8952 = vst [vmem:[#allocation24_spill] sm:$0xff] %v6057_v32  ;;  %v6060_v14 = vpop.eup %5214  ;;  %v1539_v57 = vor.u32 %v1538_v30, %v1537_v53  ;;  %v8954_v10 = vand.u32 2147483647, %v5967_v27  ;;  %vm1540_vm14 = vcmp.lt.s32.totalorder %v6038_v63, 1  ;;  %vm1542_vm1 = vcmp.lt.s32.totalorder %v6038_v63, 3 }
 0x189   : > { %8953 = vst [vmem:[#allocation25_spill] sm:$0xff] %v6060_v14  ;;  %v6065_v42 = vpop.eup %5216  ;;  %vm1543_vm4 = vcmp.lt.s32.totalorder %v6038_v63, 4  ;;  %vm1415_vm5 = vcmp.gt.s32.totalorder %v1414_v41, 0  ;;  %v1548_v47 = vsel %vm1540_vm14, %v1527_v54, %v1530_v9  ;;  %v1552_v40 = vsel %vm1540_vm14, %v1530_v9, %v1533_v6 }
 0x18a   : > { %v1411_v39 = vand.u32 8388607, %v8954_v10  ;;  %8955 = vst [vmem:[#allocation26_spill] sm:$0xff] %v6065_v42  ;;  %v1549_v56 = vsel %vm1543_vm4, %v1536_v24, 920167782  ;;  %v1063_v12 = vor.u32 %v1062_v34, %v1061_v2  ;;  %v1264_v10 = vclz %v4668_v19 }
 0x18b   : > { %v1553_v30 = vsel %vm1543_vm4, %v1539_v57, 1326507024  ;;  %v1068_v49 = vand.u32 2147483647, %v1067_v62  ;;  %v1550_v13 = vsel %vm1542_vm1, %v1533_v6, %v1549_v56  ;;  %vm1541_vm7 = vcmp.lt.s32.totalorder %v6038_v63, 2 }
 0x18c   : > { %v1545_v22 = vsel %vm1543_vm4, %v1533_v6, 2102212464  ;;  %v1554_v59 = vsel %vm1542_vm1, %v1536_v24, %v1553_v30  ;;  %v1556_v21 = vshll.u32 %v1516_v51, 8  ;;  %v1524_v7 = vshrl.u32 %v8929_v52, %v1523_v28 }
 0x18d   : > { %v1551_v0 = vsel %vm1541_vm7, %v1548_v47, %v1550_v13  ;;  %v1555_v34 = vsel %vm1541_vm7, %v1552_v40, %v1554_v59  ;;  %v1416_v62 = vsel %vm1415_vm5, %v1414_v41, 0  ;;  %v6085_v19 = vadd.s32 127, %v1376_v36 }
 0x18e   : > { %v6087_v2 = vmul.u32.u64.low %v1556_v21, %v1555_v34  ;;  %v6088_v53 = vmul.u32.u64.high %v1556_v21, %v1555_v34, %v6087_v2  ;;  %v1412_v6 = vor.u32 8388608, %v1411_v39  ;;  %v1070_v57 = vcvt.s32.f32 %v1063_v12 }
 0x18f   : > { %v4669_v56 = vadd.s32 4294967294, %v1264_v10  ;;  %v1544_v24 = vsel %vm1540_vm14, %v1524_v7, %v1527_v54  ;;  %v1546_v51 = vsel %vm1542_vm1, %v1530_v9, %v1545_v22  ;;  %v1356_v28 = vadd.s32 %v5849_v37, %v5855_v17 }
 0x190   : > { %v6096_v47 = vmul.u32.u64.low %v1556_v21, %v1551_v0  ;;  %v6097_v40 = vmul.u32.u64.high %v1556_v21, %v1551_v0, %v6096_v47  ;;  %v1418_v36 = vand.u32 31, %v1416_v62  ;;  %v6100_v41 = vmul.f32 %v1070_v57, %v1068_v49 }
 0x191   : > { %v1372_v39 = vsub.s32 32, %v6033_v1  ;;  %v6105_v30 = vadd.f32 %v5963_v25, %v5582_v31  ;;  %v6109_v54 = vadd.f32 %v5963_v25, %v5655_v15  ;;  %v1378_v9 = vshll.u32 %v6085_v19, 23 }
 0x192   : > { %v1547_v37 = vsel %vm1541_vm7, %v1544_v24, %v1546_v51  ;;  %v1419_v17 = vsub.s32 32, %v1418_v36  ;;  %v6114_v12 = vshll.u32 %v1412_v6, 8  ;;  %vm4670_vm9 = vcmp.lt.s32.totalorder %v4669_v56, 0 }
 0x193   : > { %vm1565_vm11 = vc.u32 %v6088_v53, %v6096_v47  ;;  %v1417_v49 = vshrl.u32 %v1416_v62, 5  ;;  %v1421_v31 = vshll.u32 %v8929_v52, %v1418_v36  ;;  %v1566_v10 = vadd.s32 1, %v6097_v40 }
 0x194   : > { %v1422_v15 = vshrl.u32 %v8932_v38, %v1419_v17  ;;  %v1424_v13 = vshll.u32 %v8932_v38, %v1418_v36  ;;  %v1425_v22 = vshrl.u32 %v8933_v4, %v1419_v17  ;;  %v1563_v63 = vmul.u32 %v1556_v21, %v1547_v37 }
 0x195   : > { %v1427_v59 = vshll.u32 %v8933_v4, %v1418_v36  ;;  %v1428_v7 = vshrl.u32 %v8926_v44, %v1419_v17  ;;  %v1430_v0 = vshll.u32 %v8926_v44, %v1418_v36  ;;  %v1567_v34 = vsel %vm1565_vm11, %v1566_v10, %v6097_v40 }
 0x196   : > { %v1423_v62 = vor.u32 %v1422_v15, %v1421_v31  ;;  %v1426_v19 = vor.u32 %v1425_v22, %v1424_v13  ;;  %v1431_v2 = vshrl.u32 %v8927_v5, %v1419_v17  ;;  %v6129_v6 = vsel %vm4670_vm9, 0, %v4669_v56 }
 0x197   : > { %v1568_v57 = vadd.s32 %v1567_v34, %v1563_v63  ;;  %v1429_v24 = vor.u32 %v1428_v7, %v1427_v59  ;;  %v1719_v51 = vand.u32 2139095040, %v6105_v30  ;;  %v8956_v21 = vand.u32 2147483647, %v5622_v29 }
 0x198   : > { %v8957_v37 = vmov 0  ;;  %v1432_v32 = vor.u32 %v1431_v2, %v1430_v0  ;;  %v1433_v40 = vshll.u32 %v8927_v5, %v1418_v36  ;;  %v1434_v31 = vshrl.u32 %v8928_v60, %v1419_v17 }
 0x199   : > { %vm6134_vm13 = vcmp.le.f32.partialorder %v8956_v21, 0.7853982  ;;  %vm1436_vm14 = vcmp.lt.s32.totalorder %v1417_v49, 1  ;;  %v1569_v10 = vadd.s32 536870912, %v1568_v57  ;;  %v1420_v56 = vshrl.u32 %v8929_v52, %v1419_v17 }
 0x19a   : > { %v8958_v37 = vsel %vm6134_vm13, 4294967295, %v8957_v37  ;;  %vm1438_vm1 = vcmp.lt.s32.totalorder %v1417_v49, 3  ;;  %vm1439_vm4 = vcmp.lt.s32.totalorder %v1417_v49, 4  ;;  %v1435_v15 = vor.u32 %v1434_v31, %v1433_v40 }
 0x19b   : > { %8959 = vst [vmem:[#allocation27_spill] sm:$0xff] %v8958_v37  ;;  %v1441_v13 = vsel %vm1439_vm4, %v1429_v24, 2102212464  ;;  %v1444_v22 = vsel %vm1436_vm14, %v1423_v62, %v1426_v19  ;;  %v1445_v63 = vsel %vm1439_vm4, %v1432_v32, 920167782  ;;  %v1272_v59 = vsub.s32 4294967266, %v6129_v6 }
 0x19c   : > { %v6142_v7 = vshrl.u32 %v1569_v10, 30  ;;  %vm1437_vm5 = vcmp.lt.s32.totalorder %v1417_v49, 2  ;;  %v1446_v0 = vsel %vm1438_vm1, %v1429_v24, %v1445_v63  ;;  %v1440_v36 = vsel %vm1436_vm14, %v1420_v56, %v1423_v62 }
 0x19d   : > { %v1447_v34 = vsel %vm1437_vm5, %v1444_v22, %v1446_v0  ;;  %v1448_v2 = vsel %vm1436_vm14, %v1426_v19, %v1429_v24  ;;  %v1449_v21 = vsel %vm1439_vm4, %v1435_v15, 1326507024  ;;  %v1442_v14 = vsel %vm1438_vm1, %v1426_v19, %v1441_v13 }
 0x19e   : > { %8960 = vst [vmem:[#allocation28_spill] sm:$0xff] %v6142_v7  ;;  %v1571_v17 = vshll.u32 %v6142_v7, 30  ;;  %v1450_v40 = vsel %vm1438_vm1, %v1432_v32, %v1449_v21  ;;  %v1720_v31 = vshrl.u32 %v1719_v51, 23  ;;  %vm8795_vm7 = vcmp.lt.s32.totalorder %v5653_v11, 0 }
 0x19f   : > { %v1374_v42 = vshrl.u32 %v1356_v28, %v1372_v39  ;;  %v1451_v10 = vsel %vm1437_vm5, %v1448_v2, %v1450_v40  ;;  %v6152_v3 = vmul.u32.u64.low %v6114_v12, %v1447_v34  ;;  %v6153_v63 = vmul.u32.u64.high %v6114_v12, %v1447_v34, %v6152_v3 }
 0x1a0   : > { %v1379_v62 = vor.u32 4788187, %v1378_v9  ;;  %v6156_v24 = vsub.s32 %v1568_v57, %v1571_v17  ;;  %v6159_v56 = vmul.u32.u64.low %v6114_v12, %v1451_v10  ;;  %v6160_v15 = vmul.u32.u64.high %v6114_v12, %v1451_v10, %v6159_v56 }
 0x1a1   : > { %v1373_v32 = vshll.u32 %v5937_v23, %v6033_v1  ;;  %v1273_v19 = vadd.s32 127, %v1272_v59  ;;  %v1443_v28 = vsel %vm1437_vm5, %v1440_v36, %v1442_v14  ;;  %v4687_v39 = vadd.s32 4294967169, %v1720_v31 }
 0x1a2   : > { %v6169_v51 = vsel %vm6134_vm13, %v5622_v29, %v6023_v20  ;;  %v1574_v9 = vsub.s32 0, %v6156_v24  ;;  %v8778_v57 = vand.u32 2147483647, %v6105_v30  ;;  %v1615_v13 = vand.u32 2139095040, %v6109_v54 }
 0x1a3   : > { %v1072_v22 = vxor.u32 2147483648, %v6100_v41  ;;  %v1375_v0 = vor.u32 %v1374_v42, %v1373_v32  ;;  %v1462_v23 = vadd.s32 1, %v6153_v63  ;;  %v1726_v1 = vadd.s32 1, %v4687_v39 }
 0x1a4   : > { %v1380_v14 = vand.u32 2147483647, %v1379_v62  ;;  %v4680_v49 = vmin.u32 %v1574_v9, %v6156_v24  ;;  %v1459_v59 = vmul.u32 %v6114_v12, %v1443_v28  ;;  %vm1461_vm9 = vc.u32 %v6160_v15, %v6152_v3 }
 0x1a5   : > { %v1268_v20 = vsub.s32 32, %v6129_v6  ;;  %v1274_v36 = vshll.u32 %v1273_v19, 23  ;;  %v1463_v34 = vsel %vm1461_vm9, %v1462_v23, %v6153_v63  ;;  %vm1727_vm11 = vcmp.gt.s32.totalorder %v1726_v1, 0 }
 0x1a6   : > { %v1464_v2 = vadd.s32 %v1463_v34, %v1459_v59  ;;  %v1723_v42 = vand.u32 8388607, %v8778_v57  ;;  %v1728_v21 = vsel %vm1727_vm11, %v1726_v1, 0  ;;  %v1616_v17 = vshrl.u32 %v1615_v13, 23 }
 0x1a7   : > { %v1382_v40 = vcvt.s32.f32 %v1375_v0  ;;  %v1252_v31 = vadd.s32 %v5953_v58, %v5977_v55  ;;  %v1576_v12 = vclz %v4680_v49  ;;  %v1730_v10 = vand.u32 31, %v1728_v21 }
 0x1a8   : > { %5218 = vcosq.f32 %v6169_v51  ;;  %v8961_v62 = vand.u32 2147483647, %v5653_v11  ;;  %v1073_v63 = vsel %vm8795_vm7, %v1072_v22, %v6100_v41  ;;  %v1465_v32 = vadd.s32 536870912, %v1464_v2 }
 0x1a9   : > { %v6196_v19 = vmul.f32 %v1382_v40, %v1380_v14  ;;  %v1269_v58 = vshll.u32 %v6036_v16, %v6129_v6  ;;  %v1270_v55 = vshrl.u32 %v1252_v31, %v1268_v20  ;;  %v1731_v28 = vsub.s32 32, %v1730_v10 }
 0x1aa   : > { %vm6189_vm14 = vcmp.le.f32.partialorder %v8961_v62, 0.7853982  ;;  %v6200_v39 = vor.u32 4788187, %v1274_v36  ;;  %v6202_v9 = vshrl.u32 %v1465_v32, 30  ;;  %v1724_v13 = vor.u32 8388608, %v1723_v42 }
 0x1ab   : > { %v4683_v0 = vadd.s32 4294967169, %v1616_v17  ;;  %v4681_v23 = vadd.s32 4294967294, %v1576_v12  ;;  %v1729_v1 = vshrl.u32 %v1728_v21, 5  ;;  %v1734_v49 = vshrl.u32 %v8932_v38, %v1731_v28 }
 0x1ac   : > { %8964 = vst [vmem:[#allocation29_spill] sm:$0xff] %v6202_v9  ;;  %v1737_v41 = vshrl.u32 %v8933_v4, %v1731_v28  ;;  %v1467_v22 = vshll.u32 %v6202_v9, 30  ;;  %v1733_v14 = vshll.u32 %v8929_v52, %v1730_v10  ;;  %v1736_v16 = vshll.u32 %v8932_v38, %v1730_v10 }
 0x1ad   : > { %v1739_v6 = vshll.u32 %v8933_v4, %v1730_v10  ;;  %v1740_v59 = vshrl.u32 %v8926_v44, %v1731_v28  ;;  %v1742_v20 = vshll.u32 %v8926_v44, %v1730_v10  ;;  %v1743_v36 = vshrl.u32 %v8927_v5, %v1731_v28 }
 0x1ae   : > { %v1745_v34 = vshll.u32 %v8927_v5, %v1730_v10  ;;  %v6214_v42 = vsub.s32 %v1464_v2, %v1467_v22  ;;  %v1735_v21 = vor.u32 %v1734_v49, %v1733_v14  ;;  %v1738_v17 = vor.u32 %v1737_v41, %v1736_v16 }
 0x1af   : > { %v1746_v40 = vshrl.u32 %v8928_v60, %v1731_v28  ;;  %v6220_v31 = vsel %vm6189_vm14, %v5653_v11, %v1073_v63  ;;  %v1384_v12 = vxor.u32 2147483648, %v6196_v19  ;;  %v1741_v62 = vor.u32 %v1740_v59, %v1739_v6 }
 0x1b0   : > { %v1744_v32 = vor.u32 %v1743_v36, %v1742_v20  ;;  %v1271_v57 = vor.u32 %v1270_v55, %v1269_v58  ;;  %v1276_v7 = vand.u32 2147483647, %v6200_v39  ;;  %v1470_v10 = vsub.s32 0, %v6214_v42 }
 0x1b1   : > { %v1747_v2 = vor.u32 %v1746_v40, %v1745_v34  ;;  %vm1748_vm1 = vcmp.lt.s32.totalorder %v1729_v1, 1  ;;  %v1764_v49 = vshll.u32 %v1724_v13, 8  ;;  %v1622_v22 = vadd.s32 1, %v4683_v0 }
 0x1b2   : > { %v6226_v14 = vpop.eup %5218  ;;  %vm4682_vm4 = vcmp.lt.s32.totalorder %v4681_v23, 0  ;;  %vm1750_vm5 = vcmp.lt.s32.totalorder %v1729_v1, 3  ;;  %vm1751_vm9 = vcmp.lt.s32.totalorder %v1729_v1, 4  ;;  %v1756_v63 = vsel %vm1748_vm1, %v1735_v21, %v1738_v17 }
 0x1b3   : > { %8965 = vst [vmem:[#allocation30_spill] sm:$0xff] %v6226_v14  ;;  %v1753_v16 = vsel %vm1751_vm9, %v1741_v62, 2102212464  ;;  %v1757_v6 = vsel %vm1751_vm9, %v1744_v32, 920167782  ;;  %v1760_v58 = vsel %vm1748_vm1, %v1738_v17, %v1741_v62  ;;  %v4676_v39 = vmin.u32 %v1470_v10, %v6214_v42 }
 0x1b4   : > { %v1761_v55 = vsel %vm1751_vm9, %v1747_v2, 1326507024  ;;  %v1732_v59 = vshrl.u32 %v8929_v52, %v1731_v28  ;;  %vm1749_vm11 = vcmp.lt.s32.totalorder %v1729_v1, 2  ;;  %v1758_v13 = vsel %vm1750_vm5, %v1741_v62, %v1757_v6 }
 0x1b5   : > { %v6233_v0 = vsel %vm4682_vm4, 0, %v4681_v23  ;;  %v1759_v20 = vsel %vm1749_vm11, %v1756_v63, %v1758_v13  ;;  %v1762_v36 = vsel %vm1750_vm5, %v1744_v32, %v1761_v55  ;;  %vm1623_vm0 = vcmp.gt.s32.totalorder %v1622_v22, 0 }
 0x1b6   : > { %v1752_v34 = vsel %vm1748_vm1, %v1732_v59, %v1735_v21  ;;  %v1754_v40 = vsel %vm1750_vm5, %v1738_v17, %v1753_v16  ;;  %v1763_v2 = vsel %vm1749_vm11, %v1760_v58, %v1762_v36  ;;  %v1624_v41 = vsel %vm1623_vm0, %v1622_v22, 0 }
 0x1b7   : > { %v6240_v10 = vmul.u32.u64.low %v1764_v49, %v1763_v2  ;;  %v6241_v9 = vmul.u32.u64.high %v1764_v49, %v1763_v2, %v6240_v10  ;;  %v6243_v28 = vmul.u32.u64.low %v1764_v49, %v1759_v20  ;;  %v6244_v14 = vmul.u32.u64.high %v1764_v49, %v1759_v20, %v6243_v28 }
 0x1b8   : > { %5220 = vsinq.f32 %v6169_v51  ;;  %vm8785_vm4 = vcmp.lt.s32.totalorder %v5724_v48, 0  ;;  %v1472_v23 = vclz %v4676_v39  ;;  %v1626_v62 = vand.u32 31, %v1624_v41 }
 0x1b9   : > { %v1278_v32 = vcvt.s32.f32 %v1271_v57  ;;  %v1580_v21 = vsub.s32 32, %v6233_v0  ;;  %v1755_v17 = vsel %vm1749_vm11, %v1752_v34, %v1754_v40  ;;  %v8966_v22 = vand.u32 2147483647, %v6109_v54 }
 0x1ba   : > { %5222 = vcosq.f32 %v6220_v31  ;;  %v6259_v51 = vsel %vm8785_vm4, %v1384_v12, %v6196_v19  ;;  %v1584_v6 = vsub.s32 4294967266, %v6233_v0  ;;  %v1564_v1 = vadd.s32 %v6096_v47, %v6088_v53 }
 0x1bb   : > { %v1619_v63 = vand.u32 8388607, %v8966_v22  ;;  %v6262_v57 = vmul.f32 %v1278_v32, %v1276_v7  ;;  %vm1773_vm0 = vc.u32 %v6241_v9, %v6243_v28  ;;  %v1774_v58 = vadd.s32 1, %v6244_v14 }
 0x1bc   : > { %v4677_v55 = vadd.s32 4294967294, %v1472_v23  ;;  %v1771_v39 = vmul.u32 %v1764_v49, %v1755_v17  ;;  %v1627_v59 = vsub.s32 32, %v1626_v62  ;;  %v6271_v13 = vadd.f32 %v5963_v25, %v5701_v18 }
 0x1bd   : > { %v1581_v19 = vshll.u32 %v6156_v24, %v6233_v0  ;;  %v1582_v7 = vshrl.u32 %v1564_v1, %v1580_v21  ;;  %v1775_v12 = vsel %vm1773_vm0, %v1774_v58, %v6244_v14  ;;  %v1620_v20 = vor.u32 8388608, %v1619_v63 }
 0x1be   : > { %v1585_v53 = vadd.s32 127, %v1584_v6  ;;  %v1776_v47 = vadd.s32 %v1775_v12, %v1771_v39  ;;  %v1629_v36 = vshll.u32 %v8929_v52, %v1626_v62  ;;  %v1632_v34 = vshll.u32 %v8932_v38, %v1626_v62 }
 0x1bf   : > { %v1630_v49 = vshrl.u32 %v8932_v38, %v1627_v59  ;;  %v1633_v40 = vshrl.u32 %v8933_v4, %v1627_v59  ;;  %v1635_v18 = vshll.u32 %v8933_v4, %v1626_v62  ;;  %v1636_v2 = vshrl.u32 %v8926_v44, %v1627_v59 }
 0x1c0   : > { %vm4678_vm1 = vcmp.lt.s32.totalorder %v4677_v55, 0  ;;  %v1777_v24 = vadd.s32 536870912, %v1776_v47  ;;  %v1625_v0 = vshrl.u32 %v1624_v41, 5  ;;  %v1638_v14 = vshll.u32 %v8926_v44, %v1626_v62 }
 0x1c1   : > { %v1631_v10 = vor.u32 %v1630_v49, %v1629_v36  ;;  %v1634_v23 = vor.u32 %v1633_v40, %v1632_v34  ;;  %v1637_v32 = vor.u32 %v1636_v2, %v1635_v18  ;;  %v1639_v21 = vshrl.u32 %v8927_v5, %v1627_v59 }
 0x1c2   : > { %v6284_v17 = vpop.eup %5220  ;;  %v8968_v22 = vand.u32 2147483647, %v5724_v48  ;;  %v8969_v63 = vmov 0  ;;  %v1586_v6 = vshll.u32 %v1585_v53, 23  ;;  %v6292_v1 = vshrl.u32 %v1777_v24, 30 }
 0x1c3   : > { %8967 = vst [vmem:[#allocation31_spill] sm:$0xff] %v6284_v17  ;;  %v1641_v41 = vshll.u32 %v8927_v5, %v1626_v62  ;;  %v1642_v58 = vshrl.u32 %v8928_v60, %v1627_v59  ;;  %v6296_v39 = vsel %vm4678_vm1, 0, %v4677_v55  ;;  %v1640_v12 = vor.u32 %v1639_v21, %v1638_v14 }
 0x1c4   : > { %vm6288_vm5 = vcmp.le.f32.partialorder %v8968_v22, 0.7853982  ;;  %8972 = vst [vmem:[#allocation33_spill] sm:$0xff] %v6292_v1  ;;  %v1660_v36 = vshll.u32 %v1620_v20, 8  ;;  %v1927_v34 = vand.u32 2139095040, %v6271_v13  ;;  %v6299_v49 = vpop.eup %5222  ;;  %v1779_v40 = vshll.u32 %v6292_v1, 30 }
 0x1c5   : > { %v8970_v63 = vsel %vm6288_vm5, 4294967295, %v8969_v63  ;;  %8973 = vst [vmem:[#allocation34_spill] sm:$0xff] %v6299_v49  ;;  %v1643_v18 = vor.u32 %v1642_v58, %v1641_v41  ;;  %vm1644_vm9 = vcmp.lt.s32.totalorder %v1625_v0, 1  ;;  %vm1647_vm11 = vcmp.lt.s32.totalorder %v1625_v0, 4 }
 0x1c6   : > { %8971 = vst [vmem:[#allocation32_spill] sm:$0xff] %v8970_v63  ;;  %vm1646_vm0 = vcmp.lt.s32.totalorder %v1625_v0, 3  ;;  %v1649_v53 = vsel %vm1647_vm11, %v1637_v32, 2102212464  ;;  %v1652_v2 = vsel %vm1644_vm9, %v1631_v10, %v1634_v23  ;;  %v1653_v62 = vsel %vm1647_vm11, %v1640_v12, 920167782 }
 0x1c7   : > { %v1480_v24 = vsub.s32 4294967266, %v6296_v39  ;;  %v1628_v55 = vshrl.u32 %v8929_v52, %v1627_v59  ;;  %vm1645_vm1 = vcmp.lt.s32.totalorder %v1625_v0, 2  ;;  %v1654_v20 = vsel %vm1646_vm0, %v1637_v32, %v1653_v62 }
 0x1c8   : > { %vm607_vm4 = vcmp.lt.s32.totalorder %v5860_v43, 4  ;;  %v6307_v14 = vsub.s32 %v1776_v47, %v1779_v40  ;;  %v1655_v21 = vsel %vm1645_vm1, %v1652_v2, %v1654_v20  ;;  %v1656_v22 = vsel %vm1644_vm9, %v1634_v23, %v1637_v32  ;;  %v341_v47 = vld [vmem:[%s8716_s3] sm:$0xff] }
 0x1c9   : > { %v1657_v41 = vsel %vm1647_vm11, %v1643_v18, 1326507024  ;;  %v1583_v58 = vor.u32 %v1582_v7, %v1581_v19  ;;  %v1648_v16 = vsel %vm1644_vm9, %v1628_v55, %v1631_v10  ;;  %v1650_v1 = vsel %vm1646_vm0, %v1634_v23, %v1649_v53  ;;  %v342_v19 = vld [vmem:[%s8716_s3 + $0x8] sm:$0xff] }
 0x1ca   : > { %v1658_v17 = vsel %vm1646_vm0, %v1640_v12, %v1657_v41  ;;  %v1587_v59 = vor.u32 4788187, %v1586_v6  ;;  %v6315_v62 = vmul.u32.u64.low %v1660_v36, %v1655_v21  ;;  %v6316_v37 = vmul.u32.u64.high %v1660_v36, %v1655_v21, %v6315_v62 }
 0x1cb   : > { %v1659_v49 = vsel %vm1645_vm1, %v1656_v22, %v1658_v17  ;;  %v1476_v7 = vsub.s32 32, %v6296_v39  ;;  %v1481_v10 = vadd.s32 127, %v1480_v24  ;;  %v1388_v17 = vsel %vm6288_vm5, %v5724_v48, %v6259_v51 }
 0x1cc   : > { %v6326_v23 = vmul.u32.u64.low %v1660_v36, %v1659_v49  ;;  %v6327_v32 = vmul.u32.u64.high %v1660_v36, %v1659_v49, %v6326_v23  ;;  %v1782_v6 = vsub.s32 0, %v6307_v14  ;;  %v1651_v12 = vsel %vm1645_vm1, %v1648_v16, %v1650_v1 }
 0x1cd   : > { %v1928_v40 = vshrl.u32 %v1927_v34, 23  ;;  %v1280_v18 = vxor.u32 2147483648, %v6262_v57  ;;  %v1460_v53 = vadd.s32 %v6152_v3, %v6160_v15  ;;  %v8792_v2 = vand.u32 2147483647, %v6271_v13 }
 0x1ce   : > { %v5040_v24 = vpack.c.bf16 %v342_v19, %v341_v47  ;;  %v1588_v49 = vand.u32 2147483647, %v1587_v59  ;;  %v1590_v55 = vcvt.s32.f32 %v1583_v58  ;;  %v1670_v20 = vadd.s32 1, %v6316_v37 }
 0x1cf   : > { %v4695_v21 = vadd.s32 4294967169, %v1928_v40  ;;  %v1478_v22 = vshrl.u32 %v1460_v53, %v1476_v7  ;;  %v1482_v51 = vshll.u32 %v1481_v10, 23  ;;  %v1667_v41 = vmul.u32 %v1660_v36, %v1651_v12 }
 0x1d0   : > { %vm1669_vm9 = vc.u32 %v6327_v32, %v6315_v62  ;;  %5041 = vmatprep.subr.bf16.mxu1 %v5040_v24  ;;  %v4688_v16 = vmin.u32 %v1782_v6, %v6307_v14  ;;  %v6346_v15 = vadd.f32 %v5963_v25, %v5790_v46  ;;  %v6351_v1 = vsel %vm607_vm4, %v6016_v8, 920167782 }
 0x1d1   : > { %v1671_v0 = vsel %vm1669_vm9, %v1670_v20, %v6316_v37  ;;  %v1934_v3 = vadd.s32 1, %v4695_v21  ;;  %5043 = vmatpush3.bf16.msra.mxu1 %v5040_v24  ;;  %5224 = vsinq.f32 %v6220_v31  ;;  %v1477_v36 = vshll.u32 %v6214_v42, %v6296_v39 }
 0x1d2   : > { %v1672_v34 = vadd.s32 %v1671_v0, %v1667_v41  ;;  %5226 = vcosq.f32 %v1388_v17  ;;  %vm8791_vm11 = vcmp.lt.s32.totalorder %v5728_v50, 0  ;;  %v6357_v37 = vmul.f32 %v1590_v55, %v1588_v49 }
 0x1d3   : > { %vm1935_vm0 = vcmp.gt.s32.totalorder %v1934_v3, 0  ;;  %v1281_v46 = vsel %vm8791_vm11, %v1280_v18, %v6262_v57  ;;  %v6362_v58 = vor.u32 %v1478_v22, %v1477_v36  ;;  %v6364_v59 = vor.u32 4788187, %v1482_v51 }
 0x1d4   : > { %v1673_v47 = vadd.s32 536870912, %v1672_v34  ;;  %v1784_v31 = vclz %v4688_v16  ;;  %v1931_v42 = vand.u32 8388607, %v8792_v2  ;;  %v1936_v39 = vsel %vm1935_vm0, %v1934_v3, 0 }
 0x1d5   : > { %v1823_v19 = vand.u32 2139095040, %v6346_v15  ;;  %v8974_v7 = vor.u32 %v6012_v35, %v5878_v45  ;;  %5228 = vsinq.f32 %v1388_v17  ;;  %v8975_v57 = vand.u32 2147483647, %v5728_v50 }
 0x1d6   : > { %v8976_v23 = vmov 0  ;;  %v6382_v6 = vshrl.u32 %v1673_v47, 30  ;;  %v6392_v35 = vadd.s32 %v6243_v28, %v6241_v9  ;;  %v1938_v17 = vand.u32 31, %v1936_v39 }
 0x1d7   : > { %v6374_v10 = vsel %vm607_vm4, %v8974_v7, 1326507024  ;;  %vm6378_vm1 = vcmp.le.f32.partialorder %v8975_v57, 0.7853982  ;;  %v1484_v40 = vand.u32 2147483647, %v6364_v59  ;;  %v1486_v18 = vcvt.s32.f32 %v6362_v58 }
 0x1d8   : > { %v8977_v23 = vsel %vm6378_vm1, 4294967295, %v8976_v23  ;;  %8979 = vst [vmem:[#allocation36_spill] sm:$0xff] %v6382_v6  ;;  %v6387_v12 = vsel %vm6378_vm1, %v5728_v50, %v1281_v46  ;;  %v1675_v53 = vshll.u32 %v6382_v6, 30  ;;  %v6399_v24 = vadd.f32 %v5963_v25, %v5857_v61 }
 0x1d9   : > { %8978 = vst [vmem:[#allocation35_spill] sm:$0xff] %v8977_v23  ;;  %v4689_v49 = vadd.s32 4294967294, %v1784_v31  ;;  %v1932_v55 = vor.u32 8388608, %v1931_v42  ;;  %v1939_v20 = vsub.s32 32, %v1938_v17  ;;  %v1824_v21 = vshrl.u32 %v1823_v19, 23 }
 0x1da   : > { %8980 = vst [vmem:[#allocation37_spill] sm:$0xff] %v6399_v24  ;;  %v6401_v22 = vsub.s32 %v1672_v34, %v1675_v53  ;;  %v1937_v51 = vshrl.u32 %v1936_v39, 5  ;;  %v1941_v9 = vshll.u32 %v8929_v52, %v1938_v17  ;;  %v1944_v28 = vshll.u32 %v8932_v38, %v1938_v17 }
 0x1db   : > { %v1942_v41 = vshrl.u32 %v8932_v38, %v1939_v20  ;;  %v1945_v16 = vshrl.u32 %v8933_v4, %v1939_v20  ;;  %v1947_v0 = vshll.u32 %v8933_v4, %v1938_v17  ;;  %v1948_v61 = vshrl.u32 %v8926_v44, %v1939_v20  ;;  %v6409_v3 = vpop.eup %5224 }
 0x1dc   : > { %8981 = vst [vmem:[#allocation38_spill] sm:$0xff] %v6409_v3  ;;  %v1678_v36 = vsub.s32 0, %v6401_v22  ;;  %v1950_v34 = vshll.u32 %v8926_v44, %v1938_v17  ;;  %v1951_v46 = vshrl.u32 %v8927_v5, %v1939_v20  ;;  %v1953_v58 = vshll.u32 %v8927_v5, %v1938_v17  ;;  %v6415_v59 = vpop.eup %5226 }
 0x1dd   : > { %8982 = vst [vmem:[#allocation39_spill] sm:$0xff] %v6415_v59  ;;  %v1943_v47 = vor.u32 %v1942_v41, %v1941_v9  ;;  %v1946_v31 = vor.u32 %v1945_v16, %v1944_v28  ;;  %v1949_v42 = vor.u32 %v1948_v61, %v1947_v0  ;;  %v1954_v39 = vshrl.u32 %v8928_v60, %v1939_v20 }
 0x1de   : > { %vm4690_vm9 = vcmp.lt.s32.totalorder %v4689_v49, 0  ;;  %v4684_v19 = vmin.u32 %v1678_v36, %v6401_v22  ;;  %v1952_v7 = vor.u32 %v1951_v46, %v1950_v34  ;;  %vm1956_vm0 = vcmp.lt.s32.totalorder %v1937_v51, 1 }
 0x1df   : > { %v1955_v53 = vor.u32 %v1954_v39, %v1953_v58  ;;  %vm1959_vm11 = vcmp.lt.s32.totalorder %v1937_v51, 4  ;;  %v4691_v2 = vadd.s32 4294967169, %v1824_v21  ;;  %v6420_v45 = vpop.eup %5228  ;;  %v1940_v59 = vshrl.u32 %v8929_v52, %v1939_v20 }
 0x1e0   : > { %8983 = vst [vmem:[#allocation40_spill] sm:$0xff] %v6420_v45  ;;  %v1680_v17 = vclz %v4684_v19  ;;  %vm1958_vm12 = vcmp.lt.s32.totalorder %v1937_v51, 3  ;;  %v1961_v9 = vsel %vm1959_vm11, %v1949_v42, 2102212464  ;;  %v1964_v28 = vsel %vm1956_vm0, %v1943_v47, %v1946_v31 }
 0x1e1   : > { %v1965_v41 = vsel %vm1959_vm11, %v1952_v7, 920167782  ;;  %v1968_v16 = vsel %vm1956_vm0, %v1946_v31, %v1949_v42  ;;  %v1969_v0 = vsel %vm1959_vm11, %v1955_v53, 1326507024  ;;  %v6426_v61 = vsel %vm4690_vm9, 0, %v4689_v49 }
 0x1e2   : > { %v4685_v36 = vadd.s32 4294967294, %v1680_v17  ;;  %v1966_v34 = vsel %vm1958_vm12, %v1949_v42, %v1965_v41  ;;  %v1972_v46 = vshll.u32 %v1932_v55, 8  ;;  %vm1957_vm7 = vcmp.lt.s32.totalorder %v1937_v51, 2 }
 0x1e3   : > { %v1960_v21 = vsel %vm1956_vm0, %v1940_v59, %v1943_v47  ;;  %v1962_v58 = vsel %vm1958_vm12, %v1946_v31, %v1961_v9  ;;  %v1970_v39 = vsel %vm1958_vm12, %v1952_v7, %v1969_v0  ;;  %v1967_v20 = vsel %vm1957_vm7, %v1964_v28, %v1966_v34 }
 0x1e4   : > { %vm4686_vm15 = vcmp.lt.s32.totalorder %v4685_v36, 0  ;;  %v1971_v19 = vsel %vm1957_vm7, %v1968_v16, %v1970_v39  ;;  %v1830_v57 = vadd.s32 1, %v4691_v2  ;;  %v1792_v45 = vsub.s32 4294967266, %v6426_v61 }
 0x1e5   : > { %v6430_v6 = vmul.u32.u64.low %v1972_v46, %v1971_v19  ;;  %v6431_v63 = vmul.u32.u64.high %v1972_v46, %v1971_v19, %v6430_v6  ;;  %v8984_v49 = vand.u32 2147483647, %v6346_v15  ;;  %v6435_v17 = vmul.f32 %v1486_v18, %v1484_v40 }
 0x1e6   : > { %v1963_v55 = vsel %vm1957_vm7, %v1960_v21, %v1962_v58  ;;  %vm1831_vm11 = vcmp.gt.s32.totalorder %v1830_v57, 0  ;;  %v2135_v51 = vand.u32 2139095040, %v6399_v24  ;;  %v6438_v59 = vsel %vm4686_vm15, 0, %v4685_v36 }
 0x1e7   : > { %v1827_v53 = vand.u32 8388607, %v8984_v49  ;;  %v6440_v47 = vmul.u32.u64.low %v1972_v46, %v1967_v20  ;;  %v6441_v31 = vmul.u32.u64.high %v1972_v46, %v1967_v20, %v6440_v47  ;;  %v1832_v2 = vsel %vm1831_vm11, %v1830_v57, 0 }
 0x1e8   : > { %v1668_v42 = vadd.s32 %v6315_v62, %v6327_v32  ;;  %v1834_v6 = vand.u32 31, %v1832_v2  ;;  %v6449_v40 = vadd.f32 %v5963_v25, %v5969_v26  ;;  %v1788_v18 = vsub.s32 32, %v6426_v61 }
 0x1e9   : > { %v1789_v9 = vshll.u32 %v6307_v14, %v6426_v61  ;;  %v1793_v28 = vadd.s32 127, %v1792_v45  ;;  %v1828_v41 = vor.u32 8388608, %v1827_v53  ;;  %v1688_v16 = vsub.s32 4294967266, %v6438_v59 }
 0x1ea   : > { %v1979_v57 = vmul.u32 %v1972_v46, %v1963_v55  ;;  %vm1981_vm15 = vc.u32 %v6431_v63, %v6440_v47  ;;  %v1835_v62 = vsub.s32 32, %v1834_v6  ;;  %v1982_v32 = vadd.s32 1, %v6441_v31 }
 0x1eb   : > { %v1833_v0 = vshrl.u32 %v1832_v2, 5  ;;  %v1837_v25 = vshll.u32 %v8929_v52, %v1834_v6  ;;  %v2136_v26 = vshrl.u32 %v2135_v51, 23  ;;  %v1840_v34 = vshll.u32 %v8932_v38, %v1834_v6 }
 0x1ec   : > { %v1838_v36 = vshrl.u32 %v8932_v38, %v1835_v62  ;;  %v1843_v14 = vshll.u32 %v8933_v4, %v1834_v6  ;;  %v1846_v45 = vshll.u32 %v8926_v44, %v1834_v6  ;;  %v1983_v61 = vsel %vm1981_vm15, %v1982_v32, %v6441_v31 }
 0x1ed   : > { %v1841_v46 = vshrl.u32 %v8933_v4, %v1835_v62  ;;  %v1844_v21 = vshrl.u32 %v8926_v44, %v1835_v62  ;;  %v1847_v58 = vshrl.u32 %v8927_v5, %v1835_v62  ;;  %v1790_v39 = vshrl.u32 %v6392_v35, %v1788_v18 }
 0x1ee   : > { %v1984_v20 = vadd.s32 %v1983_v61, %v1979_v57  ;;  %v1839_v19 = vor.u32 %v1838_v36, %v1837_v25  ;;  %v1849_v49 = vshll.u32 %v8927_v5, %v1834_v6  ;;  %v1850_v2 = vshrl.u32 %v8928_v60, %v1835_v62 }
 0x1ef   : > { %v1842_v53 = vor.u32 %v1841_v46, %v1840_v34  ;;  %v1845_v55 = vor.u32 %v1844_v21, %v1843_v14  ;;  %v1848_v51 = vor.u32 %v1847_v58, %v1846_v45  ;;  %v1794_v7 = vshll.u32 %v1793_v28, 23 }
 0x1f0   : > { %v1684_v31 = vsub.s32 32, %v6438_v59  ;;  %v1985_v32 = vadd.s32 536870912, %v1984_v20  ;;  %v1868_v23 = vshll.u32 %v1828_v41, 8  ;;  %v1689_v48 = vadd.s32 127, %v1688_v16 }
 0x1f1   : > { %v1851_v3 = vor.u32 %v1850_v2, %v1849_v49  ;;  %vm1852_vm12 = vcmp.lt.s32.totalorder %v1833_v0, 1  ;;  %v4703_v50 = vadd.s32 4294967169, %v2136_v26  ;;  %vm1854_vm7 = vcmp.lt.s32.totalorder %v1833_v0, 3 }
 0x1f2   : > { %v6471_v29 = vshrl.u32 %v1985_v32, 30  ;;  %vm1855_vm9 = vcmp.lt.s32.totalorder %v1833_v0, 4  ;;  %v1860_v35 = vsel %vm1852_vm12, %v1839_v19, %v1842_v53  ;;  %v1864_v57 = vsel %vm1852_vm12, %v1842_v53, %v1845_v55 }
 0x1f3   : > { %v1857_v6 = vsel %vm1855_vm9, %v1845_v55, 2102212464  ;;  %v1861_v18 = vsel %vm1855_vm9, %v1848_v51, 920167782  ;;  %v1865_v25 = vsel %vm1855_vm9, %v1851_v3, 1326507024  ;;  %v1836_v36 = vshrl.u32 %v8929_v52, %v1835_v62 }
 0x1f4   : > { %v1987_v28 = vshll.u32 %v6471_v29, 30  ;;  %vm1853_vm0 = vcmp.lt.s32.totalorder %v1833_v0, 2  ;;  %v1862_v41 = vsel %vm1854_vm7, %v1845_v55, %v1861_v18  ;;  %v6478_v16 = vor.u32 %v1790_v39, %v1789_v9  ;;  %v344_v39 = vld [vmem:[%s8716_s3 + $0x18] sm:$0xff] }
 0x1f5   : > { %v6480_v26 = vor.u32 4788187, %v1794_v7  ;;  %v1863_v34 = vsel %vm1853_vm0, %v1860_v35, %v1862_v41  ;;  %v1866_v14 = vsel %vm1854_vm7, %v1848_v51, %v1865_v25  ;;  %v1856_v61 = vsel %vm1852_vm12, %v1836_v36, %v1839_v19  ;;  %v343_v7 = vld [vmem:[%s8716_s3 + $0x10] sm:$0xff] }
 0x1f6   : > { %v6484_v45 = vsub.s32 %v1984_v20, %v1987_v28  ;;  %v1858_v3 = vsel %vm1854_vm7, %v1842_v53, %v1857_v6  ;;  %v1867_v46 = vsel %vm1853_vm0, %v1864_v57, %v1866_v14  ;;  %v1686_v62 = vshrl.u32 %v1668_v42, %v1684_v31 }
 0x1f7   : > { %v6489_v21 = vmul.u32.u64.low %v1868_v23, %v1867_v46  ;;  %v6490_v58 = vmul.u32.u64.high %v1868_v23, %v1867_v46, %v6489_v21  ;;  %v2142_v9 = vadd.s32 1, %v4703_v50  ;;  %v1690_v20 = vshll.u32 %v1689_v48, 23 }
 0x1f8   : > { %v1990_v19 = vsub.s32 0, %v6484_v45  ;;  %v6499_v49 = vmul.u32.u64.low %v1868_v23, %v1863_v34  ;;  %v6500_v53 = vmul.u32.u64.high %v1868_v23, %v1863_v34, %v6499_v49  ;;  %v1685_v42 = vshll.u32 %v6401_v22, %v6438_v59 }
 0x1f9   : > { %v1859_v50 = vsel %vm1853_vm0, %v1856_v61, %v1858_v3  ;;  %v8985_v55 = vand.u32 2147483647, %v6399_v24  ;;  %vm2143_vm11 = vcmp.gt.s32.totalorder %v2142_v9, 0  ;;  %v1798_v2 = vcvt.s32.f32 %v6478_v16 }
 0x1fa   : > { %v4696_v31 = vmin.u32 %v1990_v19, %v6484_v45  ;;  %v2144_v48 = vsel %vm2143_vm11, %v2142_v9, 0  ;;  %v5044_v32 = vpack.c.bf16 %v344_v39, %v343_v7  ;;  %v1796_v35 = vand.u32 2147483647, %v6480_v26 }
 0x1fb   : > { %v2139_v51 = vand.u32 8388607, %v8985_v55  ;;  %v6511_v6 = vor.u32 %v1686_v62, %v1685_v42  ;;  %vm1877_vm15 = vc.u32 %v6490_v58, %v6499_v49  ;;  %v2146_v22 = vand.u32 31, %v2144_v48 }
 0x1fc   : > { %v6515_v59 = vor.u32 4788187, %v1690_v20  ;;  %v1992_v0 = vclz %v4696_v31  ;;  %v1875_v18 = vmul.u32 %v1868_v23, %v1859_v50  ;;  %v1878_v57 = vadd.s32 1, %v6500_v53  ;;  %5045 = vmatprep.subr.bf16.mxu1 %v5044_v32 }
 0x1fd   : > { %v2140_v25 = vor.u32 8388608, %v2139_v51  ;;  %v6518_v28 = vshrl.u32 %v2144_v48, 5  ;;  %v2147_v36 = vsub.s32 32, %v2146_v22  ;;  %v2149_v41 = vshll.u32 %v8929_v52, %v2146_v22  ;;  %5047 = vmatpush3.bf16.msra.mxu1 %v5044_v32 }
 0x1fe   : > { %v4697_v34 = vadd.s32 4294967294, %v1992_v0  ;;  %v1879_v14 = vsel %vm1877_vm15, %v1878_v57, %v6500_v53  ;;  %v2152_v61 = vshll.u32 %v8932_v38, %v2146_v22  ;;  %v2155_v3 = vshll.u32 %v8933_v4, %v2146_v22 }
 0x1ff   : > { %v1880_v46 = vadd.s32 %v1879_v14, %v1875_v18  ;;  %v2150_v23 = vshrl.u32 %v8932_v38, %v2147_v36  ;;  %v2153_v62 = vshrl.u32 %v8933_v4, %v2147_v36  ;;  %v2158_v21 = vshll.u32 %v8926_v44, %v2146_v22 }
 0x200   : > { %vm4698_vm12 = vcmp.lt.s32.totalorder %v4697_v34, 0  ;;  %v2156_v9 = vshrl.u32 %v8926_v44, %v2147_v36  ;;  %v2159_v7 = vshrl.u32 %v8927_v5, %v2147_v36  ;;  %v2162_v39 = vshrl.u32 %v8928_v60, %v2147_v36 }
 0x201   : > { %v1995_v20 = vsel %vm4698_vm12, 0, %v4697_v34  ;;  %v1881_v19 = vadd.s32 536870912, %v1880_v46  ;;  %v2151_v53 = vor.u32 %v2150_v23, %v2149_v41  ;;  %v2154_v42 = vor.u32 %v2153_v62, %v2152_v61 }
 0x202   : > { %v1694_v50 = vcvt.s32.f32 %v6511_v6  ;;  %v1980_v55 = vadd.s32 %v6440_v47, %v6431_v63  ;;  %v2000_v51 = vsub.s32 4294967266, %v1995_v20  ;;  %v2031_v31 = vand.u32 2139095040, %v6449_v40 }
 0x203   : > { %v6534_v48 = vshrl.u32 %v1881_v19, 30  ;;  %v2157_v32 = vor.u32 %v2156_v9, %v2155_v3  ;;  %v2160_v0 = vor.u32 %v2159_v7, %v2158_v21  ;;  %v2161_v18 = vshll.u32 %v8927_v5, %v2146_v22 }
 0x204   : > { %v1692_v57 = vand.u32 2147483647, %v6515_v59  ;;  %v2001_v34 = vadd.s32 127, %v2000_v51  ;;  %vm2164_vm7 = vcmp.lt.s32.totalorder %v6518_v28, 1  ;;  %v2180_v41 = vshll.u32 %v2140_v25, 8 }
 0x205   : > { %vm8812_vm9 = vcmp.lt.s32.totalorder %v5899_v33, 0  ;;  %v1883_v6 = vshll.u32 %v6534_v48, 30  ;;  %v2163_v63 = vor.u32 %v2162_v39, %v2161_v18  ;;  %vm2167_vm0 = vcmp.lt.s32.totalorder %v6518_v28, 4 }
 0x206   : > { %v2172_v47 = vsel %vm2164_vm7, %v2151_v53, %v2154_v42  ;;  %v1996_v14 = vsub.s32 32, %v1995_v20  ;;  %vm2166_vm11 = vcmp.lt.s32.totalorder %v6518_v28, 3  ;;  %v2173_v22 = vsel %vm2167_vm0, %v2160_v0, 920167782 }
 0x207   : > { %v2032_v59 = vshrl.u32 %v2031_v31, 23  ;;  %v6547_v61 = vsub.s32 %v1880_v46, %v1883_v6  ;;  %vm2165_vm15 = vcmp.lt.s32.totalorder %v6518_v28, 2  ;;  %v2169_v25 = vsel %vm2167_vm0, %v2157_v32, 2102212464 }
 0x208   : > { %v2174_v3 = vsel %vm2166_vm11, %v2157_v32, %v2173_v22  ;;  %v2002_v23 = vshll.u32 %v2001_v34, 23  ;;  %v2148_v62 = vshrl.u32 %v8929_v52, %v2147_v36  ;;  %v2176_v9 = vsel %vm2164_vm7, %v2154_v42, %v2157_v32 }
 0x209   : > { %v2175_v21 = vsel %vm2165_vm15, %v2172_v47, %v2174_v3  ;;  %v8986_v46 = vand.u32 2147483647, %v5899_v33  ;;  %vm8813_vm3 = vcmp.lt.s32.totalorder %v5967_v27, 0  ;;  %v1886_v39 = vsub.s32 0, %v6547_v61 }
 0x20a   : > { %v2177_v19 = vsel %vm2167_vm0, %v2163_v63, 1326507024  ;;  %v6569_v36 = vmul.u32.u64.low %v2180_v41, %v2175_v21  ;;  %v6570_v51 = vmul.u32.u64.high %v2180_v41, %v2175_v21, %v6569_v36  ;;  %v2168_v31 = vsel %vm2164_vm7, %v2148_v62, %v2151_v53 }
 0x20b   : > { %vm6561_vm12 = vcmp.le.f32.partialorder %v8986_v46, 0.7853982  ;;  %v2170_v32 = vsel %vm2166_vm11, %v2154_v42, %v2169_v25  ;;  %v2178_v18 = vsel %vm2166_vm11, %v2160_v0, %v2177_v19  ;;  %v4699_v34 = vadd.s32 4294967169, %v2032_v59 }
 0x20c   : > { %v1998_v6 = vshrl.u32 %v1980_v55, %v1996_v14  ;;  %v4692_v47 = vmin.u32 %v1886_v39, %v6547_v61  ;;  %v2179_v63 = vsel %vm2165_vm15, %v2176_v9, %v2178_v18  ;;  %v8810_v22 = vand.u32 2147483647, %v6449_v40 }
 0x20d   : > { %v1997_v3 = vshll.u32 %v6484_v45, %v1995_v20  ;;  %v6584_v21 = vmul.u32.u64.low %v2180_v41, %v2179_v63  ;;  %v6585_v46 = vmul.u32.u64.high %v2180_v41, %v2179_v63, %v6584_v21  ;;  %v2038_v53 = vadd.s32 1, %v4699_v34 }
 0x20e   : > { %v2003_v62 = vor.u32 4788187, %v2002_v23  ;;  %v1888_v42 = vclz %v4692_v47  ;;  %v2171_v0 = vsel %vm2165_vm15, %v2168_v31, %v2170_v32  ;;  %v2190_v55 = vadd.s32 1, %v6570_v51  ;;  %v8990_v31 = vld [vmem:[#allocation8_spill] sm:$0xff] }
 0x20f   : > { %v8989_v14 = vxor.u32 2147483648, %v6357_v37  ;;  %v1488_v25 = vxor.u32 2147483648, %v6435_v17  ;;  %v6600_v45 = vmul.f32 %v1798_v2, %v1796_v35  ;;  %vm2039_vm7 = vcmp.gt.s32.totalorder %v2038_v53, 0 }
 0x210   : > { %v6602_v20 = vmul.f32 %v1694_v50, %v1692_v57  ;;  %v1999_v28 = vor.u32 %v1998_v6, %v1997_v3  ;;  %v4693_v23 = vadd.s32 4294967294, %v1888_v42  ;;  %v2040_v9 = vsel %vm2039_vm7, %v2038_v53, 0 }
 0x211   : > { %v1593_v59 = vsel %vm8812_vm9, %v8989_v14, %v6357_v37  ;;  %5230 = vcosq.f32 %v6387_v12  ;;  %v2187_v39 = vmul.u32 %v2180_v41, %v2171_v0  ;;  %vm2189_vm0 = vc.u32 %v6585_v46, %v6569_v36 }
 0x212   : > { %v2035_v37 = vand.u32 8388607, %v8810_v22  ;;  %5232 = vsinq.f32 %v6387_v12  ;;  %v2004_v16 = vand.u32 2147483647, %v2003_v62  ;;  %v2191_v26 = vsel %vm2189_vm0, %v2190_v55, %v6570_v51 }
 0x213   : > { %v2042_v2 = vand.u32 31, %v2040_v9  ;;  %v6614_v35 = vsel %vm6561_vm12, %v5899_v33, %v1593_v59  ;;  %v6619_v50 = vsel %vm8813_vm3, %v1488_v25, %v6435_v17  ;;  %vm4694_vm11 = vcmp.lt.s32.totalorder %v4693_v23, 0 }
 0x214   : > { %v2192_v57 = vadd.s32 %v2191_v26, %v2187_v39  ;;  %v2006_v19 = vcvt.s32.f32 %v1999_v28  ;;  %v1876_v32 = vadd.s32 %v6499_v49, %v6490_v58  ;;  %v2036_v34 = vor.u32 8388608, %v2035_v37 }
 0x215   : > { %v2043_v6 = vsub.s32 32, %v2042_v2  ;;  %v6628_v63 = vsel %vm4694_vm11, 0, %v4693_v23  ;;  %v2041_v17 = vshrl.u32 %v2040_v9, 5  ;;  %v2045_v3 = vshll.u32 %v8929_v52, %v2042_v2 }
 0x216   : > { %v2193_v18 = vadd.s32 536870912, %v2192_v57  ;;  %v6626_v47 = vmul.f32 %v2006_v19, %v2004_v16  ;;  %v2048_v62 = vshll.u32 %v8932_v38, %v2042_v2  ;;  %v2051_v58 = vshll.u32 %v8933_v4, %v2042_v2 }
 0x217   : > { %v2046_v53 = vshrl.u32 %v8932_v38, %v2043_v6  ;;  %v2049_v42 = vshrl.u32 %v8933_v4, %v2043_v6  ;;  %v2052_v49 = vshrl.u32 %v8926_v44, %v2043_v6  ;;  %v2054_v0 = vshll.u32 %v8926_v44, %v2042_v2 }
 0x218   : > { %v6631_v21 = vshrl.u32 %v2193_v18, 30  ;;  %v2055_v55 = vshrl.u32 %v8927_v5, %v2043_v6  ;;  %v2076_v28 = vshll.u32 %v2036_v34, 8  ;;  %v1896_v23 = vsub.s32 4294967266, %v6628_v63 }
 0x219   : > { %v2047_v59 = vor.u32 %v2046_v53, %v2045_v3  ;;  %v2050_v25 = vor.u32 %v2049_v42, %v2048_v62  ;;  %v2053_v9 = vor.u32 %v2052_v49, %v2051_v58  ;;  %vm2060_vm15 = vcmp.lt.s32.totalorder %v2041_v17, 1 }
 0x21a   : > { %v2195_v14 = vshll.u32 %v6631_v21, 30  ;;  %v2056_v39 = vor.u32 %v2055_v55, %v2054_v0  ;;  %v1892_v16 = vsub.s32 32, %v6628_v63  ;;  %v2057_v19 = vshll.u32 %v8927_v5, %v2042_v2 }
 0x21b   : > { %v6642_v37 = vpop.eup %5230  ;;  %v2058_v18 = vshrl.u32 %v8928_v60, %v2043_v6  ;;  %v2044_v3 = vshrl.u32 %v8929_v52, %v2043_v6  ;;  %vm2062_vm7 = vcmp.lt.s32.totalorder %v2041_v17, 3  ;;  %vm2063_vm0 = vcmp.lt.s32.totalorder %v2041_v17, 4 }
 0x21c   : > { %v6645_v26 = vsub.s32 %v2192_v57, %v2195_v14  ;;  %v6649_v22 = vpop.eup %5232  ;;  %v2068_v34 = vsel %vm2060_vm15, %v2047_v59, %v2050_v25  ;;  %v2065_v42 = vsel %vm2063_vm0, %v2053_v9, 2102212464  ;;  %v2069_v58 = vsel %vm2063_vm0, %v2056_v39, 920167782 }
 0x21d   : > { %v2059_v62 = vor.u32 %v2058_v18, %v2057_v19  ;;  %v1897_v49 = vadd.s32 127, %v1896_v23  ;;  %vm2061_vm11 = vcmp.lt.s32.totalorder %v2041_v17, 2  ;;  %v2070_v57 = vsel %vm2062_vm7, %v2053_v9, %v2069_v58 }
 0x21e   : > { %v2198_v53 = vsub.s32 0, %v6645_v26  ;;  %v2072_v2 = vsel %vm2060_vm15, %v2050_v25, %v2053_v9  ;;  %v2064_v55 = vsel %vm2060_vm15, %v2044_v3, %v2047_v59  ;;  %v2071_v6 = vsel %vm2061_vm11, %v2068_v34, %v2070_v57  ;;  %v8991_v9 = vld [vmem:[#allocation13_spill] sm:$0xff]  ;;  %v8992_v34 = vld [vmem:[#allocation15_spill] sm:$0xff] }
 0x21f   : > { %v2073_v14 = vsel %vm2063_vm0, %v2059_v62, 1326507024  ;;  %v2066_v12 = vsel %vm2062_vm7, %v2050_v25, %v2065_v42  ;;  %v6661_v19 = vmul.u32.u64.low %v2076_v28, %v2071_v6  ;;  %v6662_v18 = vmul.u32.u64.high %v2076_v28, %v2071_v6, %v6661_v19 }
 0x220   : > { %v4704_v0 = vmin.u32 %v2198_v53, %v6645_v26  ;;  %v2074_v41 = vsel %vm2062_vm7, %v2056_v39, %v2073_v14  ;;  %v1894_v23 = vshrl.u32 %v1876_v32, %v1892_v16  ;;  %v589_v53 = vshll.u32 %v8929_v52, %v8991_v9 }
 0x221   : > { %v2075_v58 = vsel %vm2061_vm11, %v2072_v2, %v2074_v41  ;;  %v1898_v60 = vshll.u32 %v1897_v49, 23  ;;  %v590_v25 = vshrl.u32 %v8932_v38, %v8992_v34  ;;  %v2067_v39 = vsel %vm2061_vm11, %v2064_v55, %v2066_v12 }
 0x222   : > { %v2200_v51 = vclz %v4704_v0  ;;  %v6668_v59 = vmul.u32.u64.low %v2076_v28, %v2075_v58  ;;  %v6669_v3 = vmul.u32.u64.high %v2076_v28, %v2075_v58, %v6668_v59  ;;  %v592_v42 = vshll.u32 %v8932_v38, %v8991_v9 }
 0x223   : > { %v593_v32 = vshrl.u32 %v8933_v4, %v8992_v34  ;;  %v1893_v41 = vshll.u32 %v6547_v61, %v6628_v63  ;;  %v2086_v16 = vadd.s32 1, %v6662_v18  ;;  %v8993_v49 = vand.u32 2147483647, %v8990_v31 }
 0x224   : > { %v4705_v62 = vadd.s32 4294967294, %v2200_v51  ;;  %v588_v2 = vshrl.u32 %v8929_v52, %v8992_v34  ;;  %v591_v51 = vor.u32 %v590_v25, %v589_v53  ;;  %v596_v17 = vshrl.u32 %v8926_v44, %v8992_v34 }
 0x225   : > { %v579_v57 = vand.u32 8388607, %v8993_v49  ;;  %v594_v12 = vor.u32 %v593_v32, %v592_v42  ;;  %v2083_v55 = vmul.u32 %v2076_v28, %v2067_v39  ;;  %vm2085_vm7 = vc.u32 %v6669_v3, %v6661_v19 }
 0x226   : > { %vm4706_vm15 = vcmp.lt.s32.totalorder %v4705_v62, 0  ;;  %v595_v61 = vshll.u32 %v8933_v4, %v8991_v9  ;;  %v8994_v63 = vand.u32 2147483647, %v5967_v27  ;;  %v1895_v14 = vor.u32 %v1894_v23, %v1893_v41 }
 0x227   : > { %v2203_v0 = vsel %vm4706_vm15, 0, %v4705_v62  ;;  %v1899_v58 = vor.u32 4788187, %v1898_v60  ;;  %v2087_v59 = vsel %vm2085_vm7, %v2086_v16, %v6662_v18  ;;  %vm8827_vm11 = vcmp.lt.s32.totalorder %v6105_v30, 0 }
 0x228   : > { %vm6693_vm0 = vcmp.le.f32.partialorder %v8994_v63, 0.7853982  ;;  %v2208_v53 = vsub.s32 4294967266, %v2203_v0  ;;  %v2088_v28 = vadd.s32 %v2087_v59, %v2083_v55  ;;  %v580_v34 = vor.u32 8388608, %v579_v57 }
 0x229   : > { %v597_v25 = vor.u32 %v596_v17, %v595_v61  ;;  %vm604_vm15 = vcmp.lt.s32.totalorder %v5860_v43, 1  ;;  %v2204_v9 = vsub.s32 32, %v2203_v0  ;;  %vm606_vm3 = vcmp.lt.s32.totalorder %v5860_v43, 3 }
 0x22a   : > { %v2209_v62 = vadd.s32 127, %v2208_v53  ;;  %v612_v23 = vsel %vm604_vm15, %v591_v51, %v594_v12  ;;  %v2188_v60 = vadd.s32 %v6569_v36, %v6585_v46  ;;  %v2089_v18 = vadd.s32 536870912, %v2088_v28 }
 0x22b   : > { %v614_v39 = vsel %vm606_vm3, %v597_v25, %v6351_v1  ;;  %v616_v42 = vsel %vm604_vm15, %v594_v12, %v597_v25  ;;  %v8997_v32 = vand.u32 2147483647, %v6105_v30  ;;  %v1902_v16 = vcvt.s32.f32 %v1895_v14 }
 0x22c   : > { %v2210_v49 = vshll.u32 %v2209_v62, 23  ;;  %vm605_vm10 = vcmp.lt.s32.totalorder %v5860_v43, 2  ;;  %v609_v36 = vsel %vm607_vm4, %v597_v25, 2102212464  ;;  %v6720_v46 = vshrl.u32 %v2089_v18, 30  ;;  %v9006_v43 = vld [vmem:[#allocation5_spill] sm:$0xff] }
 0x22d   : > { %vm6713_vm7 = vcmp.le.f32.partialorder %v8997_v32, 0.7853982  ;;  %v615_v1 = vsel %vm605_vm10, %v612_v23, %v614_v39  ;;  %v618_v57 = vsel %vm606_vm3, %v6016_v8, %v6374_v10  ;;  %v620_v17 = vshll.u32 %v580_v34, 8 }
 0x22e   : > { %v9000_v55 = vand.u32 2147483647, %v6109_v54  ;;  %v1900_v63 = vand.u32 2147483647, %v1899_v58  ;;  %v2206_v14 = vshrl.u32 %v2188_v60, %v2204_v9  ;;  %v608_v53 = vsel %vm604_vm15, %v588_v2, %v591_v51 }
 0x22f   : > { %v619_v59 = vsel %vm605_vm10, %v616_v42, %v618_v57  ;;  %v2091_v25 = vshll.u32 %v6720_v46, 30  ;;  %v610_v8 = vsel %vm606_vm3, %v594_v12, %v609_v36  ;;  %v2205_v62 = vshll.u32 %v6645_v26, %v2203_v0 }
 0x230   : > { %vm6730_vm9 = vcmp.le.f32.partialorder %v9000_v55, 0.7853982  ;;  %v6741_v10 = vmul.u32.u64.low %v620_v17, %v619_v59  ;;  %v6742_v34 = vmul.u32.u64.high %v620_v17, %v619_v59, %v6741_v10  ;;  %v2211_v23 = vor.u32 4788187, %v2210_v49 }
 0x231   : > { %v6745_v18 = vmul.u32.u64.low %v620_v17, %v615_v1  ;;  %v6746_v58 = vmul.u32.u64.high %v620_v17, %v615_v1, %v6745_v18  ;;  %5234 = vcosq.f32 %v6614_v35  ;;  %v1492_v2 = vsel %vm6693_vm0, %v5967_v27, %v6619_v50 }
 0x232   : > { %vm8815_vm4 = vcmp.lt.s32.totalorder %v6271_v13, 0  ;;  %v6755_v51 = vsub.s32 %v2088_v28, %v2091_v25  ;;  %v9003_v12 = vxor.u32 2147483648, %v6600_v45  ;;  %v1903_v0 = vmul.f32 %v1902_v16, %v1900_v63 }
 0x233   : > { %v2207_v9 = vor.u32 %v2206_v14, %v2205_v62  ;;  %v611_v60 = vsel %vm605_vm10, %v608_v53, %v610_v8  ;;  %5236 = vsinq.f32 %v6614_v35  ;;  %v9004_v50 = vxor.u32 2147483648, %v6602_v20  ;;  %v9009_v62 = vld [vmem:[#allocation9_spill] sm:$0xff] }
 0x234   : > { %v1801_v26 = vsel %vm8827_vm11, %v9003_v12, %v6600_v45  ;;  %vm9005_vm3 = vcmp.lt.s32.totalorder %v6109_v54, 0  ;;  %v2094_v39 = vsub.s32 0, %v6755_v51  ;;  %vm629_vm15 = vc.u32 %v6742_v34, %v6745_v18 }
 0x235   : > { %v1697_v28 = vsel %vm9005_vm3, %v9004_v50, %v6602_v20  ;;  %v2008_v45 = vxor.u32 2147483648, %v6626_v47  ;;  %v2212_v42 = vand.u32 2147483647, %v2211_v23  ;;  %v630_v32 = vadd.s32 1, %v6746_v58 }
 0x236   : > { %v762_v16 = vsub.s32 4, %v9006_v43  ;;  %5238 = vcosq.f32 %v1492_v2  ;;  %v1804_v35 = vsel %vm6713_vm7, %v6105_v30, %v1801_v26  ;;  %v4700_v49 = vmin.u32 %v2094_v39, %v6755_v51 }
 0x237   : > { %v627_v20 = vmul.u32 %v620_v17, %v611_v60  ;;  %5240 = vsinq.f32 %v1492_v2  ;;  %v1904_v36 = vxor.u32 2147483648, %v1903_v0  ;;  %v2214_v1 = vcvt.s32.f32 %v2207_v9  ;;  %v9007_v17 = vld [vmem:[#allocation2_spill] sm:$0xff] }
 0x238   : > { %v631_v57 = vsel %vm629_vm15, %v630_v32, %v6746_v58  ;;  %v1700_v55 = vsel %vm6730_vm9, %v6109_v54, %v1697_v28  ;;  %vm8826_vm10 = vcmp.lt.s32.totalorder %v6346_v15, 0  ;;  %v2096_v63 = vclz %v4700_v49  ;;  %v9026_v60 = vld [vmem:[#allocation22_spill] sm:$0xff] }
 0x239   : > { %v632_v14 = vadd.s32 %v631_v57, %v627_v20  ;;  %5242 = vcosq.f32 %v1804_v35  ;;  %v2009_v53 = vsel %vm8815_vm4, %v2008_v45, %v6626_v47  ;;  %v2215_v59 = vmul.f32 %v2214_v1, %v2212_v42 }
 0x23a   : > { %vm9008_vm3 = vcmp.lt.s32.totalorder %v9007_v17, 0  ;;  %5244 = vsinq.f32 %v1804_v35  ;;  %v4701_v8 = vadd.s32 4294967294, %v2096_v63  ;;  %v866_v23 = vsub.s32 4, %v9009_v62  ;;  %v9017_v35 = vld [vmem:[#allocation4_spill] sm:$0xff] }
 0x23b   : > { %v763_v25 = vsel %vm9008_vm3, %v762_v16, %v9006_v43  ;;  %v633_v10 = vadd.s32 536870912, %v632_v14  ;;  %5246 = vcosq.f32 %v1700_v55  ;;  %v9010_v58 = vand.u32 2147483647, %v6271_v13  ;;  %v6800_v12 = vpop.eup %5234 }
 0x23c   : > { %v9011_v2 = vmov 0  ;;  %v1905_v47 = vsel %vm8826_vm10, %v1904_v36, %v1903_v0  ;;  %vm4702_vm3 = vcmp.lt.s32.totalorder %v4701_v8, 0  ;;  %v765_v50 = vsel %vm5921_vm2, 0, %v763_v25  ;;  %v9019_v36 = vld [vmem:[#allocation7_spill] sm:$0xff] }
 0x23d   : > { %vm6794_vm15 = vcmp.le.f32.partialorder %v9010_v58, 0.7853982  ;;  %v6805_v9 = vshrl.u32 %v633_v10, 30  ;;  %5248 = vsinq.f32 %v1700_v55  ;;  %v9014_v28 = vand.u32 2147483647, %v6346_v15  ;;  %v6817_v42 = vpop.eup %5236 }
 0x23e   : > { %v9012_v2 = vsel %vm6794_vm15, 4294967295, %v9011_v2  ;;  %v2012_v26 = vsel %vm6794_vm15, %v6271_v13, %v2009_v53  ;;  %v2216_v0 = vxor.u32 2147483648, %v2215_v59  ;;  %v6815_v45 = vsel %vm4702_vm3, 0, %v4701_v8 }
 0x23f   : > { %vm6811_vm4 = vcmp.le.f32.partialorder %v9014_v28, 0.7853982  ;;  %v2104_v43 = vsub.s32 4294967266, %v6815_v45  ;;  %v635_v16 = vshll.u32 %v6805_v9, 30  ;;  %vm9018_vm2 = vcmp.lt.s32.totalorder %v9017_v35, 0 }
 0x240   : > { %v1908_v32 = vsel %vm6811_vm4, %v6346_v15, %v1905_v47  ;;  %v867_v49 = vsel %vm9018_vm2, %v866_v23, %v9009_v62  ;;  %5250 = vcosq.f32 %v2012_v26  ;;  %v769_v20 = vadd.s32 3, %v765_v50  ;;  %v6828_v57 = vpop.eup %5238  ;;  %v9027_v50 = vld [vmem:[#allocation3_spill] sm:$0xff] }
 0x241   : > { %v970_v1 = vsub.s32 4, %v9019_v36  ;;  %5252 = vsinq.f32 %v2012_v26  ;;  %vm8816_vm3 = vcmp.lt.s32.totalorder %v6399_v24, 0  ;;  %v6831_v55 = vsub.s32 %v632_v14, %v635_v16  ;;  %v6833_v63 = vpop.eup %5240  ;;  %v9030_v16 = vld [vmem:[#allocation21_spill] sm:$0xff] }
 0x242   : > { %5254 = vcosq.f32 %v1908_v32  ;;  %v2217_v53 = vsel %vm8816_vm3, %v2216_v0, %v2215_v59  ;;  %v2105_v25 = vadd.s32 127, %v2104_v43  ;;  %v869_v10 = vsel %vm5943_vm8, 0, %v867_v49 }
 0x243   : > { %5256 = vsinq.f32 %v1908_v32  ;;  %v9021_v62 = vand.u32 2147483647, %v6399_v24  ;;  %v9022_v23 = vmov 0  ;;  %v638_v14 = vsub.s32 0, %v6831_v55  ;;  %v6846_v58 = vpop.eup %5242 }
 0x244   : > { %9025 = vst [vmem:[#allocation13_spill] sm:$0xff] %v6846_v58  ;;  %v2100_v47 = vsub.s32 32, %v6815_v45  ;;  %v770_v26 = vand.u32 3, %v769_v20  ;;  %v773_v59 = vxor.u32 2147483648, %v9026_v60  ;;  %vm9028_vm3 = vcmp.lt.s32.totalorder %v9027_v50, 0  ;;  %v6853_v0 = vpop.eup %5244 }
 0x245   : > { %vm6841_vm2 = vcmp.le.f32.partialorder %v9021_v62, 0.7853982  ;;  %v971_v28 = vsel %vm9028_vm3, %v970_v1, %v9019_v36  ;;  %9029 = vst [vmem:[#allocation15_spill] sm:$0xff] %v6853_v0  ;;  %v4644_v43 = vmin.u32 %v638_v14, %v6831_v55  ;;  %v776_v49 = vxor.u32 2147483648, %v9030_v16  ;;  %v6861_v20 = vpop.eup %5246  ;;  %v9031_v1 = vld [vmem:[#allocation26_spill] sm:$0xff] }
 0x246   : > { %v9023_v23 = vsel %vm6841_vm2, 4294967295, %v9022_v23  ;;  %v2220_v32 = vsel %vm6841_vm2, %v6399_v24, %v2217_v53  ;;  %v873_v8 = vadd.s32 3, %v869_v10  ;;  %v2084_v62 = vadd.s32 %v6661_v19, %v6669_v3  ;;  %v9032_v53 = vld [vmem:[#allocation25_spill] sm:$0xff] }
 0x247   : > { %9024 = vst [vmem:[#allocation8_spill] sm:$0xff] %v9023_v23  ;;  %v2106_v5 = vshll.u32 %v2105_v25, 23  ;;  %v628_v36 = vadd.s32 %v6745_v18, %v6742_v34  ;;  %v877_v44 = vxor.u32 2147483648, %v9031_v1  ;;  %v640_v4 = vclz %v4644_v43  ;;  %v9034_v23 = vld [vmem:[#allocation14_spill] sm:$0xff]  ;;  %v6872_v10 = vpop.eup %5248 }
 0x248   : > { %v880_v38 = vxor.u32 2147483648, %v9032_v53  ;;  %v973_v14 = vsel %vm5932_vm6, 0, %v971_v28  ;;  %v1074_v24 = vsub.s32 4, %v9034_v23  ;;  %5258 = vcosq.f32 %v2220_v32 }
 0x249   : > { %v2102_v58 = vshrl.u32 %v2084_v62, %v2100_v47  ;;  %v9035_v19 = vand.u32 2147483647, %v8990_v31  ;;  %vm772_vm10 = vcmp.eq.s32.totalorder %v770_v26, 0  ;;  %vm775_vm11 = vcmp.eq.s32.totalorder %v770_v26, 2 }
 0x24a   : > { %v4645_v34 = vadd.s32 4294967294, %v640_v4  ;;  %v774_v18 = vsel %vm772_vm10, %v9030_v16, %v773_v59  ;;  %v777_v52 = vsel %vm775_vm11, %v776_v49, %v9026_v60  ;;  %v874_v25 = vand.u32 3, %v873_v8  ;;  %v6882_v28 = vpop.eup %5250  ;;  %v9041_v60 = vld [vmem:[#allocation12_spill] sm:$0xff] }
 0x24b   : > { %vm6876_vm3 = vcmp.le.f32.partialorder %v9035_v19, 0.7853982  ;;  %9038 = vst [vmem:[#allocation5_spill] sm:$0xff] %v6882_v28  ;;  %v2101_v43 = vshll.u32 %v6755_v51, %v6815_v45  ;;  %v2107_v47 = vor.u32 4788187, %v2106_v5  ;;  %v658_v62 = vsub.s32 4, %v6805_v9  ;;  %v6888_v0 = vpop.eup %5252 }
 0x24c   : > { %v977_v19 = vadd.s32 3, %v973_v14  ;;  %9039 = vst [vmem:[#allocation2_spill] sm:$0xff] %v6888_v0  ;;  %vm4646_vm8 = vcmp.lt.s32.totalorder %v4645_v34, 0  ;;  %vm771_vm2 = vcmp.lt.s32.totalorder %v770_v26, 2  ;;  %vm9040_vm10 = vcmp.lt.s32.totalorder %v5653_v11, 0  ;;  %v6894_v16 = vpop.eup %5254 }
 0x24d   : > { %v1075_v4 = vsel %vm9040_vm10, %v1074_v24, %v9034_v23  ;;  %v1178_v59 = vsub.s32 4, %v9041_v60  ;;  %5260 = vsinq.f32 %v2220_v32  ;;  %v2103_v51 = vor.u32 %v2102_v58, %v2101_v43  ;;  %v6896_v49 = vpop.eup %5256 }
 0x24e   : > { %v643_v5 = vsel %vm4646_vm8, 0, %v4645_v34  ;;  %v778_v45 = vsel %vm771_vm2, %v774_v18, %v777_v52  ;;  %vm876_vm11 = vcmp.eq.s32.totalorder %v874_v25, 0  ;;  %vm879_vm6 = vcmp.eq.s32.totalorder %v874_v25, 2  ;;  %v9043_v18 = vld [vmem:[#allocation6_spill] sm:$0xff] }
 0x24f   : > { %v644_v8 = vsub.s32 32, %v643_v5  ;;  %v648_v14 = vsub.s32 4294967266, %v643_v5  ;;  %v2108_v28 = vand.u32 2147483647, %v2107_v47  ;;  %vm9042_vm15 = vcmp.lt.s32.totalorder %v8990_v31, 0 }
 0x250   : > { %v659_v26 = vsel %vm9042_vm15, %v658_v62, %v6805_v9  ;;  %vm872_vm10 = vweird.f32 %v9017_v35  ;;  %v978_v24 = vand.u32 3, %v977_v19  ;;  %v1077_v23 = vsel %vm6189_vm14, 0, %v1075_v4  ;;  %v9045_v9 = vld [vmem:[#allocation24_spill] sm:$0xff] }
 0x251   : > { %v645_v58 = vshll.u32 %v6831_v55, %v643_v5  ;;  %v646_v32 = vshrl.u32 %v628_v36, %v644_v8  ;;  %v649_v34 = vadd.s32 127, %v648_v14  ;;  %vm9044_vm2 = vcmp.lt.s32.totalorder %v9043_v18, 0  ;;  %v9046_v36 = vld [vmem:[#allocation23_spill] sm:$0xff] }
 0x252   : > { %v1179_v52 = vsel %vm9044_vm2, %v1178_v59, %v9041_v60  ;;  %v2110_v43 = vcvt.s32.f32 %v2103_v51  ;;  %v878_v47 = vsel %vm876_vm11, %v9032_v53, %v877_v44  ;;  %v881_v0 = vsel %vm879_vm6, %v880_v38, %v9031_v1  ;;  %v6915_v5 = vpop.eup %5258  ;;  %v9049_v53 = vld [vmem:[#allocation20_spill] sm:$0xff] }
 0x253   : > { %v981_v62 = vxor.u32 2147483648, %v9045_v9  ;;  %vm8835_vm15 = vcmp.lt.s32.totalorder %v6449_v40, 0  ;;  %v647_v19 = vor.u32 %v646_v32, %v645_v58  ;;  %v650_v56 = vshll.u32 %v649_v34, 23  ;;  %9047 = vst [vmem:[#allocation9_spill] sm:$0xff] %v6915_v5  ;;  %v9062_v5 = vld [vmem:[#allocation31_spill] sm:$0xff] }
 0x254   : > { %v661_v55 = vsel %vm6876_vm3, 0, %v659_v26  ;;  %v984_v4 = vxor.u32 2147483648, %v9046_v36  ;;  %v2111_v8 = vmul.f32 %v2110_v43, %v2108_v28  ;;  %v1081_v60 = vadd.s32 3, %v1077_v23 }
 0x255   : > { %v1181_v44 = vsel %vm6134_vm13, 0, %v1179_v52  ;;  %v1282_v38 = vsub.s32 4, %v9049_v53  ;;  %v651_v1 = vor.u32 4788187, %v650_v56  ;;  %vm9050_vm14 = vweird.f32 %v9007_v17 }
 0x256   : > { %v6922_v51 = vsel %vm9050_vm14, nan, %v778_v45  ;;  %vm875_vm8 = vcmp.lt.s32.totalorder %v874_v25, 2  ;;  %vm980_vm6 = vcmp.eq.s32.totalorder %v978_v24, 0  ;;  %v665_v14 = vadd.s32 3, %v661_v55  ;;  %v9055_v45 = vld [vmem:[#allocation11_spill] sm:$0xff]  ;;  %v9058_v55 = vld [vmem:[#allocation38_spill] sm:$0xff] }
 0x257   : > { %v882_v26 = vsel %vm875_vm8, %v878_v47, %v881_v0  ;;  %v982_v58 = vsel %vm980_vm6, %v9046_v36, %v981_v62  ;;  %vm983_vm11 = vcmp.eq.s32.totalorder %v978_v24, 2  ;;  %v652_v32 = vand.u32 2147483647, %v651_v1  ;;  %v6926_v52 = vpop.eup %5260  ;;  %v9057_v62 = vld [vmem:[#allocation16_spill] sm:$0xff] }
 0x258   : > { %v654_v28 = vcvt.s32.f32 %v647_v19  ;;  %v985_v23 = vsel %vm983_vm11, %v984_v4, %v9045_v9  ;;  %v1185_v34 = vadd.s32 3, %v1181_v44  ;;  %9051 = vst [vmem:[#allocation17_spill] sm:$0xff] %v6926_v52  ;;  %v9052_v43 = vand.u32 2147483647, %v6449_v40  ;;  %v9059_v44 = vld [vmem:[#allocation34_spill] sm:$0xff] }
 0x259   : > { %v2112_v25 = vxor.u32 2147483648, %v2111_v8  ;;  %vm976_vm2 = vweird.f32 %v9027_v50  ;;  %v1082_v0 = vand.u32 3, %v1081_v60  ;;  %vm9056_vm14 = vcmp.lt.s32.totalorder %v9055_v45, 0  ;;  %v9060_v60 = vld [vmem:[#allocation10_spill] sm:$0xff] }
 0x25a   : > { %vm6930_vm13 = vcmp.le.f32.partialorder %v9052_v43, 0.7853982  ;;  %v1283_v47 = vsel %vm9056_vm14, %v1282_v38, %v9049_v53  ;;  %v1386_v19 = vsub.s32 4, %v9057_v62  ;;  %v655_v9 = vmul.f32 %v654_v28, %v652_v32 }
 0x25b   : > { %v6941_v56 = vsel %vm872_vm10, nan, %v882_v26  ;;  %vm979_vm8 = vcmp.lt.s32.totalorder %v978_v24, 2  ;;  %v1085_v36 = vxor.u32 2147483648, %v9058_v55  ;;  %v6944_v4 = vand.u32 3, %v665_v14  ;;  %v9064_v14 = vld [vmem:[#allocation30_spill] sm:$0xff] }
 0x25c   : > { %v986_v59 = vsel %vm979_vm8, %v982_v58, %v985_v23  ;;  %v1088_v1 = vxor.u32 2147483648, %v9059_v44  ;;  %vm9061_vm6 = vcmp.lt.s32.totalorder %v9060_v60, 0  ;;  %v656_v53 = vxor.u32 2147483648, %v655_v9  ;;  %v9065_v58 = vld [vmem:[#allocation29_spill] sm:$0xff] }
 0x25d   : > { %v1387_v43 = vsel %vm9061_vm6, %v1386_v19, %v9057_v62  ;;  %v1186_v38 = vand.u32 3, %v1185_v34  ;;  %v1189_v32 = vxor.u32 2147483648, %v9062_v5  ;;  %v1285_v35 = vsel %vm6378_vm1, 0, %v1283_v47 }
 0x25e   : > { %v2113_v24 = vsel %vm8835_vm15, %v2112_v25, %v2111_v8  ;;  %vm1080_vm10 = vweird.f32 %v5653_v11  ;;  %vm1084_vm11 = vcmp.eq.s32.totalorder %v1082_v0, 0  ;;  %v1192_v26 = vxor.u32 2147483648, %v9064_v14 }
 0x25f   : > { %v1490_v23 = vsub.s32 4, %v9065_v58  ;;  %vm9066_vm14 = vcmp.lt.s32.totalorder %v8990_v31, 0  ;;  %v1086_v34 = vsel %vm1084_vm11, %v9059_v44, %v1085_v36  ;;  %vm1087_vm8 = vcmp.eq.s32.totalorder %v1082_v0, 2 }
 0x260   : > { %v657_v62 = vsel %vm9066_vm14, %v656_v53, %v655_v9  ;;  %v1389_v28 = vsel %vm6288_vm5, 0, %v1387_v43  ;;  %v1089_v25 = vsel %vm1087_vm8, %v1088_v1, %v9058_v55  ;;  %v1289_v47 = vadd.s32 3, %v1285_v35  ;;  %v9069_v9 = vld [vmem:[#allocation28_spill] sm:$0xff] }
 0x261   : > { %v660_v8 = vsel %vm6876_vm3, %v8990_v31, %v657_v62  ;;  %vm9068_vm1 = vcmp.lt.s32.totalorder %v5967_v27, 0  ;;  %vm1188_vm6 = vcmp.eq.s32.totalorder %v1186_v38, 0  ;;  %vm1191_vm14 = vcmp.eq.s32.totalorder %v1186_v38, 2 }
 0x262   : > { %v1491_v52 = vsel %vm9068_vm1, %v1490_v23, %v9065_v58  ;;  %5262 = vcosq.f32 %v660_v8  ;;  %v1594_v36 = vsub.s32 4, %v9069_v9  ;;  %v1190_v44 = vsel %vm1188_vm6, %v9064_v14, %v1189_v32  ;;  %v9073_v23 = vld [vmem:[#allocation39_spill] sm:$0xff] }
 0x263   : > { %5264 = vsinq.f32 %v660_v8  ;;  %v1193_v43 = vsel %vm1191_vm14, %v1192_v26, %v9062_v5  ;;  %v1393_v53 = vadd.s32 3, %v1389_v28  ;;  %v2116_v3 = vsel %vm6930_vm13, %v6449_v40, %v2113_v24  ;;  %v9072_v26 = vld [vmem:[#allocation40_spill] sm:$0xff]  ;;  %v9074_v8 = vld [vmem:[#allocation33_spill] sm:$0xff] }
 0x264   : > { %v6978_v55 = vsel %vm976_vm2, nan, %v986_v59  ;;  %vm1083_vm5 = vcmp.lt.s32.totalorder %v1082_v0, 2  ;;  %v1493_v1 = vsel %vm6693_vm0, 0, %v1491_v52  ;;  %vm1184_vm3 = vweird.f32 %v9043_v18  ;;  %v9071_v0 = vld [vmem:[#allocation36_spill] sm:$0xff] }
 0x265   : > { %v1090_v35 = vsel %vm1083_vm5, %v1086_v34, %v1089_v25  ;;  %vm1187_vm11 = vcmp.lt.s32.totalorder %v1186_v38, 2  ;;  %v1290_v32 = vand.u32 3, %v1289_v47  ;;  %vm671_vm8 = vcmp.eq.s32.totalorder %v6944_v4, 2 }
 0x266   : > { %v1194_v5 = vsel %vm1187_vm11, %v1190_v44, %v1193_v43  ;;  %v1293_v14 = vxor.u32 2147483648, %v6649_v22  ;;  %v1296_v24 = vxor.u32 2147483648, %v6642_v37  ;;  %vm9070_vm2 = vcmp.lt.s32.totalorder %v5899_v33, 0 }
 0x267   : > { %v1595_v50 = vsel %vm9070_vm2, %v1594_v36, %v9069_v9  ;;  %5266 = vcosq.f32 %v2116_v3  ;;  %vm668_vm1 = vcmp.eq.s32.totalorder %v6944_v4, 0  ;;  %v1394_v6 = vand.u32 3, %v1393_v53 }
 0x268   : > { %v1497_v52 = vadd.s32 3, %v1493_v1  ;;  %v1698_v59 = vsub.s32 4, %v9071_v0  ;;  %5268 = vsinq.f32 %v2116_v3  ;;  %vm667_vm0 = vcmp.lt.s32.totalorder %v6944_v4, 2 }
 0x269   : > { %v6994_v38 = vsel %vm1080_vm10, nan, %v1090_v35  ;;  %v1397_v58 = vxor.u32 2147483648, %v9072_v26  ;;  %v1400_v62 = vxor.u32 2147483648, %v9073_v23  ;;  %vm664_vm6 = vweird.f32 %v8990_v31 }
 0x26a   : > { %v7001_v34 = vsel %vm1184_vm3, nan, %v1194_v5  ;;  %vm1288_vm14 = vweird.f32 %v9055_v45  ;;  %vm1292_vm5 = vcmp.eq.s32.totalorder %v1290_v32, 0  ;;  %vm1295_vm11 = vcmp.eq.s32.totalorder %v1290_v32, 2 }
 0x26b   : > { %v1597_v19 = vsel %vm6561_vm12, 0, %v1595_v50  ;;  %vm1291_vm2 = vcmp.lt.s32.totalorder %v1290_v32, 2  ;;  %v1294_v11 = vsel %vm1292_vm5, %v6642_v37, %v1293_v14  ;;  %v1297_v28 = vsel %vm1295_vm11, %v1296_v24, %v6649_v22 }
 0x26c   : > { %v1802_v25 = vsub.s32 4, %v9074_v8  ;;  %vm1396_vm10 = vcmp.eq.s32.totalorder %v1394_v6, 0  ;;  %vm1399_vm15 = vcmp.eq.s32.totalorder %v1394_v6, 2  ;;  %v1498_v47 = vand.u32 3, %v1497_v52  ;;  %v5263_v9 = vpop.eup %5262 }
 0x26d   : > { %vm9075_vm3 = vcmp.lt.s32.totalorder %v6109_v54, 0  ;;  %v1398_v36 = vsel %vm1396_vm10, %v9073_v23, %v1397_v58  ;;  %v1401_v7 = vsel %vm1399_vm15, %v1400_v62, %v9072_v26  ;;  %v1501_v44 = vxor.u32 2147483648, %v6833_v63  ;;  %v5265_v37 = vpop.eup %5264 }
 0x26e   : > { %v1699_v18 = vsel %vm9075_vm3, %v1698_v59, %v9071_v0  ;;  %v1601_v43 = vadd.s32 3, %v1597_v19  ;;  %v672_v53 = vxor.u32 2147483648, %v5263_v9  ;;  %v1298_v22 = vsel %vm1291_vm2, %v1294_v11, %v1297_v28 }
 0x26f   : > { %vm1392_vm12 = vweird.f32 %v9060_v60  ;;  %v1504_v3 = vxor.u32 2147483648, %v6828_v57  ;;  %v669_v1 = vxor.u32 2147483648, %v5265_v37  ;;  %vm1395_vm5 = vcmp.lt.s32.totalorder %v1394_v6, 2 }
 0x270   : > { %v1701_v35 = vsel %vm6730_vm9, 0, %v1699_v18  ;;  %vm9076_vm11 = vcmp.lt.s32.totalorder %v6105_v30, 0  ;;  %v673_v5 = vsel %vm671_vm8, %v672_v53, %v5265_v37  ;;  %v1402_v14 = vsel %vm1395_vm5, %v1398_v36, %v1401_v7 }
 0x271   : > { %v1803_v32 = vsel %vm9076_vm11, %v1802_v25, %v9074_v8  ;;  %vm1500_vm15 = vcmp.eq.s32.totalorder %v1498_v47, 0  ;;  %v1906_v24 = vsub.s32 4, %v6534_v48  ;;  %v670_v50 = vsel %vm668_vm1, %v5263_v9, %v669_v1  ;;  %v7028_v61 = vpop.eup %5266  ;;  %v347_v1 = vld [vmem:[%s8718_s5 + $0x8] sm:$0xff] }
 0x272   : > { %v1502_v52 = vsel %vm1500_vm15, %v6828_v57, %v1501_v44  ;;  %vm1503_vm2 = vcmp.eq.s32.totalorder %v1498_v47, 2  ;;  %v1602_v6 = vand.u32 3, %v1601_v43  ;;  %v674_v0 = vsel %vm667_vm0, %v670_v50, %v673_v5  ;;  %v7035_v23 = vpop.eup %5268  ;;  %v9087_v44 = vld [vmem:[#allocation13_spill] sm:$0xff] }
 0x273   : > { %v1505_v59 = vsel %vm1503_vm2, %v1504_v3, %v6833_v63  ;;  %v1705_v26 = vadd.s32 3, %v1701_v35  ;;  %v1805_v58 = vsel %vm6713_vm7, 0, %v1803_v32  ;;  %v675_v62 = vsel %vm664_vm6, nan, %v674_v0  ;;  %v9088_v3 = vld [vmem:[#allocation37_spill] sm:$0xff] }
 0x274   : > { %v1299_v57 = vsel %vm1288_vm14, nan, %v1298_v22  ;;  %vm1496_vm9 = vweird.f32 %v5967_v27  ;;  %v1605_v19 = vxor.u32 2147483648, %v6817_v42  ;;  %vm9077_vm8 = vcmask 261120  }
 0x275   : > { %4944 = vmatprep.mubr.msk.f32.mxu1 %vm9077_vm8, %v675_v62  ;;  %v7046_v63 = vsel %vm1392_vm12, nan, %v1402_v14  ;;  %vm1499_vm1 = vcmp.lt.s32.totalorder %v1498_v47, 2  ;;  %v1608_v41 = vxor.u32 2147483648, %v6800_v12  ;;  %vm9078_vm7 = vcmp.lt.s32.totalorder %v6346_v15, 0  ;;  %vm9079_vm0 = vmmov %vm9077_vm8  ;;  %v9092_v14 = vld [vmem:[#allocation8_spill] sm:$0xff] }
 0x276   : > { %v1907_v31 = vsel %vm9078_vm7, %v1906_v24, %v6534_v48  ;;  %4945 = vmatmul.mubr.msk.f32.vlgmr.msra.gmra.mrb[0].mxu1 %vm9079_vm0, %v6922_v51  ;;  %v1506_v45 = vsel %vm1499_vm1, %v1502_v52, %v1505_v59  ;;  %v1809_v4 = vadd.s32 3, %v1805_v58  ;;  %v2010_v28 = vsub.s32 4, %v6471_v29  ;;  %vm9080_vm6 = vmmov %vm9079_vm0 }
 0x277   : > { %v1909_v11 = vsel %vm6811_vm4, 0, %v1907_v31  ;;  %4947 = vmatprep.mubr.msk.f32.mxu1 %vm9080_vm6, %v6941_v56  ;;  %vm1603_vm14 = vcmp.lt.s32.totalorder %v1602_v6, 2  ;;  %v1706_v60 = vand.u32 3, %v1705_v26  ;;  %v1709_v8 = vxor.u32 2147483648, %v6872_v10  ;;  %vm9082_vm4 = vmmov %vm9079_vm0 }
 0x278   : > { %v1712_v25 = vxor.u32 2147483648, %v6861_v20  ;;  %vm1604_vm10 = vcmp.eq.s32.totalorder %v1602_v6, 0  ;;  %vm1607_vm3 = vcmp.eq.s32.totalorder %v1602_v6, 2  ;;  %vm9081_vm12 = vcmp.lt.s32.totalorder %v6271_v13, 0  ;;  %vm9085_vm2 = vmmov %vm9079_vm0 }
 0x279   : > { %v2011_v48 = vsel %vm9081_vm12, %v2010_v28, %v6471_v29  ;;  %v2114_v39 = vsub.s32 4, %v6720_v46  ;;  %v1507_v51 = vsel %vm1496_vm9, nan, %v1506_v45  ;;  %v1606_v47 = vsel %vm1604_vm10, %v6800_v12, %v1605_v19  ;;  %v9086_v12 = vld [vmem:[#allocation15_spill] sm:$0xff]  ;;  %v9097_v45 = vld [vmem:[#allocation5_spill] sm:$0xff] }
 0x27a   : > { %v1609_v56 = vsel %vm1607_vm3, %v1608_v41, %v6817_v42  ;;  %v1913_v18 = vadd.s32 3, %v1909_v11  ;;  %4948 = vmatmul.mubr.msk.f32.gmra.mrb[2].mxu1 %vm9082_vm4, %v6978_v55  ;;  %vm1600_vm5 = vweird.f32 %v5899_v33  ;;  %v1810_v9 = vand.u32 3, %v1809_v4  ;;  %v9096_v41 = vld [vmem:[#allocation2_spill] sm:$0xff] }
 0x27b   : > { %vm9083_vm11 = vnez %v9012_v2  ;;  %vm9084_vm15 = vcmp.lt.s32.totalorder %v6449_v40, 0  ;;  %v2218_v27 = vsub.s32 4, %v6631_v21  ;;  %4950 = vmatprep.mubr.msk.f32.mxu1 %vm9085_vm2, %v6994_v38  ;;  %vm1704_vm9 = vweird.f32 %v6109_v54  ;;  %v346_v38 = vld [vmem:[%s8718_s5] sm:$0xff] }
 0x27c   : > { %v2013_v36 = vsel %vm9083_vm11, 0, %v2011_v48  ;;  %v2115_v29 = vsel %vm9084_vm15, %v2114_v39, %v6720_v46  ;;  %vm1708_vm8 = vcmp.eq.s32.totalorder %v1706_v60, 0  ;;  %vm1711_vm1 = vcmp.eq.s32.totalorder %v1706_v60, 2  ;;  %vm9094_vm11 = vmmov %vm9085_vm2  ;;  %v9101_v48 = vld [vmem:[#allocation9_spill] sm:$0xff] }
 0x27d   : > { %v1813_v42 = vxor.u32 2147483648, %v9086_v12  ;;  %v2117_v55 = vsel %vm6930_vm13, 0, %v2115_v29  ;;  %v1610_v2 = vsel %vm1603_vm14, %v1606_v47, %v1609_v56  ;;  %v1710_v7 = vsel %vm1708_vm8, %v6861_v20, %v1709_v8  ;;  %v348_v20 = vld [vmem:[%s8718_s5 + $0x10] sm:$0xff]  ;;  %vm9090_vm13 = vmmov %vm9079_vm0  ;;  %v9100_v8 = vld [vmem:[#allocation17_spill] sm:$0xff] }
 0x27e   : > { %v1713_v46 = vsel %vm1711_vm1, %v1712_v25, %v6872_v10  ;;  %v1816_v43 = vxor.u32 2147483648, %v9087_v44  ;;  %v1914_v37 = vand.u32 3, %v1913_v18  ;;  %v2017_v53 = vadd.s32 3, %v2013_v36  ;;  %v349_v10 = vld [vmem:[%s8718_s5 + $0x18] sm:$0xff]  ;;  %4951 = vmatmul.mubr.msk.f32.gmra.mrb[4].mxu1 %vm9090_vm13, %v7001_v34  ;;  %vm9091_vm14 = vmmov %vm9085_vm2 }
 0x27f   : > { %v2121_v22 = vadd.s32 3, %v2117_v55  ;;  %vm9089_vm7 = vcmp.lt.s32.totalorder %v9088_v3, 0  ;;  %vm1707_vm0 = vcmp.lt.s32.totalorder %v1706_v60, 2  ;;  %vm1812_vm6 = vcmp.eq.s32.totalorder %v1810_v9, 0  ;;  %4953 = vmatprep.mubr.msk.f32.mxu1 %vm9091_vm14, %v1299_v57  ;;  %vm9095_vm15 = vmmov %vm9085_vm2 }
 0x280   : > { %v2219_v17 = vsel %vm9089_vm7, %v2218_v27, %v6631_v21  ;;  %v1917_v35 = vxor.u32 2147483648, %v6896_v49  ;;  %v1920_v21 = vxor.u32 2147483648, %v6894_v16  ;;  %v1714_v32 = vsel %vm1707_vm0, %v1710_v7, %v1713_v46 }
 0x281   : > { %v1814_v5 = vsel %vm1812_vm6, %v9087_v44, %v1813_v42  ;;  %vm1815_vm10 = vcmp.eq.s32.totalorder %v1810_v9, 2  ;;  %vm9093_vm3 = vnez %v9092_v14  ;;  %v2125_v52 = vxor.u32 2147483648, %v7035_v23  ;;  %vm9098_vm6 = vmmov %vm9094_vm11 }
 0x282   : > { %v2221_v24 = vsel %vm9093_vm3, 0, %v2219_v17  ;;  %v1817_v50 = vsel %vm1815_vm10, %v1816_v43, %v9086_v12  ;;  %v5048_v34 = vpack.c.bf16 %v347_v1, %v346_v38  ;;  %v5052_v6 = vpack.c.bf16 %v349_v10, %v348_v20  ;;  %4954 = vmatmul.mubr.msk.f32.gmra.mrb[6].mxu1 %vm9094_vm11, %v7046_v63  ;;  %vm9099_vm14 = vmmov %vm9098_vm6 }
 0x283   : > { %vm1916_vm12 = vcmp.eq.s32.totalorder %v1914_v37, 0  ;;  %vm1919_vm4 = vcmp.eq.s32.totalorder %v1914_v37, 2  ;;  %v2018_v0 = vand.u32 3, %v2017_v53  ;;  %v2122_v59 = vand.u32 3, %v2121_v22  ;;  %4956 = vmatprep.mubr.msk.f32.mxu1 %vm9095_vm15, %v1507_v51  ;;  %vm9103_vm15 = vmmov %vm9098_vm6 }
 0x284   : > { %v1918_v26 = vsel %vm1916_vm12, %v6894_v16, %v1917_v35  ;;  %v1921_v58 = vsel %vm1919_vm4, %v1920_v21, %v6896_v49  ;;  %v2128_v62 = vxor.u32 2147483648, %v7028_v61  ;;  %v2225_v57 = vadd.s32 3, %v2221_v24  ;;  %5049 = vmatprep.subr.bf16.mxu0 %v5048_v34  ;;  %vm9102_vm12 = vmmov %vm9098_vm6 }
 0x285   : > { %v1611_v19 = vsel %vm1600_vm5, nan, %v1610_v2  ;;  %vm1811_vm2 = vcmp.lt.s32.totalorder %v1810_v9, 2  ;;  %v2021_v31 = vxor.u32 2147483648, %v9096_v41  ;;  %v2024_v4 = vxor.u32 2147483648, %v9097_v45  ;;  %5051 = vmatpush3.bf16.msra.mxu0 %v5048_v34 }
 0x286   : > { %v1715_v16 = vsel %vm1704_vm9, nan, %v1714_v32  ;;  %v1818_v63 = vsel %vm1811_vm2, %v1814_v5, %v1817_v50  ;;  %vm1912_vm8 = vweird.f32 %v6346_v15  ;;  %vm1915_vm1 = vcmp.lt.s32.totalorder %v1914_v37, 2  ;;  %5053 = vmatprep.subr.bf16.mxu0 %v5052_v6  ;;  %4957 = vmatmul.mubr.msk.f32.gmra.mrb[8].mxu1 %vm9098_vm6, %v1611_v19 }
 0x287   : > { %v1922_v49 = vsel %vm1915_vm1, %v1918_v26, %v1921_v58  ;;  %vm2020_vm7 = vcmp.eq.s32.totalorder %v2018_v0, 0  ;;  %vm2124_vm13 = vcmp.eq.s32.totalorder %v2122_v59, 0  ;;  %vm2127_vm0 = vcmp.eq.s32.totalorder %v2122_v59, 2  ;;  %4959 = vmatprep.mubr.msk.f32.mxu1 %vm9099_vm14, %v1715_v16  ;;  %v7169_v26 = vld [vmem:[%s8719_s6] ss:$0 sm:$0xff] }
 0x288   : > { %vm2023_vm5 = vcmp.eq.s32.totalorder %v2018_v0, 2  ;;  %v2126_v33 = vsel %vm2124_vm13, %v7028_v61, %v2125_v52  ;;  %v2129_v11 = vsel %vm2127_vm0, %v2128_v62, %v7035_v23  ;;  %v2226_v28 = vand.u32 3, %v2225_v57  ;;  %vm9105_vm13 = vmmov %vm9098_vm6 }
 0x289   : > { %v2022_v54 = vsel %vm2020_vm7, %v9097_v45, %v2021_v31  ;;  %v2025_v60 = vsel %vm2023_vm5, %v2024_v4, %v9096_v41  ;;  %v2229_v25 = vxor.u32 2147483648, %v9100_v8  ;;  %v2232_v39 = vxor.u32 2147483648, %v9101_v48  ;;  %5055 = vmatpush3.bf16.msra.mxu0 %v5052_v6  ;;  %vm9104_vm7 = vmmov %vm9098_vm6 }
 0x28a   : > { %vm1808_vm9 = vweird.f32 %v6105_v30  ;;  %v1923_v51 = vsel %vm1912_vm8, nan, %v1922_v49  ;;  %vm2123_vm10 = vcmp.lt.s32.totalorder %v2122_v59, 2  ;;  %vm2019_vm3 = vcmp.lt.s32.totalorder %v2018_v0, 2  ;;  %vm9106_vm5 = vmmov %vm9098_vm6 }
 0x28b   : > { %v1819_v61 = vsel %vm1808_vm9, nan, %v1818_v63  ;;  %v2130_v23 = vsel %vm2123_vm10, %v2126_v33, %v2129_v11  ;;  %v2026_v47 = vsel %vm2019_vm3, %v2022_v54, %v2025_v60  ;;  %vm2228_vm4 = vcmp.eq.s32.totalorder %v2226_v28, 0  ;;  %vm9107_vm14 = vmmov %vm9106_vm5 }
 0x28c   : > { %4960 = vmatmul.mubr.msk.f32.gmra.mrb[10].mxu1 %vm9102_vm12, %v1819_v61  ;;  %vm2231_vm11 = vcmp.eq.s32.totalorder %v2226_v28, 2  ;;  %vm2120_vm2 = vweird.f32 %v6449_v40  ;;  %v2230_v56 = vsel %vm2228_vm4, %v9101_v48, %v2229_v25  ;;  %vm2016_vm1 = vweird.f32 %v6271_v13  ;;  %v4707_v40 = vld [vmem:[%s8717_s4] ss:$0 sm:$0xff]  ;;  %vm9108_vm9 = vmmov %vm9106_vm5 }
 0x28d   : > { %4962 = vmatprep.mubr.msk.f32.mxu1 %vm9103_vm15, %v1923_v51  ;;  %v2233_v30 = vsel %vm2231_vm11, %v2232_v39, %v9100_v8  ;;  %v2131_v15 = vsel %vm2120_vm2, nan, %v2130_v23  ;;  %v2027_v18 = vsel %vm2016_vm1, nan, %v2026_v47  ;;  %vm2227_vm8 = vcmp.lt.s32.totalorder %v2226_v28, 2  ;;  %vm9109_vm10 = vmmov %vm9106_vm5 }
 0x28e   : > { %v2234_v9 = vsel %vm2227_vm8, %v2230_v56, %v2233_v30  ;;  %vm2224_vm0 = vweird.f32 %v9088_v3  ;;  %vm9110_vm3 = vmmov %vm9106_vm5 }
 0x28f   : > { %v2235_v36 = vsel %vm2224_vm0, nan, %v2234_v9  ;;  %vm9111_vm12 = vmmov %vm9110_vm3 }
 0x290   : > { %4963 = vmatmul.mubr.msk.f32.gmra.mrb[12].mxu1 %vm9104_vm7, %v2027_v18  ;;  %vm9112_vm4 = vmmov %vm9110_vm3 }
 0x291   : > { %4965 = vmatprep.mubr.msk.f32.mxu1 %vm9105_vm13, %v2131_v15  ;;  %vm9113_vm11 = vmmov %vm9110_vm3 }
 0x292   : > { %vm9114_vm15 = vmmov %vm9110_vm3 }
 0x293   : > { %vm9115_vm2 = vmmov %vm9110_vm3 }
 0x294   : > { %4966 = vmatmul.mubr.msk.f32.gmra.mrb[14].mxu1 %vm9098_vm6, %v2235_v36  ;;  %vm9116_vm1 = vmmov %vm9115_vm2 }
 0x295   : > { %vm9117_vm8 = vmmov %vm9116_vm1 }
 0x296   : > { %vm9118_vm7 = vmmov %vm9116_vm1 }
 0x297   : > { %vm9119_vm13 = vmmov %vm9116_vm1 }
 0x298   : > { %vm9120_vm0 = vmmov %vm9116_vm1 }
 0x299   : > { %vm9121_vm6 = vmmov %vm9120_vm0 }
 0x349   : > { %v4946_v29 = vpop.f32.mrb[0].mxu1 }
 0x34a   : > { %v2372_v27 = vpop.f32.mrb[1].mxu1  ;;  %v2378_v12 = vadd.f32 %v4946_v29, %v4707_v40 }
 0x34b   : > { %v2373_v13 = vadd.f32 %v4707_v40, %v2372_v27 }
 0x34d   : > { %v4949_v42 = vpop.f32.mrb[2].mxu1  ;;  %4976 = vmatprep.mubr.msk.f32.mxu0 %vm9106_vm5, %v2373_v13 }
 0x34e   : > { %v2382_v55 = vpop.f32.mrb[3].mxu1  ;;  %4977 = vmatmul.mubr.msk.f32.vlgmr.msra.gmra.mrb[16].mxu0 %vm9107_vm14, %v2378_v12  ;;  %v2388_v7 = vadd.f32 %v4949_v42, %v4707_v40 }
 0x34f   : > { %v2383_v2 = vadd.f32 %v4707_v40, %v2382_v55 }
 0x351   : > { %v4952_v46 = vpop.f32.mrb[4].mxu1  ;;  %4979 = vmatprep.mubr.msk.f32.mxu0 %vm9108_vm9, %v2383_v2 }
 0x352   : > { %v2392_v44 = vpop.f32.mrb[5].mxu1  ;;  %4980 = vmatmul.mubr.msk.f32.gmra.mrb[18].mxu0 %vm9109_vm10, %v2388_v7  ;;  %v2398_v38 = vadd.f32 %v4952_v46, %v4707_v40  ;;  %v9124_v46 = vmov 683565275  }
 0x353   : > { %v2393_v43 = vadd.f32 %v4707_v40, %v2392_v44 }
 0x355   : > { %v4955_v37 = vpop.f32.mrb[6].mxu1  ;;  %4982 = vmatprep.mubr.msk.f32.mxu0 %vm9110_vm3, %v2393_v43 }
 0x356   : > { %v2402_v53 = vpop.f32.mrb[7].mxu1  ;;  %4983 = vmatmul.mubr.msk.f32.gmra.mrb[20].mxu0 %vm9111_vm12, %v2398_v38  ;;  %v2408_v3 = vadd.f32 %v4955_v37, %v4707_v40  ;;  %v9125_v37 = vmov 2475754826  }
 0x357   : > { %v2403_v22 = vadd.f32 %v4707_v40, %v2402_v53 }
 0x359   : > { %v4958_v17 = vpop.f32.mrb[8].mxu1  ;;  %4985 = vmatprep.mubr.msk.f32.mxu0 %vm9112_vm4, %v2403_v22  ;;  %v9126_v22 = vmov 2131351028  }
 0x35a   : > { %v2412_v1 = vpop.f32.mrb[9].mxu1  ;;  %4986 = vmatmul.mubr.msk.f32.gmra.mrb[22].mxu0 %vm9113_vm11, %v2408_v3  ;;  %v2418_v10 = vadd.f32 %v4958_v17, %v4707_v40  ;;  %v9127_v17 = vmov 2102212464  }
 0x35b   : > { %v2413_v20 = vadd.f32 %v4707_v40, %v2412_v1 }
 0x35d   : > { %4988 = vmatprep.mubr.msk.f32.mxu0 %vm9114_vm15, %v2413_v20  ;;  %v9128_v20 = vmov 920167782  }
 0x35e   : > { %4989 = vmatmul.mubr.msk.f32.gmra.mrb[24].mxu0 %vm9115_vm2, %v2418_v10 }
 0x35f   : > { %v4961_v35 = vpop.f32.mrb[10].mxu1 }
 0x360   : > { %v2422_v21 = vpop.f32.mrb[11].mxu1  ;;  %v2428_v5 = vadd.f32 %v4961_v35, %v4707_v40 }
 0x361   : > { %v2423_v32 = vadd.f32 %v4707_v40, %v2422_v21 }
 0x363   : > { %v4964_v14 = vpop.f32.mrb[12].mxu1  ;;  %4991 = vmatprep.mubr.msk.f32.mxu0 %vm9116_vm1, %v2423_v32 }
 0x364   : > { %v2432_v24 = vpop.f32.mrb[13].mxu1  ;;  %4992 = vmatmul.mubr.msk.f32.gmra.mrb[26].mxu0 %vm9117_vm8, %v2428_v5  ;;  %v2438_v52 = vadd.f32 %v4964_v14, %v4707_v40 }
 0x365   : > { %v2433_v50 = vadd.f32 %v4707_v40, %v2432_v24 }
 0x367   : > { %v4967_v34 = vpop.f32.mrb[14].mxu1  ;;  %4994 = vmatprep.mubr.msk.f32.mxu0 %vm9118_vm7, %v2433_v50  ;;  %v9129_v50 = vmov 1326507024  }
 0x368   : > { %v2442_v6 = vpop.f32.mrb[15].mxu1  ;;  %4995 = vmatmul.mubr.msk.f32.gmra.mrb[28].mxu0 %vm9119_vm13, %v2438_v52  ;;  %v2448_v59 = vadd.f32 %v4967_v34, %v4707_v40 }
 0x369   : > { %v2443_v0 = vadd.f32 %v4707_v40, %v2442_v6 }
 0x36b   : > { %4997 = vmatprep.mubr.msk.f32.mxu0 %vm9120_vm0, %v2443_v0 }
 0x36c   : > { %4998 = vmatmul.mubr.msk.f32.gmra.mrb[30].mxu0 %vm9121_vm6, %v2448_v59 }
 0x421   : > { %v4978_v58 = vpop.f32.mrb[16].mxu0 }
 0x422   : > { %v7172_v62 = vadd.f32 %v4978_v58, %v7169_v26  ;;  %v2571_v57 = vpop.f32.mrb[17].mxu0 }
 0x423   : > { %v7175_v19 = vadd.f32 %v7169_v26, %v2571_v57 }
 0x424   : > { %v2754_v41 = vand.u32 2147483647, %v7172_v62  ;;  %v2757_v31 = vand.u32 2139095040, %v7172_v62 }
 0x425   : > { %v2650_v45 = vand.u32 2147483647, %v7175_v19  ;;  %v2653_v4 = vand.u32 2139095040, %v7175_v19  ;;  %v4981_v16 = vpop.f32.mrb[18].mxu0 }
 0x426   : > { %v2758_v63 = vshrl.u32 %v2757_v31, 23  ;;  %v2761_v49 = vand.u32 8388607, %v2754_v41  ;;  %v7184_v33 = vadd.f32 %v4981_v16, %v7169_v26  ;;  %v2581_v11 = vpop.f32.mrb[19].mxu0 }
 0x427   : > { %v2654_v28 = vshrl.u32 %v2653_v4, 23  ;;  %v2657_v54 = vand.u32 8388607, %v2650_v45  ;;  %v7197_v27 = vadd.f32 %v7169_v26, %v2581_v11 }
 0x428   : > { %9122 = vst [vmem:[#allocation4_spill] sm:$0xff] %v7184_v33  ;;  %v4745_v60 = vadd.s32 4294967169, %v2758_v63  ;;  %v2965_v25 = vand.u32 2139095040, %v7184_v33  ;;  %v2762_v39 = vor.u32 8388608, %v2761_v49  ;;  %v2962_v47 = vand.u32 2147483647, %v7184_v33 }
 0x429   : > { %v4741_v8 = vadd.s32 4294967169, %v2654_v28  ;;  %v7189_v48 = vpop.f32.mrb[20].mxu0  ;;  %v2658_v61 = vor.u32 8388608, %v2657_v54  ;;  %9123 = vst [vmem:[#allocation7_spill] sm:$0xff] %v7197_v27 }
 0x42a   : > { %v2764_v51 = vadd.s32 1, %v4745_v60  ;;  %v2966_v56 = vshrl.u32 %v2965_v25, 23  ;;  %v7192_v30 = vpop.f32.mrb[21].mxu0  ;;  %v7201_v12 = vshll.u32 %v2762_v39, 8  ;;  %v7209_v2 = vand.u32 8388607, %v2962_v47 }
 0x42b   : > { %v2660_v23 = vadd.s32 1, %v4741_v8  ;;  %v7205_v55 = vshll.u32 %v2658_v61, 8 }
 0x42c   : > { %vm2765_vm5 = vcmp.gt.s32.totalorder %v2764_v51, 0  ;;  %v4753_v18 = vadd.s32 4294967169, %v2966_v56 }
 0x42d   : > { %v2766_v15 = vsel %vm2765_vm5, %v2764_v51, 0  ;;  %vm2661_vm14 = vcmp.gt.s32.totalorder %v2660_v23, 0  ;;  %v7194_v9 = vpop.f32.mrb[22].mxu0 }
 0x42e   : > { %v2767_v36 = vshrl.u32 %v2766_v15, 5  ;;  %v2768_v40 = vand.u32 31, %v2766_v15  ;;  %v2662_v29 = vsel %vm2661_vm14, %v2660_v23, 0  ;;  %v7199_v13 = vpop.f32.mrb[23].mxu0  ;;  %v7212_v38 = vadd.s32 1, %v4753_v18 }
 0x42f   : > { %v7203_v42 = vshrl.u32 %v2662_v29, 5  ;;  %v2664_v43 = vand.u32 31, %v2662_v29 }
 0x430   : > { %v2769_v7 = vsub.s32 32, %v2768_v40  ;;  %v2771_v44 = vshll.u32 %v9124_v46, %v2768_v40  ;;  %v2774_v53 = vshll.u32 %v9125_v37, %v2768_v40  ;;  %v2777_v3 = vshll.u32 %v9126_v22, %v2768_v40 }
 0x431   : > { %v2780_v1 = vshll.u32 %v9127_v17, %v2768_v40  ;;  %v2783_v10 = vshll.u32 %v9128_v20, %v2768_v40  ;;  %vm2786_vm9 = vcmp.lt.s32.totalorder %v2767_v36, 1  ;;  %v7221_v5 = vpop.f32.mrb[24].mxu0  ;;  %vm2787_vm10 = vcmp.lt.s32.totalorder %v2767_v36, 2 }
 0x432   : > { %v2772_v35 = vshrl.u32 %v9125_v37, %v2769_v7  ;;  %v2775_v21 = vshrl.u32 %v9126_v22, %v2769_v7  ;;  %v2778_v32 = vshrl.u32 %v9127_v17, %v2769_v7  ;;  %v2770_v14 = vshrl.u32 %v9124_v46, %v2769_v7 }
 0x433   : > { %v2781_v24 = vshrl.u32 %v9128_v20, %v2769_v7  ;;  %v2784_v52 = vshrl.u32 %v9129_v50, %v2769_v7  ;;  %v2665_v59 = vsub.s32 32, %v2664_v43  ;;  %vm2788_vm3 = vcmp.lt.s32.totalorder %v2767_v36, 3 }
 0x434   : > { %v2773_v34 = vor.u32 %v2772_v35, %v2771_v44  ;;  %v2776_v6 = vor.u32 %v2775_v21, %v2774_v53  ;;  %v2779_v0 = vor.u32 %v2778_v32, %v2777_v3  ;;  %vm2789_vm12 = vcmp.lt.s32.totalorder %v2767_v36, 4 }
 0x435   : > { %v2782_v58 = vor.u32 %v2781_v24, %v2780_v1  ;;  %v2785_v57 = vor.u32 %v2784_v52, %v2783_v10  ;;  %v2667_v54 = vshll.u32 %v9124_v46, %v2664_v43  ;;  %v2668_v25 = vshrl.u32 %v9125_v37, %v2665_v59 }
 0x436   : > { %v2790_v31 = vsel %vm2786_vm9, %v2770_v14, %v2773_v34  ;;  %v2791_v4 = vsel %vm2789_vm12, %v2779_v0, 2102212464  ;;  %v2794_v16 = vsel %vm2786_vm9, %v2773_v34, %v2776_v6  ;;  %v2798_v63 = vsel %vm2786_vm9, %v2776_v6, %v2779_v0 }
 0x437   : > { %v2792_v49 = vsel %vm2788_vm3, %v2776_v6, %v2791_v4  ;;  %v2795_v11 = vsel %vm2789_vm12, %v2782_v58, 920167782  ;;  %v2799_v28 = vsel %vm2789_vm12, %v2785_v57, 1326507024  ;;  %v2670_v39 = vshll.u32 %v9125_v37, %v2664_v43 }
 0x438   : > { %v2796_v60 = vsel %vm2788_vm3, %v2779_v0, %v2795_v11  ;;  %v2800_v8 = vsel %vm2788_vm3, %v2782_v58, %v2799_v28  ;;  %v2793_v51 = vsel %vm2787_vm10, %v2790_v31, %v2792_v49  ;;  %v2671_v56 = vshrl.u32 %v9126_v22, %v2665_v59 }
 0x439   : > { %v2797_v61 = vsel %vm2787_vm10, %v2794_v16, %v2796_v60  ;;  %v2801_v23 = vsel %vm2787_vm10, %v2798_v63, %v2800_v8  ;;  %v2669_v7 = vor.u32 %v2668_v25, %v2667_v54  ;;  %v2673_v53 = vshll.u32 %v9126_v22, %v2664_v43  ;;  %v7259_v16 = vpop.f32.mrb[25].mxu0 }
 0x43a   : > { %v7237_v15 = vmul.u32.u64.low %v7201_v12, %v2801_v23  ;;  %v7238_v18 = vmul.u32.u64.high %v7201_v12, %v2801_v23, %v7237_v15  ;;  %v7241_v40 = vmul.u32.u64.low %v7201_v12, %v2797_v61  ;;  %v7242_v29 = vmul.u32.u64.high %v7201_v12, %v2797_v61, %v7241_v40 }
 0x43b   : > { %v2672_v44 = vor.u32 %v2671_v56, %v2670_v39  ;;  %v2674_v3 = vshrl.u32 %v9127_v17, %v2665_v59  ;;  %v2666_v1 = vshrl.u32 %v9124_v46, %v2665_v59  ;;  %v2676_v36 = vshll.u32 %v9127_v17, %v2664_v43 }
 0x43c   : > { %v2677_v10 = vshrl.u32 %v9128_v20, %v2665_v59  ;;  %v2680_v35 = vshrl.u32 %v9129_v50, %v2665_v59  ;;  %v2809_v21 = vmul.u32 %v7201_v12, %v2793_v51  ;;  %v2679_v14 = vshll.u32 %v9128_v20, %v2664_v43 }
 0x43d   : > { %v2675_v32 = vor.u32 %v2674_v3, %v2673_v53  ;;  %vm2682_vm4 = vcmp.lt.s32.totalorder %v7203_v42, 1  ;;  %vm2811_vm11 = vc.u32 %v7238_v18, %v7241_v40  ;;  %v2812_v24 = vadd.s32 1, %v7242_v29 }
 0x43e   : > { %v2678_v52 = vor.u32 %v2677_v10, %v2676_v36  ;;  %vm2683_vm15 = vcmp.lt.s32.totalorder %v7203_v42, 2  ;;  %v2681_v34 = vor.u32 %v2680_v35, %v2679_v14  ;;  %vm2684_vm2 = vcmp.lt.s32.totalorder %v7203_v42, 3 }
 0x43f   : > { %vm2685_vm1 = vcmp.lt.s32.totalorder %v7203_v42, 4  ;;  %v2690_v6 = vsel %vm2682_vm4, %v2669_v7, %v2672_v44  ;;  %v2813_v12 = vsel %vm2811_vm11, %v2812_v24, %v7242_v29  ;;  %v2694_v43 = vsel %vm2682_vm4, %v2672_v44, %v2675_v32 }
 0x440   : > { %v2687_v0 = vsel %vm2685_vm1, %v2675_v32, 2102212464  ;;  %v2691_v59 = vsel %vm2685_vm1, %v2678_v52, 920167782  ;;  %v2814_v58 = vadd.s32 %v2813_v12, %v2809_v21  ;;  %v2686_v57 = vsel %vm2682_vm4, %v2666_v1, %v2669_v7 }
 0x441   : > { %v2692_v31 = vsel %vm2684_vm2, %v2675_v32, %v2691_v59  ;;  %v2695_v4 = vsel %vm2685_vm1, %v2681_v34, 1326507024  ;;  %v2688_v63 = vsel %vm2684_vm2, %v2672_v44, %v2687_v0  ;;  %vm2973_vm8 = vcmp.gt.s32.totalorder %v7212_v38, 0 }
 0x442   : > { %v2693_v49 = vsel %vm2683_vm15, %v2690_v6, %v2692_v31  ;;  %v2696_v11 = vsel %vm2684_vm2, %v2678_v52, %v2695_v4  ;;  %v2815_v28 = vadd.s32 536870912, %v2814_v58  ;;  %v2974_v51 = vsel %vm2973_vm8, %v7212_v38, 0 }
 0x443   : > { %v2697_v54 = vsel %vm2683_vm15, %v2694_v43, %v2696_v11  ;;  %v7267_v60 = vmul.u32.u64.low %v7205_v55, %v2693_v49  ;;  %v7268_v8 = vmul.u32.u64.high %v7205_v55, %v2693_v49, %v7267_v60  ;;  %v2861_v61 = vand.u32 2139095040, %v7197_v27 }
 0x444   : > { %v7272_v25 = vmul.u32.u64.low %v7205_v55, %v2697_v54  ;;  %v7273_v39 = vmul.u32.u64.high %v7205_v55, %v2697_v54, %v7272_v25  ;;  %v7277_v23 = vshrl.u32 %v2815_v28, 30  ;;  %v2689_v56 = vsel %vm2683_vm15, %v2686_v57, %v2688_v63 }
 0x445   : > { %v2970_v15 = vor.u32 8388608, %v7209_v2  ;;  %v2976_v29 = vand.u32 31, %v2974_v51  ;;  %v2708_v44 = vadd.s32 1, %v7268_v8  ;;  %v2705_v3 = vmul.u32 %v7205_v55, %v2689_v56 }
 0x446   : > { %v2817_v7 = vshll.u32 %v7277_v23, 30  ;;  %vm2707_vm7 = vc.u32 %v7273_v39, %v7267_v60  ;;  %v2858_v38 = vand.u32 2147483647, %v7197_v27  ;;  %v2862_v1 = vshrl.u32 %v2861_v61, 23 }
 0x447   : > { %v2977_v53 = vsub.s32 32, %v2976_v29  ;;  %v2810_v36 = vadd.s32 %v7241_v40, %v7238_v18  ;;  %v2709_v2 = vsel %vm2707_vm7, %v2708_v44, %v7268_v8  ;;  %v7292_v10 = vshll.u32 %v2970_v15, 8 }
 0x448   : > { %v7289_v42 = vsub.s32 %v2814_v58, %v2817_v7  ;;  %v2710_v35 = vadd.s32 %v2709_v2, %v2705_v3  ;;  %v2979_v21 = vshll.u32 %v9124_v46, %v2976_v29  ;;  %v2975_v24 = vshrl.u32 %v2974_v51, 5 }
 0x449   : > { %v2980_v32 = vshrl.u32 %v9125_v37, %v2977_v53  ;;  %v2983_v55 = vshrl.u32 %v9126_v22, %v2977_v53  ;;  %v2982_v52 = vshll.u32 %v9125_v37, %v2976_v29  ;;  %v2986_v18 = vshrl.u32 %v9127_v17, %v2977_v53 }
 0x44a   : > { %v2820_v14 = vsub.s32 0, %v7289_v42  ;;  %v2711_v40 = vadd.s32 536870912, %v2710_v35  ;;  %v2985_v6 = vshll.u32 %v9126_v22, %v2976_v29  ;;  %v4749_v12 = vadd.s32 4294967169, %v2862_v1 }
 0x44b   : > { %v2981_v34 = vor.u32 %v2980_v32, %v2979_v21  ;;  %v2984_v59 = vor.u32 %v2983_v55, %v2982_v52  ;;  %v2988_v43 = vshll.u32 %v9127_v17, %v2976_v29  ;;  %v2989_v58 = vshrl.u32 %v9128_v20, %v2977_v53 }
 0x44c   : > { %v4746_v0 = vmin.u32 %v2820_v14, %v7289_v42  ;;  %v7304_v57 = vshrl.u32 %v2711_v40, 30  ;;  %v2987_v31 = vor.u32 %v2986_v18, %v2985_v6  ;;  %v2991_v4 = vshll.u32 %v9128_v20, %v2976_v29 }
 0x44d   : > { %v2992_v63 = vshrl.u32 %v9129_v50, %v2977_v53  ;;  %v2978_v11 = vshrl.u32 %v9124_v46, %v2977_v53  ;;  %v2990_v28 = vor.u32 %v2989_v58, %v2988_v43  ;;  %vm2994_vm13 = vcmp.lt.s32.totalorder %v2975_v24, 1 }
 0x44e   : > { %v2822_v49 = vclz %v4746_v0  ;;  %v2713_v54 = vshll.u32 %v7304_v57, 30  ;;  %vm2995_vm0 = vcmp.lt.s32.totalorder %v2975_v24, 2  ;;  %vm2997_vm6 = vcmp.lt.s32.totalorder %v2975_v24, 4 }
 0x44f   : > { %v2993_v8 = vor.u32 %v2992_v63, %v2991_v4  ;;  %vm2996_vm5 = vcmp.lt.s32.totalorder %v2975_v24, 3  ;;  %v3002_v51 = vsel %vm2994_vm13, %v2981_v34, %v2984_v59  ;;  %v3003_v61 = vsel %vm2997_vm6, %v2990_v28, 920167782 }
 0x450   : > { %v4747_v25 = vadd.s32 4294967294, %v2822_v49  ;;  %v7310_v56 = vsub.s32 %v2710_v35, %v2713_v54  ;;  %v2999_v15 = vsel %vm2997_vm6, %v2987_v31, 2102212464  ;;  %v3004_v29 = vsel %vm2996_vm5, %v2987_v31, %v3003_v61 }
 0x451   : > { %v3006_v7 = vsel %vm2994_vm13, %v2984_v59, %v2987_v31  ;;  %v2998_v44 = vsel %vm2994_vm13, %v2978_v11, %v2981_v34  ;;  %v3005_v53 = vsel %vm2995_vm0, %v3002_v51, %v3004_v29  ;;  %v3007_v3 = vsel %vm2997_vm6, %v2993_v8, 1326507024 }
 0x452   : > { %vm4748_vm14 = vcmp.lt.s32.totalorder %v4747_v25, 0  ;;  %v2716_v2 = vsub.s32 0, %v7310_v56  ;;  %v3008_v21 = vsel %vm2996_vm5, %v2990_v28, %v3007_v3  ;;  %v2868_v32 = vadd.s32 1, %v4749_v12  ;;  %v7332_v28 = vpop.f32.mrb[26].mxu0 }
 0x453   : > { %v2825_v1 = vsel %vm4748_vm14, 0, %v4747_v25  ;;  %v3000_v35 = vsel %vm2996_vm5, %v2984_v59, %v2999_v15  ;;  %v3009_v52 = vsel %vm2995_vm0, %v3006_v7, %v3008_v21  ;;  %v2865_v59 = vand.u32 8388607, %v2858_v38 }
 0x454   : > { %v2826_v55 = vsub.s32 32, %v2825_v1  ;;  %v2830_v14 = vsub.s32 4294967266, %v2825_v1  ;;  %v4742_v18 = vmin.u32 %v2716_v2, %v7310_v56  ;;  %vm2869_vm9 = vcmp.gt.s32.totalorder %v2868_v32, 0 }
 0x455   : > { %v7320_v40 = vmul.u32.u64.low %v7292_v10, %v3009_v52  ;;  %v7321_v34 = vmul.u32.u64.high %v7292_v10, %v3009_v52, %v7320_v40  ;;  %v7324_v43 = vmul.u32.u64.low %v7292_v10, %v3005_v53  ;;  %v7325_v58 = vmul.u32.u64.high %v7292_v10, %v3005_v53, %v7324_v43 }
 0x456   : > { %v2828_v6 = vshrl.u32 %v2810_v36, %v2826_v55  ;;  %v2831_v0 = vadd.s32 127, %v2830_v14  ;;  %v2718_v12 = vclz %v4742_v18  ;;  %v2870_v31 = vsel %vm2869_vm9, %v2868_v32, 0 }
 0x457   : > { %v2827_v4 = vshll.u32 %v7289_v42, %v2825_v1  ;;  %v3001_v49 = vsel %vm2995_vm0, %v2998_v44, %v3000_v35  ;;  %v2872_v11 = vand.u32 31, %v2870_v31  ;;  %vm3019_vm10 = vc.u32 %v7321_v34, %v7324_v43 }
 0x458   : > { %v2832_v63 = vshll.u32 %v2831_v0, 23  ;;  %v4743_v36 = vadd.s32 4294967294, %v2718_v12  ;;  %v3020_v25 = vadd.s32 1, %v7325_v58  ;;  %v3017_v61 = vmul.u32 %v7292_v10, %v3001_v49 }
 0x459   : > { %v2829_v54 = vor.u32 %v2828_v6, %v2827_v4  ;;  %v2873_v51 = vsub.s32 32, %v2872_v11  ;;  %v2866_v15 = vor.u32 8388608, %v2865_v59  ;;  %v7341_v7 = vadd.f32 %v7189_v48, %v7169_v26 }
 0x45a   : > { %v2833_v8 = vor.u32 4788187, %v2832_v63  ;;  %vm4744_vm3 = vcmp.lt.s32.totalorder %v4743_v36, 0  ;;  %v3021_v24 = vsel %vm3019_vm10, %v3020_v25, %v7325_v58  ;;  %v2706_v44 = vadd.s32 %v7267_v60, %v7273_v39 }
 0x45b   : > { %v2721_v29 = vsel %vm4744_vm3, 0, %v4743_v36  ;;  %9130 = vst [vmem:[#allocation19_spill] sm:$0xff] %v7341_v7  ;;  %v3022_v1 = vadd.s32 %v3021_v24, %v3017_v61  ;;  %v2836_v2 = vcvt.s32.f32 %v2829_v54  ;;  %v7345_v21 = vshrl.u32 %v2870_v31, 5 }
 0x45c   : > { %v2834_v42 = vand.u32 2147483647, %v2833_v8  ;;  %v2722_v53 = vsub.s32 32, %v2721_v29  ;;  %v2726_v3 = vsub.s32 4294967266, %v2721_v29  ;;  %v2876_v10 = vshrl.u32 %v9125_v37, %v2873_v51 }
 0x45d   : > { %v2879_v32 = vshrl.u32 %v9126_v22, %v2873_v51  ;;  %v3023_v14 = vadd.s32 536870912, %v3022_v1  ;;  %v2875_v35 = vshll.u32 %v9124_v46, %v2872_v11  ;;  %v2882_v48 = vshrl.u32 %v9127_v17, %v2873_v51 }
 0x45e   : > { %v2727_v55 = vadd.s32 127, %v2726_v3  ;;  %v2837_v52 = vmul.f32 %v2836_v2, %v2834_v42  ;;  %v2724_v18 = vshrl.u32 %v2706_v44, %v2722_v53  ;;  %v2878_v60 = vshll.u32 %v9125_v37, %v2872_v11 }
 0x45f   : > { %v2881_v39 = vshll.u32 %v9126_v22, %v2872_v11  ;;  %v7353_v6 = vshrl.u32 %v3023_v14, 30  ;;  %v2884_v0 = vshll.u32 %v9127_v17, %v2872_v11  ;;  %v2885_v58 = vshrl.u32 %v9128_v20, %v2873_v51 }
 0x460   : > { %v2728_v40 = vshll.u32 %v2727_v55, 23  ;;  %v2877_v12 = vor.u32 %v2876_v10, %v2875_v35  ;;  %v2880_v59 = vor.u32 %v2879_v32, %v2878_v60  ;;  %v2887_v31 = vshll.u32 %v9128_v20, %v2872_v11 }
 0x461   : > { %9131 = vst [vmem:[#allocation22_spill] sm:$0xff] %v7353_v6  ;;  %v2888_v4 = vshrl.u32 %v9129_v50, %v2873_v51  ;;  %v2723_v63 = vshll.u32 %v7310_v56, %v2721_v29  ;;  %v3025_v49 = vshll.u32 %v7353_v6, 30  ;;  %v2883_v36 = vor.u32 %v2882_v48, %v2881_v39 }
 0x462   : > { %v7363_v54 = vadd.f32 %v7169_v26, %v7192_v30  ;;  %v2729_v8 = vor.u32 4788187, %v2728_v40  ;;  %v2886_v25 = vor.u32 %v2885_v58, %v2884_v0  ;;  %v2906_v42 = vshll.u32 %v2866_v15, 8 }
 0x463   : > { %v2889_v61 = vor.u32 %v2888_v4, %v2887_v31  ;;  %vm2756_vm12 = vcmp.lt.s32.totalorder %v7172_v62, 0  ;;  %v2725_v24 = vor.u32 %v2724_v18, %v2723_v63  ;;  %v7366_v44 = vsub.s32 %v3022_v1, %v3025_v49 }
 0x464   : > { %9132 = vst [vmem:[#allocation3_spill] sm:$0xff] %v7363_v54  ;;  %v2874_v11 = vshrl.u32 %v9124_v46, %v2873_v51  ;;  %vm2890_vm4 = vcmp.lt.s32.totalorder %v7345_v21, 1  ;;  %v2838_v56 = vxor.u32 2147483648, %v2837_v52  ;;  %vm2891_vm11 = vcmp.lt.s32.totalorder %v7345_v21, 2 }
 0x465   : > { %vm2893_vm15 = vcmp.lt.s32.totalorder %v7345_v21, 4  ;;  %v2898_v30 = vsel %vm2890_vm4, %v2877_v12, %v2880_v59  ;;  %v3028_v29 = vsub.s32 0, %v7366_v44  ;;  %vm2892_vm2 = vcmp.lt.s32.totalorder %v7345_v21, 3 }
 0x466   : > { %v2895_v15 = vsel %vm2893_vm15, %v2883_v36, 2102212464  ;;  %v2899_v53 = vsel %vm2893_vm15, %v2886_v25, 920167782  ;;  %v2730_v3 = vand.u32 2147483647, %v2729_v8  ;;  %v2902_v1 = vsel %vm2890_vm4, %v2880_v59, %v2883_v36 }
 0x467   : > { %v2900_v2 = vsel %vm2892_vm2, %v2883_v36, %v2899_v53  ;;  %v2903_v10 = vsel %vm2893_vm15, %v2889_v61, 1326507024  ;;  %v2732_v32 = vcvt.s32.f32 %v2725_v24  ;;  %v4754_v51 = vmin.u32 %v3028_v29, %v7366_v44  ;;  %v7397_v8 = vpop.f32.mrb[27].mxu0 }
 0x468   : > { %v2894_v55 = vsel %vm2890_vm4, %v2874_v11, %v2877_v12  ;;  %v2901_v14 = vsel %vm2891_vm11, %v2898_v30, %v2900_v2  ;;  %v2896_v35 = vsel %vm2892_vm2, %v2880_v59, %v2895_v15  ;;  %v2904_v48 = vsel %vm2892_vm2, %v2886_v25, %v2903_v10 }
 0x469   : > { %v7377_v18 = vmul.u32.u64.low %v2906_v42, %v2901_v14  ;;  %v7378_v60 = vmul.u32.u64.high %v2906_v42, %v2901_v14, %v7377_v18  ;;  %v3030_v39 = vclz %v4754_v51  ;;  %v2905_v40 = vsel %vm2891_vm11, %v2902_v1, %v2904_v48 }
 0x46a   : > { %v8838_v0 = vand.u32 2147483647, %v7341_v7  ;;  %v3173_v58 = vand.u32 2139095040, %v7341_v7  ;;  %vm8902_vm1 = vcmp.lt.s32.totalorder %v7175_v19, 0  ;;  %v2733_v12 = vmul.f32 %v2732_v32, %v2730_v3 }
 0x46b   : > { %v7386_v31 = vmul.u32.u64.low %v2906_v42, %v2905_v40  ;;  %v7387_v4 = vmul.u32.u64.high %v2906_v42, %v2905_v40, %v7386_v31  ;;  %vm7391_vm8 = vcmp.le.f32.partialorder %v2754_v41, 0.7853982  ;;  %v4755_v63 = vadd.s32 4294967294, %v3030_v39 }
 0x46c   : > { %v2897_v49 = vsel %vm2891_vm11, %v2894_v55, %v2896_v35  ;;  %v3174_v36 = vshrl.u32 %v3173_v58, 23  ;;  %v2839_v25 = vsel %vm2756_vm12, %v2838_v56, %v2837_v52  ;;  %vm7403_vm7 = vcmp.le.f32.partialorder %v2650_v45, 0.7853982 }
 0x46d   : > { %v3018_v41 = vadd.s32 %v7324_v43, %v7321_v34  ;;  %v2916_v24 = vadd.s32 1, %v7378_v60  ;;  %vm4756_vm13 = vcmp.lt.s32.totalorder %v4755_v63, 0  ;;  %v3177_v11 = vand.u32 8388607, %v8838_v0 }
 0x46e   : > { %v4761_v21 = vadd.s32 4294967169, %v3174_v36  ;;  %v3069_v30 = vand.u32 2139095040, %v7363_v54  ;;  %v2734_v29 = vxor.u32 2147483648, %v2733_v12  ;;  %v3033_v52 = vsel %vm4756_vm13, 0, %v4755_v63 }
 0x46f   : > { %v2913_v56 = vmul.u32 %v2906_v42, %v2897_v49  ;;  %vm2915_vm0 = vc.u32 %v7387_v4, %v7377_v18  ;;  %v2842_v45 = vsel %vm7391_vm8, %v7172_v62, %v2839_v25  ;;  %v3034_v34 = vsub.s32 32, %v3033_v52 }
 0x470   : > { %v3038_v43 = vsub.s32 4294967266, %v3033_v52  ;;  %v2917_v15 = vsel %vm2915_vm0, %v2916_v24, %v7378_v60  ;;  %v3180_v3 = vadd.s32 1, %v4761_v21  ;;  %v8837_v2 = vand.u32 2147483647, %v7363_v54 }
 0x471   : > { %v2918_v53 = vadd.s32 %v2917_v15, %v2913_v56  ;;  %v3070_v1 = vshrl.u32 %v3069_v30, 23  ;;  %v3035_v10 = vshll.u32 %v7366_v44, %v3033_v52  ;;  %v3036_v32 = vshrl.u32 %v3018_v41, %v3034_v34 }
 0x472   : > { %v3039_v42 = vadd.s32 127, %v3038_v43  ;;  %v3178_v51 = vor.u32 8388608, %v3177_v11  ;;  %v2735_v55 = vsel %vm8902_vm1, %v2734_v29, %v2733_v12  ;;  %vm3181_vm6 = vcmp.gt.s32.totalorder %v3180_v3, 0 }
 0x473   : > { %v2919_v14 = vadd.s32 536870912, %v2918_v53  ;;  %v4757_v35 = vadd.s32 4294967169, %v3070_v1  ;;  %5270 = vcosq.f32 %v2842_v45  ;;  %v3037_v48 = vor.u32 %v3036_v32, %v3035_v10 }
 0x474   : > { %v3040_v39 = vshll.u32 %v3039_v42, 23  ;;  %v3182_v60 = vsel %vm3181_vm6, %v3180_v3, 0  ;;  %5272 = vsinq.f32 %v2842_v45  ;;  %v7427_v44 = vadd.f32 %v7194_v9, %v7169_v26 }
 0x475   : > { %v7423_v40 = vshrl.u32 %v2919_v14, 30  ;;  %v3184_v58 = vand.u32 31, %v3182_v60  ;;  %v7432_v31 = vsel %vm7403_vm7, %v7175_v19, %v2735_v55  ;;  %v7434_v63 = vshll.u32 %v3178_v51, 8 }
 0x476   : > { %9137 = vst [vmem:[#allocation21_spill] sm:$0xff] %v7427_v44  ;;  %v3041_v12 = vor.u32 4788187, %v3040_v39  ;;  %v7438_v49 = vand.u32 8388607, %v8837_v2  ;;  %v3183_v25 = vshrl.u32 %v3182_v60, 5  ;;  %v3044_v9 = vcvt.s32.f32 %v3037_v48 }
 0x477   : > { %v2921_v36 = vshll.u32 %v7423_v40, 30  ;;  %v3185_v41 = vsub.s32 32, %v3184_v58  ;;  %v3076_v24 = vadd.s32 1, %v4757_v35  ;;  %v3187_v11 = vshll.u32 %v9124_v46, %v3184_v58 }
 0x478   : > { %v3042_v21 = vand.u32 2147483647, %v3041_v12  ;;  %v3190_v30 = vshll.u32 %v9125_v37, %v3184_v58  ;;  %v3193_v45 = vshll.u32 %v9126_v22, %v3184_v58  ;;  %v3196_v43 = vshll.u32 %v9127_v17, %v3184_v58 }
 0x479   : > { %v7443_v29 = vsub.s32 %v2918_v53, %v2921_v36  ;;  %v3188_v52 = vshrl.u32 %v9125_v37, %v3185_v41  ;;  %v3191_v56 = vshrl.u32 %v9126_v22, %v3185_v41  ;;  %v3194_v34 = vshrl.u32 %v9127_v17, %v3185_v41 }
 0x47a   : > { %v3197_v15 = vshrl.u32 %v9128_v20, %v3185_v41  ;;  %v3200_v3 = vshrl.u32 %v9129_v50, %v3185_v41  ;;  %v3199_v53 = vshll.u32 %v9128_v20, %v3184_v58  ;;  %v3045_v42 = vmul.f32 %v3044_v9, %v3042_v21 }
 0x47b   : > { %v2924_v1 = vsub.s32 0, %v7443_v29  ;;  %v3189_v10 = vor.u32 %v3188_v52, %v3187_v11  ;;  %v3192_v32 = vor.u32 %v3191_v56, %v3190_v30  ;;  %v3186_v51 = vshrl.u32 %v9124_v46, %v3185_v41 }
 0x47c   : > { %v3195_v55 = vor.u32 %v3194_v34, %v3193_v45  ;;  %v3198_v14 = vor.u32 %v3197_v15, %v3196_v43  ;;  %vm8857_vm5 = vcmp.lt.s32.totalorder %v7184_v33, 0  ;;  %v3201_v48 = vor.u32 %v3200_v3, %v3199_v53  ;;  %v7468_v3 = vpop.f32.mrb[28].mxu0 }
 0x47d   : > { %v4750_v35 = vmin.u32 %v2924_v1, %v7443_v29  ;;  %vm3202_vm14 = vcmp.lt.s32.totalorder %v3183_v25, 1  ;;  %vm3205_vm9 = vcmp.lt.s32.totalorder %v3183_v25, 4  ;;  %v7457_v39 = vpop.eup %5270  ;;  %vm3204_vm10 = vcmp.lt.s32.totalorder %v3183_v25, 3 }
 0x47e   : > { %v3207_v60 = vsel %vm3205_vm9, %v3195_v55, 2102212464  ;;  %v3210_v12 = vsel %vm3202_vm14, %v3189_v10, %v3192_v32  ;;  %v3381_v58 = vand.u32 2139095040, %v7427_v44  ;;  %v7461_v36 = vpop.eup %5272  ;;  %v3206_v21 = vsel %vm3202_vm14, %v3186_v51, %v3189_v10 }
 0x47f   : > { %v2926_v41 = vclz %v4750_v35  ;;  %v3208_v9 = vsel %vm3204_vm10, %v3192_v32, %v3207_v60  ;;  %v3211_v11 = vsel %vm3205_vm9, %v3198_v14, 920167782  ;;  %vm3203_vm3 = vcmp.lt.s32.totalorder %v3183_v25, 2 }
 0x480   : > { %v3212_v30 = vsel %vm3204_vm10, %v3195_v55, %v3211_v11  ;;  %v3214_v52 = vsel %vm3202_vm14, %v3192_v32, %v3195_v55  ;;  %v8836_v56 = vand.u32 2147483647, %v7427_v44  ;;  %v3046_v45 = vxor.u32 2147483648, %v3045_v42 }
 0x481   : > { %v4751_v34 = vadd.s32 4294967294, %v2926_v41  ;;  %v3213_v43 = vsel %vm3203_vm3, %v3210_v12, %v3212_v30  ;;  %v3215_v15 = vsel %vm3205_vm9, %v3201_v48, 1326507024  ;;  %v3209_v1 = vsel %vm3203_vm3, %v3206_v21, %v3208_v9 }
 0x482   : > { %v3216_v10 = vsel %vm3204_vm10, %v3198_v14, %v3215_v15  ;;  %v7472_v53 = vmul.u32.u64.low %v7434_v63, %v3213_v43  ;;  %v7473_v51 = vmul.u32.u64.high %v7434_v63, %v3213_v43, %v7472_v53  ;;  %vm3077_vm11 = vcmp.gt.s32.totalorder %v3076_v24, 0 }
 0x483   : > { %vm4752_vm4 = vcmp.lt.s32.totalorder %v4751_v34, 0  ;;  %v3217_v35 = vsel %vm3203_vm3, %v3214_v52, %v3216_v10  ;;  %v3382_v32 = vshrl.u32 %v3381_v58, 23  ;;  %v3078_v48 = vsel %vm3077_vm11, %v3076_v24, 0 }
 0x484   : > { %v2929_v55 = vsel %vm4752_vm4, 0, %v4751_v34  ;;  %v7477_v60 = vmul.u32.u64.low %v7434_v63, %v3217_v35  ;;  %v7478_v12 = vmul.u32.u64.high %v7434_v63, %v3217_v35, %v7477_v60  ;;  %v2914_v41 = vadd.s32 %v7377_v18, %v7387_v4 }
 0x485   : > { %v2930_v25 = vsub.s32 32, %v2929_v55  ;;  %v2934_v14 = vsub.s32 4294967266, %v2929_v55  ;;  %v3074_v21 = vor.u32 8388608, %v7438_v49  ;;  %v7485_v9 = vsel %vm8857_vm5, %v3046_v45, %v3045_v42 }
 0x486   : > { %v3225_v11 = vmul.u32 %v7434_v63, %v3209_v1  ;;  %v3228_v58 = vadd.s32 1, %v7473_v51  ;;  %v3080_v30 = vand.u32 31, %v3078_v48  ;;  %v2931_v52 = vshll.u32 %v7443_v29, %v2929_v55 }
 0x487   : > { %v2932_v34 = vshrl.u32 %v2914_v41, %v2930_v25  ;;  %v2935_v24 = vadd.s32 127, %v2934_v14  ;;  %v3079_v43 = vshrl.u32 %v3078_v48, 5  ;;  %vm3227_vm15 = vc.u32 %v7478_v12, %v7472_v53 }
 0x488   : > { %v3081_v18 = vsub.s32 32, %v3080_v30  ;;  %v4769_v4 = vadd.s32 4294967169, %v3382_v32  ;;  %v7494_v49 = vand.u32 8388607, %v8836_v56  ;;  %v3229_v63 = vsel %vm3227_vm15, %v3228_v58, %v7473_v51 }
 0x489   : > { %v2933_v42 = vor.u32 %v2932_v34, %v2931_v52  ;;  %v2936_v45 = vshll.u32 %v2935_v24, 23  ;;  %v3083_v15 = vshll.u32 %v9124_v46, %v3080_v30  ;;  %v3230_v1 = vadd.s32 %v3229_v63, %v3225_v11 }
 0x48a   : > { %v3084_v29 = vshrl.u32 %v9125_v37, %v3081_v18  ;;  %v3086_v10 = vshll.u32 %v9125_v37, %v3080_v30  ;;  %v3087_v35 = vshrl.u32 %v9126_v22, %v3081_v18  ;;  %v3089_v32 = vshll.u32 %v9126_v22, %v3080_v30 }
 0x48b   : > { %v2937_v55 = vor.u32 4788187, %v2936_v45  ;;  %v3090_v60 = vshrl.u32 %v9127_v17, %v3081_v18  ;;  %vm3098_vm2 = vcmp.lt.s32.totalorder %v3079_v43, 1  ;;  %vm7505_vm13 = vcmp.le.f32.partialorder %v2962_v47, 0.7853982 }
 0x48c   : > { %v9138_v48 = vmov 0  ;;  %v2940_v51 = vcvt.s32.f32 %v2933_v42  ;;  %v3231_v41 = vadd.s32 536870912, %v3230_v1  ;;  %v3085_v25 = vor.u32 %v3084_v29, %v3083_v15 }
 0x48d   : > { %v9139_v48 = vsel %vm7505_vm13, 4294967295, %v9138_v48  ;;  %v3088_v14 = vor.u32 %v3087_v35, %v3086_v10  ;;  %v2938_v11 = vand.u32 2147483647, %v2937_v55  ;;  %v3091_v58 = vor.u32 %v3090_v60, %v3089_v32 }
 0x48e   : > { %9140 = vst [vmem:[#allocation26_spill] sm:$0xff] %v9139_v48  ;;  %v3092_v52 = vshll.u32 %v9127_v17, %v3080_v30  ;;  %v3093_v34 = vshrl.u32 %v9128_v20, %v3081_v18  ;;  %vm8896_vm0 = vcmp.lt.s32.totalorder %v7197_v27, 0  ;;  %v7512_v24 = vshrl.u32 %v3231_v41, 30 }
 0x48f   : > { %v3095_v45 = vshll.u32 %v9128_v20, %v3080_v30  ;;  %v3096_v47 = vshrl.u32 %v9129_v50, %v3081_v18  ;;  %vm3101_vm6 = vcmp.lt.s32.totalorder %v3079_v43, 4  ;;  %v2941_v63 = vmul.f32 %v2940_v51, %v2938_v11 }
 0x490   : > { %9141 = vst [vmem:[#allocation25_spill] sm:$0xff] %v7512_v24  ;;  %v3082_v42 = vshrl.u32 %v9124_v46, %v3081_v18  ;;  %v3094_v15 = vor.u32 %v3093_v34, %v3092_v52  ;;  %v3103_v29 = vsel %vm3101_vm6, %v3091_v58, 2102212464  ;;  %v3233_v10 = vshll.u32 %v7512_v24, 30 }
 0x491   : > { %v3097_v35 = vor.u32 %v3096_v47, %v3095_v45  ;;  %vm3099_vm14 = vcmp.lt.s32.totalorder %v3079_v43, 2  ;;  %v3106_v55 = vsel %vm3098_vm2, %v3085_v25, %v3088_v14  ;;  %vm3100_vm9 = vcmp.lt.s32.totalorder %v3079_v43, 3 }
 0x492   : > { %v3102_v32 = vsel %vm3098_vm2, %v3082_v42, %v3085_v25  ;;  %v3107_v30 = vsel %vm3101_vm6, %v3094_v15, 920167782  ;;  %v3110_v60 = vsel %vm3098_vm2, %v3088_v14, %v3091_v58  ;;  %v7523_v41 = vsub.s32 %v3230_v1, %v3233_v10 }
 0x493   : > { %v3104_v51 = vsel %vm3100_vm9, %v3088_v14, %v3103_v29  ;;  %v3108_v18 = vsel %vm3100_vm9, %v3091_v58, %v3107_v30  ;;  %v3111_v11 = vsel %vm3101_vm6, %v3097_v35, 1326507024  ;;  %v2942_v52 = vxor.u32 2147483648, %v2941_v63 }
 0x494   : > { %v3109_v34 = vsel %vm3099_vm14, %v3106_v55, %v3108_v18  ;;  %v3112_v45 = vsel %vm3100_vm9, %v3094_v15, %v3111_v11  ;;  %v3114_v47 = vshll.u32 %v3074_v21, 8  ;;  %5274 = vcosq.f32 %v7432_v31  ;;  %v7540_v15 = vpop.f32.mrb[29].mxu0 }
 0x495   : > { %v3236_v56 = vsub.s32 0, %v7523_v41  ;;  %v3113_v25 = vsel %vm3099_vm14, %v3110_v60, %v3112_v45  ;;  %v3388_v42 = vadd.s32 1, %v4769_v4  ;;  %v7534_v1 = vsel %vm7505_vm13, %v7184_v33, %v7485_v9 }
 0x496   : > { %v3105_v14 = vsel %vm3099_vm14, %v3102_v32, %v3104_v51  ;;  %v7537_v58 = vmul.u32.u64.low %v3114_v47, %v3113_v25  ;;  %v7538_v29 = vmul.u32.u64.high %v3114_v47, %v3113_v25, %v7537_v58  ;;  %v3386_v4 = vor.u32 8388608, %v7494_v49 }
 0x497   : > { %v4762_v21 = vmin.u32 %v3236_v56, %v7523_v41  ;;  %v7543_v10 = vmul.u32.u64.low %v3114_v47, %v3109_v34  ;;  %v7544_v35 = vmul.u32.u64.high %v3114_v47, %v3109_v34, %v7543_v10  ;;  %5276 = vsinq.f32 %v7432_v31 }
 0x498   : > { %v2943_v9 = vsel %vm8896_vm0, %v2942_v52, %v2941_v63  ;;  %vm3389_vm10 = vcmp.gt.s32.totalorder %v3388_v42, 0  ;;  %5278 = vcosq.f32 %v7534_v1  ;;  %vm7554_vm3 = vcmp.le.f32.partialorder %v2858_v38, 0.7853982 }
 0x499   : > { %v9142_v43 = vmov 0  ;;  %v3238_v56 = vclz %v4762_v21  ;;  %v3390_v55 = vsel %vm3389_vm10, %v3388_v42, 0  ;;  %v3226_v32 = vadd.s32 %v7472_v53, %v7478_v12 }
 0x49a   : > { %v9143_v43 = vsel %vm7554_vm3, 4294967295, %v9142_v43  ;;  %v3121_v49 = vmul.u32 %v3114_v47, %v3105_v14  ;;  %vm3123_vm4 = vc.u32 %v7538_v29, %v7543_v10  ;;  %v3392_v31 = vand.u32 31, %v3390_v55 }
 0x49b   : > { %9144 = vst [vmem:[#allocation18_spill] sm:$0xff] %v9143_v43  ;;  %v7565_v63 = vsel %vm7554_vm3, %v7197_v27, %v2943_v9  ;;  %v4763_v30 = vadd.s32 4294967294, %v3238_v56  ;;  %v3124_v38 = vadd.s32 1, %v7544_v35  ;;  %v7568_v60 = vshll.u32 %v3386_v4, 8 }
 0x49c   : > { %v7570_v51 = vshrl.u32 %v3390_v55, 5  ;;  %v3393_v18 = vsub.s32 32, %v3392_v31  ;;  %v3395_v53 = vshll.u32 %v9124_v46, %v3392_v31  ;;  %v3398_v12 = vshll.u32 %v9125_v37, %v3392_v31 }
 0x49d   : > { %vm4764_vm11 = vcmp.lt.s32.totalorder %v4763_v30, 0  ;;  %v3125_v11 = vsel %vm3123_vm4, %v3124_v38, %v7544_v35  ;;  %v3401_v52 = vshll.u32 %v9126_v22, %v3392_v31  ;;  %v3404_v34 = vshll.u32 %v9127_v17, %v3392_v31 }
 0x49e   : > { %v3241_v45 = vsel %vm4764_vm11, 0, %v4763_v30  ;;  %v3126_v47 = vadd.s32 %v3125_v11, %v3121_v49  ;;  %v3396_v25 = vshrl.u32 %v9125_v37, %v3393_v18  ;;  %v3407_v42 = vshll.u32 %v9128_v20, %v3392_v31  ;;  %v7579_v14 = vpop.eup %5274 }
 0x49f   : > { %v3242_v58 = vsub.s32 32, %v3241_v45  ;;  %v3243_v21 = vshll.u32 %v7523_v41, %v3241_v45  ;;  %v3246_v4 = vsub.s32 4294967266, %v3241_v45  ;;  %v3399_v9 = vshrl.u32 %v9126_v22, %v3393_v18 }
 0x4a0   : > { %v3127_v56 = vadd.s32 536870912, %v3126_v47  ;;  %v3397_v35 = vor.u32 %v3396_v25, %v3395_v53  ;;  %v3402_v55 = vshrl.u32 %v9127_v17, %v3393_v18  ;;  %v3405_v38 = vshrl.u32 %v9128_v20, %v3393_v18 }
 0x4a1   : > { %v3244_v30 = vshrl.u32 %v3226_v32, %v3242_v58  ;;  %v3247_v49 = vadd.s32 127, %v3246_v4  ;;  %v3400_v11 = vor.u32 %v3399_v9, %v3398_v12  ;;  %v3408_v2 = vshrl.u32 %v9129_v50, %v3393_v18  ;;  %v7586_v31 = vpop.eup %5276 }
 0x4a2   : > { %v7588_v0 = vshrl.u32 %v3127_v56, 30  ;;  %v3403_v24 = vor.u32 %v3402_v55, %v3401_v52  ;;  %v3406_v41 = vor.u32 %v3405_v38, %v3404_v34  ;;  %v7592_v45 = vadd.f32 %v7169_v26, %v7199_v13  ;;  %v7594_v53 = vpop.eup %5278 }
 0x4a3   : > { %9146 = vst [vmem:[#allocation12_spill] sm:$0xff] %v7594_v53  ;;  %v3245_v25 = vor.u32 %v3244_v30, %v3243_v21  ;;  %v3248_v48 = vshll.u32 %v3247_v49, 23  ;;  %v3394_v32 = vshrl.u32 %v9124_v46, %v3393_v18  ;;  %v3409_v58 = vor.u32 %v3408_v2, %v3407_v42 }
 0x4a4   : > { %9145 = vst [vmem:[#allocation14_spill] sm:$0xff] %v7588_v0  ;;  %v3129_v12 = vshll.u32 %v7588_v0, 30  ;;  %vm3410_vm15 = vcmp.lt.s32.totalorder %v7570_v51, 1  ;;  %vm3411_vm2 = vcmp.lt.s32.totalorder %v7570_v51, 2  ;;  %vm3413_vm6 = vcmp.lt.s32.totalorder %v7570_v51, 4 }
 0x4a5   : > { %v3249_v52 = vor.u32 4788187, %v3248_v48  ;;  %vm3412_vm14 = vcmp.lt.s32.totalorder %v7570_v51, 3  ;;  %v3415_v26 = vsel %vm3413_vm6, %v3403_v24, 2102212464  ;;  %v3418_v13 = vsel %vm3410_vm15, %v3397_v35, %v3400_v11 }
 0x4a6   : > { %v7602_v34 = vsub.s32 %v3126_v47, %v3129_v12  ;;  %v3414_v21 = vsel %vm3410_vm15, %v3394_v32, %v3397_v35  ;;  %v3419_v4 = vsel %vm3413_vm6, %v3406_v41, 920167782  ;;  %v3422_v9 = vsel %vm3410_vm15, %v3400_v11, %v3403_v24 }
 0x4a7   : > { %v3250_v18 = vand.u32 2147483647, %v3249_v52  ;;  %v3252_v2 = vcvt.s32.f32 %v3245_v25  ;;  %v3420_v42 = vsel %vm3412_vm14, %v3403_v24, %v3419_v4  ;;  %v3423_v56 = vsel %vm3413_vm6, %v3409_v58, 1326507024 }
 0x4a8   : > { %v3132_v55 = vsub.s32 0, %v7602_v34  ;;  %v3416_v38 = vsel %vm3412_vm14, %v3400_v11, %v3415_v26  ;;  %v3421_v30 = vsel %vm3411_vm2, %v3418_v13, %v3420_v42  ;;  %v3424_v48 = vsel %vm3412_vm14, %v3406_v41, %v3423_v56  ;;  %v7621_v11 = vld [vmem:[%s8719_s6] ss:$0 sm:$0xff] }
 0x4a9   : > { %v3253_v49 = vmul.f32 %v3252_v2, %v3250_v18  ;;  %v3425_v53 = vsel %vm3411_vm2, %v3422_v9, %v3424_v48  ;;  %v7610_v47 = vmul.u32.u64.low %v7568_v60, %v3421_v30  ;;  %v7611_v35 = vmul.u32.u64.high %v7568_v60, %v3421_v30, %v7610_v47 }
 0x4aa   : > { %v4758_v32 = vmin.u32 %v3132_v55, %v7602_v34  ;;  %v7615_v24 = vmul.u32.u64.low %v7568_v60, %v3425_v53  ;;  %v7616_v25 = vmul.u32.u64.high %v7568_v60, %v3425_v53, %v7615_v24  ;;  %v7625_v41 = vadd.f32 %v7621_v11, %v7221_v5 }
 0x4ab   : > { %5280 = vsinq.f32 %v7534_v1  ;;  %v3417_v58 = vsel %vm3411_vm2, %v3414_v21, %v3416_v38  ;;  %v3277_v12 = vand.u32 2139095040, %v7592_v45  ;;  %v9148_v53 = vand.u32 2147483647, %v7341_v7  ;;  %v7641_v21 = vpop.f32.mrb[30].mxu0 }
 0x4ac   : > { %9147 = vst [vmem:[#allocation6_spill] sm:$0xff] %v7625_v41  ;;  %5282 = vcosq.f32 %v7565_v63  ;;  %v9149_v26 = vmov 0  ;;  %v3134_v13 = vclz %v4758_v32  ;;  %v3254_v5 = vxor.u32 2147483648, %v3253_v49 }
 0x4ad   : > { %vm7635_vm9 = vcmp.le.f32.partialorder %v9148_v53, 0.7853982  ;;  %v3436_v4 = vadd.s32 1, %v7611_v35  ;;  %v8843_v1 = vand.u32 2147483647, %v7592_v45  ;;  %v3278_v51 = vshrl.u32 %v3277_v12, 23 }
 0x4ae   : > { %v9150_v26 = vsel %vm7635_vm9, 4294967295, %v9149_v26  ;;  %v4759_v9 = vadd.s32 4294967294, %v3134_v13  ;;  %v3433_v18 = vmul.u32 %v7568_v60, %v3417_v58  ;;  %vm3435_vm10 = vc.u32 %v7616_v25, %v7610_v47 }
 0x4af   : > { %9151 = vst [vmem:[#allocation24_spill] sm:$0xff] %v9150_v26  ;;  %v3589_v2 = vand.u32 2139095040, %v7625_v41  ;;  %5284 = vsinq.f32 %v7565_v63  ;;  %vm8856_vm4 = vcmp.lt.s32.totalorder %v7341_v7, 0  ;;  %v3437_v42 = vsel %vm3435_vm10, %v3436_v4, %v7611_v35 }
 0x4b0   : > { %v4765_v56 = vadd.s32 4294967169, %v3278_v51  ;;  %v3122_v55 = vadd.s32 %v7543_v10, %v7538_v29  ;;  %vm4760_vm11 = vcmp.lt.s32.totalorder %v4759_v9, 0  ;;  %v3438_v38 = vadd.s32 %v3437_v42, %v3433_v18 }
 0x4b1   : > { %v7653_v30 = vadd.f32 %v7621_v11, %v7259_v16  ;;  %v3255_v60 = vsel %vm8856_vm4, %v3254_v5, %v3253_v49  ;;  %v3137_v48 = vsel %vm4760_vm11, 0, %v4759_v9  ;;  %v3281_v63 = vand.u32 8388607, %v8843_v1 }
 0x4b2   : > { %v3284_v32 = vadd.s32 1, %v4765_v56  ;;  %v3138_v24 = vsub.s32 32, %v3137_v48  ;;  %v3142_v35 = vsub.s32 4294967266, %v3137_v48  ;;  %v3439_v58 = vadd.s32 536870912, %v3438_v38 }
 0x4b3   : > { %9152 = vst [vmem:[#allocation23_spill] sm:$0xff] %v7653_v30  ;;  %v3590_v12 = vshrl.u32 %v3589_v2, 23  ;;  %v3139_v29 = vshll.u32 %v7602_v34, %v3137_v48  ;;  %v7663_v16 = vadd.f32 %v7621_v11, %v7332_v28  ;;  %v7672_v51 = vsel %vm7635_vm9, %v7341_v7, %v3255_v60 }
 0x4b4   : > { %vm3285_vm15 = vcmp.gt.s32.totalorder %v3284_v32, 0  ;;  %v3140_v53 = vshrl.u32 %v3122_v55, %v3138_v24  ;;  %v3143_v49 = vadd.s32 127, %v3142_v35  ;;  %v7665_v13 = vshrl.u32 %v3439_v58, 30 }
 0x4b5   : > { %9153 = vst [vmem:[#allocation27_spill] sm:$0xff] %v7663_v16  ;;  %v3286_v5 = vsel %vm3285_vm15, %v3284_v32, 0  ;;  %v7667_v4 = vpop.eup %5280  ;;  %v7675_v34 = vadd.s32 %v7610_v47, %v7616_v25  ;;  %v3282_v9 = vor.u32 8388608, %v3281_v63  ;;  %v4777_v55 = vadd.s32 4294967169, %v3590_v12 }
 0x4b6   : > { %9154 = vst [vmem:[#allocation20_spill] sm:$0xff] %v7665_v13  ;;  %9155 = vst [vmem:[#allocation11_spill] sm:$0xff] %v7667_v4  ;;  %v3288_v18 = vand.u32 31, %v3286_v5  ;;  %v7677_v2 = vpop.eup %5282  ;;  %v3141_v28 = vor.u32 %v3140_v53, %v3139_v29  ;;  %v3144_v42 = vshll.u32 %v3143_v49, 23  ;;  %v3441_v56 = vshll.u32 %v7665_v13, 30 }
 0x4b7   : > { %9156 = vst [vmem:[#allocation16_spill] sm:$0xff] %v7677_v2  ;;  %v3287_v48 = vshrl.u32 %v3286_v5, 5  ;;  %vm8881_vm2 = vcmp.lt.s32.totalorder %v7363_v54, 0  ;;  %v9158_v4 = vand.u32 2147483647, %v7625_v41  ;;  %v3596_v2 = vadd.s32 1, %v4777_v55 }
 0x4b8   : > { %v3289_v32 = vsub.s32 32, %v3288_v18  ;;  %v3291_v24 = vshll.u32 %v9124_v46, %v3288_v18  ;;  %v3294_v35 = vshll.u32 %v9125_v37, %v3288_v18  ;;  %v3145_v60 = vor.u32 4788187, %v3144_v42 }
 0x4b9   : > { %v3148_v58 = vcvt.s32.f32 %v3141_v28  ;;  %v7682_v1 = vsub.s32 %v3438_v38, %v3441_v56  ;;  %v3297_v47 = vshll.u32 %v9126_v22, %v3288_v18  ;;  %v7685_v25 = vpop.eup %5284  ;;  %v3300_v53 = vshll.u32 %v9127_v17, %v3288_v18 }
 0x4ba   : > { %9157 = vst [vmem:[#allocation38_spill] sm:$0xff] %v7685_v25  ;;  %v3292_v63 = vshrl.u32 %v9125_v37, %v3289_v32  ;;  %v3295_v29 = vshrl.u32 %v9126_v22, %v3289_v32  ;;  %v3298_v12 = vshrl.u32 %v9127_v17, %v3289_v32  ;;  %v3146_v49 = vand.u32 2147483647, %v3145_v60 }
 0x4bb   : > { %v3444_v5 = vsub.s32 0, %v7682_v1  ;;  %v3301_v38 = vshrl.u32 %v9128_v20, %v3289_v32  ;;  %v3303_v28 = vshll.u32 %v9128_v20, %v3288_v18  ;;  %v3304_v10 = vshrl.u32 %v9129_v50, %v3289_v32 }
 0x4bc   : > { %v3293_v42 = vor.u32 %v3292_v63, %v3291_v24  ;;  %v3296_v56 = vor.u32 %v3295_v29, %v3294_v35  ;;  %v3299_v52 = vor.u32 %v3298_v12, %v3297_v47  ;;  %v3149_v13 = vmul.f32 %v3148_v58, %v3146_v49 }
 0x4bd   : > { %v4770_v26 = vmin.u32 %v3444_v5, %v7682_v1  ;;  %v3302_v7 = vor.u32 %v3301_v38, %v3300_v53  ;;  %v3593_v0 = vand.u32 8388607, %v9158_v4  ;;  %v3305_v33 = vor.u32 %v3304_v10, %v3303_v28 }
 0x4be   : > { %vm3309_vm6 = vcmp.lt.s32.totalorder %v3287_v48, 4  ;;  %v7699_v60 = vshll.u32 %v3282_v9, 8  ;;  %v9159_v25 = vand.u32 2147483647, %v7363_v54  ;;  %v9160_v18 = vmov 0  ;;  %v7710_v9 = vpop.f32.mrb[31].mxu0 }
 0x4bf   : > { %v3446_v24 = vclz %v4770_v26  ;;  %v3290_v35 = vshrl.u32 %v9124_v46, %v3289_v32  ;;  %vm3306_vm10 = vcmp.lt.s32.totalorder %v3287_v48, 1  ;;  %v3311_v58 = vsel %vm3309_vm6, %v3299_v52, 2102212464 }
 0x4c0   : > { %vm7703_vm14 = vcmp.le.f32.partialorder %v9159_v25, 0.7853982  ;;  %v3150_v47 = vxor.u32 2147483648, %v3149_v13  ;;  %vm3308_vm11 = vcmp.lt.s32.totalorder %v3287_v48, 3  ;;  %v3314_v4 = vsel %vm3306_vm10, %v3293_v42, %v3296_v56 }
 0x4c1   : > { %v9161_v18 = vsel %vm7703_vm14, 4294967295, %v9160_v18  ;;  %v3315_v10 = vsel %vm3309_vm6, %v3302_v7, 920167782  ;;  %v4771_v55 = vadd.s32 4294967294, %v3446_v24  ;;  %v3318_v29 = vsel %vm3306_vm10, %v3296_v56, %v3299_v52 }
 0x4c2   : > { %9162 = vst [vmem:[#allocation34_spill] sm:$0xff] %v9161_v18  ;;  %v3316_v63 = vsel %vm3308_vm11, %v3299_v52, %v3315_v10  ;;  %v3594_v25 = vor.u32 8388608, %v3593_v0  ;;  %vm3307_vm15 = vcmp.lt.s32.totalorder %v3287_v48, 2  ;;  %v3310_v12 = vsel %vm3306_vm10, %v3290_v35, %v3293_v42 }
 0x4c3   : > { %v3312_v53 = vsel %vm3308_vm11, %v3296_v56, %v3311_v58  ;;  %v3319_v26 = vsel %vm3309_vm6, %v3305_v33, 1326507024  ;;  %vm4772_vm4 = vcmp.lt.s32.totalorder %v4771_v55, 0  ;;  %v3317_v32 = vsel %vm3307_vm15, %v3314_v4, %v3316_v63 }
 0x4c4   : > { %v3320_v49 = vsel %vm3308_vm11, %v3302_v7, %v3319_v26  ;;  %vm3597_vm5 = vcmp.gt.s32.totalorder %v3596_v2, 0  ;;  %v3151_v5 = vsel %vm8881_vm2, %v3150_v47, %v3149_v13  ;;  %v3449_v38 = vsel %vm4772_vm4, 0, %v4771_v55 }
 0x4c5   : > { %v3321_v28 = vsel %vm3307_vm15, %v3318_v29, %v3320_v49  ;;  %v3598_v6 = vsel %vm3597_vm5, %v3596_v2, 0  ;;  %v3450_v43 = vsub.s32 32, %v3449_v38  ;;  %v3454_v24 = vsub.s32 4294967266, %v3449_v38 }
 0x4c6   : > { %v3313_v10 = vsel %vm3307_vm15, %v3310_v12, %v3312_v53  ;;  %v7715_v52 = vshrl.u32 %v3598_v6, 5  ;;  %v7718_v0 = vmul.u32.u64.low %v7699_v60, %v3321_v28  ;;  %v7719_v42 = vmul.u32.u64.high %v7699_v60, %v3321_v28, %v7718_v0 }
 0x4c7   : > { %v7722_v33 = vmul.u32.u64.low %v7699_v60, %v3317_v32  ;;  %v7723_v48 = vmul.u32.u64.high %v7699_v60, %v3317_v32, %v7722_v33  ;;  %v3451_v7 = vshll.u32 %v7682_v1, %v3449_v38  ;;  %v3452_v13 = vshrl.u32 %v7675_v34, %v3450_v43 }
 0x4c8   : > { %v3455_v56 = vadd.s32 127, %v3454_v24  ;;  %v3600_v2 = vand.u32 31, %v3598_v6  ;;  %5286 = vcosq.f32 %v7672_v51  ;;  %v7732_v35 = vsel %vm7703_vm14, %v7363_v54, %v3151_v5 }
 0x4c9   : > { %v7734_v58 = vshll.u32 %v3594_v25, 8  ;;  %v8862_v47 = vand.u32 2147483647, %v7653_v30  ;;  %v3453_v4 = vor.u32 %v3452_v13, %v3451_v7  ;;  %v3329_v63 = vmul.u32 %v7699_v60, %v3313_v10 }
 0x4ca   : > { %v3456_v55 = vshll.u32 %v3455_v56, 23  ;;  %v3601_v1 = vsub.s32 32, %v3600_v2  ;;  %vm3331_vm5 = vc.u32 %v7719_v42, %v7722_v33  ;;  %v3332_v6 = vadd.s32 1, %v7723_v48 }
 0x4cb   : > { %vm3618_vm4 = vcmp.lt.s32.totalorder %v7715_v52, 1  ;;  %v3485_v43 = vand.u32 2139095040, %v7653_v30  ;;  %v3603_v29 = vshll.u32 %v9124_v46, %v3600_v2  ;;  %v3606_v12 = vshll.u32 %v9125_v37, %v3600_v2 }
 0x4cc   : > { %v3457_v34 = vor.u32 4788187, %v3456_v55  ;;  %v3604_v25 = vshrl.u32 %v9125_v37, %v3601_v1  ;;  %v3333_v53 = vsel %vm3331_vm5, %v3332_v6, %v7723_v48  ;;  %v3607_v60 = vshrl.u32 %v9126_v22, %v3601_v1 }
 0x4cd   : > { %v3609_v26 = vshll.u32 %v9126_v22, %v3600_v2  ;;  %v3610_v32 = vshrl.u32 %v9127_v17, %v3601_v1  ;;  %v3460_v5 = vcvt.s32.f32 %v3453_v4  ;;  %v3334_v38 = vadd.s32 %v3333_v53, %v3329_v63 }
 0x4ce   : > { %v3458_v49 = vand.u32 2147483647, %v3457_v34  ;;  %v3605_v28 = vor.u32 %v3604_v25, %v3603_v29  ;;  %v3608_v24 = vor.u32 %v3607_v60, %v3606_v12  ;;  %v3612_v0 = vshll.u32 %v9127_v17, %v3600_v2 }
 0x4cf   : > { %v3611_v10 = vor.u32 %v3610_v32, %v3609_v26  ;;  %v3613_v7 = vshrl.u32 %v9128_v20, %v3601_v1  ;;  %v3335_v13 = vadd.s32 536870912, %v3334_v38  ;;  %v3615_v56 = vshll.u32 %v9128_v20, %v3600_v2 }
 0x4d0   : > { %v3616_v48 = vshrl.u32 %v9129_v50, %v3601_v1  ;;  %vm3619_vm6 = vcmp.lt.s32.totalorder %v7715_v52, 2  ;;  %vm8876_vm10 = vcmp.lt.s32.totalorder %v7427_v44, 0  ;;  %v3461_v55 = vmul.f32 %v3460_v5, %v3458_v49 }
 0x4d1   : > { %v3614_v6 = vor.u32 %v3613_v7, %v3612_v0  ;;  %vm3620_vm11 = vcmp.lt.s32.totalorder %v7715_v52, 3  ;;  %vm3621_vm15 = vcmp.lt.s32.totalorder %v7715_v52, 4  ;;  %v7758_v4 = vshrl.u32 %v3335_v13, 30 }
 0x4d2   : > { %v3602_v63 = vshrl.u32 %v9124_v46, %v3601_v1  ;;  %v3617_v34 = vor.u32 %v3616_v48, %v3615_v56  ;;  %v3626_v2 = vsel %vm3618_vm4, %v3605_v28, %v3608_v24  ;;  %v7763_v29 = vpop.eup %5286  ;;  %v3623_v25 = vsel %vm3621_vm15, %v3611_v10, 2102212464 }
 0x4d3   : > { %9163 = vst [vmem:[#allocation10_spill] sm:$0xff] %v7758_v4  ;;  %9164 = vst [vmem:[#allocation31_spill] sm:$0xff] %v7763_v29  ;;  %v3627_v12 = vsel %vm3621_vm15, %v3614_v6, 920167782  ;;  %v3630_v53 = vsel %vm3618_vm4, %v3608_v24, %v3611_v10  ;;  %v3486_v60 = vshrl.u32 %v3485_v43, 23  ;;  %v3337_v26 = vshll.u32 %v7758_v4, 30 }
 0x4d4   : > { %v3622_v32 = vsel %vm3618_vm4, %v3602_v63, %v3605_v28  ;;  %v3628_v1 = vsel %vm3620_vm11, %v3611_v10, %v3627_v12  ;;  %v3631_v49 = vsel %vm3621_vm15, %v3617_v34, 1326507024  ;;  %v3462_v5 = vxor.u32 2147483648, %v3461_v55 }
 0x4d5   : > { %v3629_v0 = vsel %vm3619_vm6, %v3626_v2, %v3628_v1  ;;  %v3632_v7 = vsel %vm3620_vm11, %v3614_v6, %v3631_v49  ;;  %v3489_v13 = vand.u32 8388607, %v8862_v47  ;;  %v7778_v43 = vsub.s32 %v3334_v38, %v3337_v26 }
 0x4d6   : > { %v3624_v56 = vsel %vm3620_vm11, %v3608_v24, %v3623_v25  ;;  %v3633_v28 = vsel %vm3619_vm6, %v3630_v53, %v3632_v7  ;;  %v4773_v10 = vadd.s32 4294967169, %v3486_v60  ;;  %5288 = vsinq.f32 %v7672_v51 }
 0x4d7   : > { %v9165_v48 = vand.u32 2147483647, %v7427_v44  ;;  %v9166_v63 = vmov 0  ;;  %v7792_v6 = vmul.u32.u64.low %v7734_v58, %v3633_v28  ;;  %v7793_v34 = vmul.u32.u64.high %v7734_v58, %v3633_v28, %v7792_v6 }
 0x4d8   : > { %v3340_v38 = vsub.s32 0, %v7778_v43  ;;  %v7797_v24 = vmul.u32.u64.low %v7734_v58, %v3629_v0  ;;  %v7798_v2 = vmul.u32.u64.high %v7734_v58, %v3629_v0, %v7797_v24  ;;  %v3492_v25 = vadd.s32 1, %v4773_v10 }
 0x4d9   : > { %vm7787_vm5 = vcmp.le.f32.partialorder %v9165_v48, 0.7853982  ;;  %5290 = vcosq.f32 %v7732_v35  ;;  %v3625_v51 = vsel %vm3619_vm6, %v3622_v32, %v3624_v56  ;;  %v3490_v12 = vor.u32 8388608, %v3489_v13 }
 0x4da   : > { %v9167_v63 = vsel %vm7787_vm5, 4294967295, %v9166_v63  ;;  %v7806_v53 = vadd.f32 %v7621_v11, %v7397_v8  ;;  %v3463_v60 = vsel %vm8876_vm10, %v3462_v5, %v3461_v55  ;;  %v4766_v26 = vmin.u32 %v3340_v38, %v7778_v43 }
 0x4db   : > { %9168 = vst [vmem:[#allocation35_spill] sm:$0xff] %v9167_v63  ;;  %vm3493_vm4 = vcmp.gt.s32.totalorder %v3492_v25, 0  ;;  %v3797_v1 = vand.u32 2139095040, %v7663_v16  ;;  %5292 = vsinq.f32 %v7732_v35  ;;  %vm3643_vm11 = vc.u32 %v7793_v34, %v7797_v24 }
 0x4dc   : > { %v3494_v52 = vsel %vm3493_vm4, %v3492_v25, 0  ;;  %v8861_v32 = vand.u32 2147483647, %v7663_v16  ;;  %v3330_v8 = vadd.s32 %v7722_v33, %v7719_v42  ;;  %v3342_v49 = vclz %v4766_v26 }
 0x4dd   : > { %v3644_v0 = vadd.s32 1, %v7798_v2  ;;  %v3496_v55 = vand.u32 31, %v3494_v52  ;;  %v7822_v5 = vsel %vm7787_vm5, %v7427_v44, %v3463_v60  ;;  %v3641_v35 = vmul.u32 %v7734_v58, %v3625_v51 }
 0x4de   : > { %v7825_v7 = vshrl.u32 %v3494_v52, 5  ;;  %v7827_v13 = vshll.u32 %v3490_v12, 8  ;;  %v4767_v56 = vadd.s32 4294967294, %v3342_v49  ;;  %v3798_v42 = vshrl.u32 %v3797_v1, 23 }
 0x4df   : > { %v3645_v28 = vsel %vm3643_vm11, %v3644_v0, %v7798_v2  ;;  %v3497_v10 = vsub.s32 32, %v3496_v55  ;;  %v3499_v48 = vshll.u32 %v9124_v46, %v3496_v55  ;;  %v3502_v6 = vshll.u32 %v9125_v37, %v3496_v55 }
 0x4e0   : > { %v3646_v33 = vadd.s32 %v3645_v28, %v3641_v35  ;;  %v7834_v38 = vand.u32 8388607, %v8861_v32  ;;  %vm4768_vm6 = vcmp.lt.s32.totalorder %v4767_v56, 0  ;;  %v3508_v51 = vshll.u32 %v9127_v17, %v3496_v55  ;;  %v7839_v12 = vpop.eup %5288 }
 0x4e1   : > { %v3500_v58 = vshrl.u32 %v9125_v37, %v3497_v10  ;;  %v3503_v25 = vshrl.u32 %v9126_v22, %v3497_v10  ;;  %9169 = vst [vmem:[#allocation30_spill] sm:$0xff] %v7839_v12  ;;  %v3345_v2 = vsel %vm4768_vm6, 0, %v4767_v56  ;;  %v3506_v26 = vshrl.u32 %v9127_v17, %v3497_v10 }
 0x4e2   : > { %v3647_v60 = vadd.s32 536870912, %v3646_v33  ;;  %v3509_v1 = vshrl.u32 %v9128_v20, %v3497_v10  ;;  %v3346_v52 = vsub.s32 32, %v3345_v2  ;;  %v3347_v49 = vshll.u32 %v7778_v43, %v3345_v2 }
 0x4e3   : > { %v3350_v0 = vsub.s32 4294967266, %v3345_v2  ;;  %v3505_v35 = vshll.u32 %v9126_v22, %v3496_v55  ;;  %v7845_v28 = vpop.eup %5290  ;;  %v3501_v47 = vor.u32 %v3500_v58, %v3499_v48  ;;  %v3504_v63 = vor.u32 %v3503_v25, %v3502_v6 }
 0x4e4   : > { %9170 = vst [vmem:[#allocation29_spill] sm:$0xff] %v7845_v28  ;;  %v7847_v32 = vshrl.u32 %v3647_v60, 30  ;;  %v3510_v44 = vor.u32 %v3509_v1, %v3508_v51  ;;  %v3348_v4 = vshrl.u32 %v3330_v8, %v3346_v52  ;;  %v3511_v29 = vshll.u32 %v9128_v20, %v3496_v55 }
 0x4e5   : > { %v3351_v56 = vadd.s32 127, %v3350_v0  ;;  %v3512_v12 = vshrl.u32 %v9129_v50, %v3497_v10  ;;  %v7851_v18 = vpop.eup %5292  ;;  %v3498_v2 = vshrl.u32 %v9124_v46, %v3497_v10  ;;  %v3507_v54 = vor.u32 %v3506_v26, %v3505_v35 }
 0x4e6   : > { %9171 = vst [vmem:[#allocation32_spill] sm:$0xff] %v7847_v32  ;;  %v3649_v43 = vshll.u32 %v7847_v32, 30  ;;  %v3693_v28 = vand.u32 2139095040, %v7806_v53  ;;  %v3349_v60 = vor.u32 %v3348_v4, %v3347_v49  ;;  %vm3514_vm15 = vcmp.lt.s32.totalorder %v7825_v7, 1 }
 0x4e7   : > { %v3352_v27 = vshll.u32 %v3351_v56, 23  ;;  %v3513_v48 = vor.u32 %v3512_v12, %v3511_v29  ;;  %vm3515_vm4 = vcmp.lt.s32.totalorder %v7825_v7, 2  ;;  %vm3517_vm11 = vcmp.lt.s32.totalorder %v7825_v7, 4 }
 0x4e8   : > { %v7857_v8 = vsub.s32 %v3646_v33, %v3649_v43  ;;  %v3522_v55 = vsel %vm3514_vm15, %v3501_v47, %v3504_v63  ;;  %vm3516_vm6 = vcmp.lt.s32.totalorder %v7825_v7, 3  ;;  %v3518_v58 = vsel %vm3514_vm15, %v3498_v2, %v3501_v47 }
 0x4e9   : > { %v3353_v6 = vor.u32 4788187, %v3352_v27  ;;  %v3523_v10 = vsel %vm3517_vm11, %v3510_v44, 920167782  ;;  %v3519_v51 = vsel %vm3517_vm11, %v3507_v54, 2102212464  ;;  %v3526_v26 = vsel %vm3514_vm15, %v3504_v63, %v3507_v54 }
 0x4ea   : > { %v3652_v25 = vsub.s32 0, %v7857_v8  ;;  %v3524_v4 = vsel %vm3516_vm6, %v3507_v54, %v3523_v10  ;;  %v3356_v12 = vcvt.s32.f32 %v3349_v60  ;;  %v3527_v1 = vsel %vm3517_vm11, %v3513_v48, 1326507024 }
 0x4eb   : > { %v3354_v29 = vand.u32 2147483647, %v3353_v6  ;;  %v3525_v33 = vsel %vm3515_vm4, %v3522_v55, %v3524_v4  ;;  %v3528_v49 = vsel %vm3516_vm6, %v3510_v44, %v3527_v1  ;;  %v3520_v35 = vsel %vm3516_vm6, %v3504_v63, %v3519_v51 }
 0x4ec   : > { %v4778_v52 = vmin.u32 %v3652_v25, %v7857_v8  ;;  %v7867_v27 = vmul.u32.u64.low %v7827_v13, %v3525_v33  ;;  %v7868_v0 = vmul.u32.u64.high %v7827_v13, %v3525_v33, %v7867_v27  ;;  %v3529_v56 = vsel %vm3515_vm4, %v3526_v26, %v3528_v49 }
 0x4ed   : > { %v3357_v47 = vmul.f32 %v3356_v12, %v3354_v29  ;;  %v4785_v54 = vadd.s32 4294967169, %v3798_v42  ;;  %v7874_v2 = vmul.u32.u64.low %v7827_v13, %v3529_v56  ;;  %v7875_v60 = vmul.u32.u64.high %v7827_v13, %v3529_v56, %v7874_v2 }
 0x4ee   : > { %v3654_v43 = vclz %v4778_v52  ;;  %v3694_v48 = vshrl.u32 %v3693_v28, 23  ;;  %v9172_v44 = vsub.s32 4, %v7277_v23  ;;  %5294 = vcosq.f32 %v7822_v5 }
 0x4ef   : > { %v3804_v63 = vadd.s32 1, %v4785_v54  ;;  %v8877_v6 = vand.u32 2147483647, %v7806_v53  ;;  %v3521_v42 = vsel %vm3515_vm4, %v3518_v58, %v3520_v35  ;;  %v3540_v25 = vadd.s32 1, %v7868_v0 }
 0x4f0   : > { %v7882_v55 = vsel %vm2756_vm12, %v9172_v44, %v7277_v23  ;;  %v4779_v10 = vadd.s32 4294967294, %v3654_v43  ;;  %v3802_v28 = vor.u32 8388608, %v7834_v38  ;;  %5296 = vsinq.f32 %v7822_v5 }
 0x4f1   : > { %vm8878_vm15 = vcmp.lt.s32.totalorder %v7592_v45, 0  ;;  %v3358_v51 = vxor.u32 2147483648, %v3357_v47  ;;  %vm3805_vm12 = vcmp.gt.s32.totalorder %v3804_v63, 0  ;;  %v3642_v23 = vadd.s32 %v7797_v24, %v7793_v34 }
 0x4f2   : > { %vm4780_vm11 = vcmp.lt.s32.totalorder %v4779_v10, 0  ;;  %vm3539_vm6 = vc.u32 %v7875_v60, %v7867_v27  ;;  %v4781_v4 = vadd.s32 4294967169, %v3694_v48  ;;  %v3537_v58 = vmul.u32 %v7827_v13, %v3521_v42 }
 0x4f3   : > { %v3657_v7 = vsel %vm4780_vm11, 0, %v4779_v10  ;;  %v3541_v26 = vsel %vm3539_vm6, %v3540_v25, %v7868_v0  ;;  %v3806_v38 = vsel %vm3805_vm12, %v3804_v63, 0  ;;  %v7898_v12 = vshll.u32 %v3802_v28, 8 }
 0x4f4   : > { %v3658_v29 = vsub.s32 32, %v3657_v7  ;;  %v3662_v5 = vsub.s32 4294967266, %v3657_v7  ;;  %v7902_v33 = vand.u32 8388607, %v8877_v6  ;;  %v3359_v34 = vsel %vm8878_vm15, %v3358_v51, %v3357_v47 }
 0x4f5   : > { %v3659_v24 = vshll.u32 %v7857_v8, %v3657_v7  ;;  %v3542_v1 = vadd.s32 %v3541_v26, %v3537_v58  ;;  %v3808_v52 = vand.u32 31, %v3806_v38  ;;  %v3807_v35 = vshrl.u32 %v3806_v38, 5 }
 0x4f6   : > { %v3660_v49 = vshrl.u32 %v3642_v23, %v3658_v29  ;;  %v3663_v13 = vadd.s32 127, %v3662_v5  ;;  %v7907_v0 = vadd.s32 1, %v4781_v4  ;;  %v9175_v51 = vand.u32 2147483647, %v7592_v45 }
 0x4f7   : > { %v3543_v56 = vadd.s32 536870912, %v3542_v1  ;;  %v3809_v54 = vsub.s32 32, %v3808_v52  ;;  %v3811_v43 = vshll.u32 %v9124_v46, %v3808_v52  ;;  %v3814_v2 = vshll.u32 %v9125_v37, %v3808_v52 }
 0x4f8   : > { %v3661_v48 = vor.u32 %v3660_v49, %v3659_v24  ;;  %v3664_v44 = vshll.u32 %v3663_v13, 23  ;;  %v3817_v63 = vshll.u32 %v9126_v22, %v3808_v52  ;;  %v3820_v47 = vshll.u32 %v9127_v17, %v3808_v52  ;;  %v7913_v8 = vpop.eup %5294 }
 0x4f9   : > { %9173 = vst [vmem:[#allocation28_spill] sm:$0xff] %v7913_v8  ;;  %v7915_v10 = vshrl.u32 %v3543_v56, 30  ;;  %v3810_v42 = vshrl.u32 %v9124_v46, %v3809_v54  ;;  %v3812_v25 = vshrl.u32 %v9125_v37, %v3809_v54  ;;  %v3815_v28 = vshrl.u32 %v9126_v22, %v3809_v54 }
 0x4fa   : > { %vm7922_vm4 = vcmp.le.f32.partialorder %v9175_v51, 0.7853982  ;;  %v3665_v4 = vor.u32 4788187, %v3664_v44  ;;  %v3668_v7 = vcvt.s32.f32 %v3661_v48  ;;  %v3818_v58 = vshrl.u32 %v9127_v17, %v3809_v54  ;;  %v7928_v38 = vpop.eup %5296 }
 0x4fb   : > { %9174 = vst [vmem:[#allocation36_spill] sm:$0xff] %v7915_v10  ;;  %v3821_v26 = vshrl.u32 %v9128_v20, %v3809_v54  ;;  %9178 = vst [vmem:[#allocation40_spill] sm:$0xff] %v7928_v38  ;;  %vm8886_vm12 = vcmp.lt.s32.totalorder %v7625_v41, 0  ;;  %v3545_v29 = vshll.u32 %v7915_v10, 30  ;;  %v3813_v5 = vor.u32 %v3812_v25, %v3811_v43 }
 0x4fc   : > { %v3816_v24 = vor.u32 %v3815_v28, %v3814_v2  ;;  %v3823_v49 = vshll.u32 %v9128_v20, %v3808_v52  ;;  %v3666_v13 = vand.u32 2147483647, %v3665_v4  ;;  %v3819_v56 = vor.u32 %v3818_v58, %v3817_v63 }
 0x4fd   : > { %v3822_v51 = vor.u32 %v3821_v26, %v3820_v47  ;;  %v3824_v44 = vshrl.u32 %v9129_v50, %v3809_v54  ;;  %v7934_v48 = vsub.s32 %v3542_v1, %v3545_v29  ;;  %vm3826_vm11 = vcmp.lt.s32.totalorder %v3807_v35, 1 }
 0x4fe   : > { %vm3827_vm6 = vcmp.lt.s32.totalorder %v3807_v35, 2  ;;  %vm3828_vm10 = vcmp.lt.s32.totalorder %v3807_v35, 3  ;;  %v9179_v6 = vand.u32 2147483647, %v7625_v41  ;;  %v9180_v32 = vmov 0 }
 0x4ff   : > { %v3669_v43 = vmul.f32 %v3668_v7, %v3666_v13  ;;  %v3825_v2 = vor.u32 %v3824_v44, %v3823_v49  ;;  %vm3829_vm2 = vcmp.lt.s32.totalorder %v3807_v35, 4  ;;  %v3830_v52 = vsel %vm3826_vm11, %v3810_v42, %v3813_v5 }
 0x500   : > { %vm7938_vm15 = vcmp.le.f32.partialorder %v9179_v6, 0.7853982  ;;  %v3548_v63 = vsub.s32 0, %v7934_v48  ;;  %v3831_v47 = vsel %vm3829_vm2, %v3819_v56, 2102212464  ;;  %v3834_v25 = vsel %vm3826_vm11, %v3813_v5, %v3816_v24 }
 0x501   : > { %v9181_v32 = vsel %vm7938_vm15, 4294967295, %v9180_v32  ;;  %v3835_v54 = vsel %vm3829_vm2, %v3822_v51, 920167782  ;;  %v3670_v1 = vxor.u32 2147483648, %v3669_v43  ;;  %v3832_v28 = vsel %vm3828_vm10, %v3816_v24, %v3831_v47 }
 0x502   : > { %9182 = vst [vmem:[#allocation39_spill] sm:$0xff] %v9181_v32  ;;  %v3836_v4 = vsel %vm3828_vm10, %v3819_v56, %v3835_v54  ;;  %v3838_v58 = vsel %vm3826_vm11, %v3816_v24, %v3819_v56  ;;  %v4774_v6 = vmin.u32 %v3548_v63, %v7934_v48  ;;  %v3839_v29 = vsel %vm3829_vm2, %v3825_v2, 1326507024 }
 0x503   : > { %v3837_v26 = vsel %vm3827_vm6, %v3834_v25, %v3836_v4  ;;  %v7949_v7 = vadd.f32 %v7621_v11, %v7468_v3  ;;  %v3840_v42 = vsel %vm3828_vm10, %v3822_v51, %v3839_v29  ;;  %v3698_v13 = vor.u32 8388608, %v7902_v33 }
 0x504   : > { %v7953_v5 = vmul.u32.u64.low %v7898_v12, %v3837_v26  ;;  %v7954_v49 = vmul.u32.u64.high %v7898_v12, %v3837_v26, %v7953_v5  ;;  %v7961_v24 = vsel %vm7922_vm4, %v7592_v45, %v3359_v34  ;;  %v3550_v56 = vclz %v4774_v6 }
 0x505   : > { %v3833_v44 = vsel %vm3827_vm6, %v3830_v52, %v3832_v28  ;;  %v3841_v3 = vsel %vm3827_vm6, %v3838_v58, %v3840_v42  ;;  %v3671_v51 = vsel %vm8886_vm12, %v3670_v1, %v3669_v43  ;;  %vm3701_vm2 = vcmp.gt.s32.totalorder %v7907_v0, 0 }
 0x506   : > { %v7968_v2 = vmul.u32.u64.low %v7898_v12, %v3841_v3  ;;  %v7969_v63 = vmul.u32.u64.high %v7898_v12, %v3841_v3, %v7968_v2  ;;  %v3538_v33 = vadd.s32 %v7867_v27, %v7875_v60  ;;  %v4775_v47 = vadd.s32 4294967294, %v3550_v56 }
 0x507   : > { %v3702_v34 = vsel %vm3701_vm2, %v7907_v0, 0  ;;  %v7977_v52 = vadd.f32 %v7621_v11, %v7540_v15  ;;  %5298 = vcosq.f32 %v7961_v24  ;;  %v3852_v35 = vadd.s32 1, %v7954_v49 }
 0x508   : > { %v3704_v43 = vand.u32 31, %v3702_v34  ;;  %v7981_v25 = vshll.u32 %v3698_v13, 8  ;;  %v7986_v54 = vsel %vm7938_vm15, %v7625_v41, %v3671_v51  ;;  %vm4776_vm10 = vcmp.lt.s32.totalorder %v4775_v47, 0 }
 0x509   : > { %v3849_v27 = vmul.u32 %v7898_v12, %v3833_v44  ;;  %v3553_v0 = vsel %vm4776_vm10, 0, %v4775_v47  ;;  %vm3851_vm11 = vc.u32 %v7969_v63, %v7953_v5  ;;  %v7992_v15 = vshrl.u32 %v3702_v34, 5 }
 0x50a   : > { %v3705_v1 = vsub.s32 32, %v3704_v43  ;;  %v3554_v28 = vsub.s32 32, %v3553_v0  ;;  %v3558_v4 = vsub.s32 4294967266, %v3553_v0  ;;  %v3853_v58 = vsel %vm3851_vm11, %v3852_v35, %v7954_v49 }
 0x50b   : > { %v4005_v6 = vand.u32 2139095040, %v7949_v7  ;;  %v3555_v26 = vshll.u32 %v7934_v48, %v3553_v0  ;;  %v3854_v29 = vadd.s32 %v3853_v58, %v3849_v27  ;;  %v3707_v12 = vshll.u32 %v9124_v46, %v3704_v43 }
 0x50c   : > { %v3708_v42 = vshrl.u32 %v9125_v37, %v3705_v1  ;;  %v3556_v13 = vshrl.u32 %v3538_v33, %v3554_v28  ;;  %v3559_v56 = vadd.s32 127, %v3558_v4  ;;  %v3710_v44 = vshll.u32 %v9125_v37, %v3704_v43 }
 0x50d   : > { %v3711_v3 = vshrl.u32 %v9126_v22, %v3705_v1  ;;  %v3855_v51 = vadd.s32 536870912, %v3854_v29  ;;  %v3706_v2 = vshrl.u32 %v9124_v46, %v3705_v1  ;;  %v3713_v49 = vshll.u32 %v9126_v22, %v3704_v43 }
 0x50e   : > { %v3714_v47 = vshrl.u32 %v9127_v17, %v3705_v1  ;;  %v3557_v34 = vor.u32 %v3556_v13, %v3555_v26  ;;  %v3560_v48 = vshll.u32 %v3559_v56, 23  ;;  %v3709_v35 = vor.u32 %v3708_v42, %v3707_v12 }
 0x50f   : > { %v3712_v27 = vor.u32 %v3711_v3, %v3710_v44  ;;  %v8004_v0 = vshrl.u32 %v3855_v51, 30  ;;  %v3716_v33 = vshll.u32 %v9127_v17, %v3704_v43  ;;  %v3717_v28 = vshrl.u32 %v9128_v20, %v3705_v1 }
 0x510   : > { %v3715_v58 = vor.u32 %v3714_v47, %v3713_v49  ;;  %vm8895_vm6 = vcmp.lt.s32.totalorder %v7653_v30, 0  ;;  %v3561_v4 = vor.u32 4788187, %v3560_v48  ;;  %v3564_v60 = vcvt.s32.f32 %v3557_v34 }
 0x511   : > { %9183 = vst [vmem:[#allocation33_spill] sm:$0xff] %v8004_v0  ;;  %v3719_v32 = vshll.u32 %v9128_v20, %v3704_v43  ;;  %v3720_v41 = vshrl.u32 %v9129_v50, %v3705_v1  ;;  %v8011_v8 = vpop.eup %5298  ;;  %v3857_v26 = vshll.u32 %v8004_v0, 30  ;;  %v3718_v12 = vor.u32 %v3717_v28, %v3716_v33 }
 0x512   : > { %vm3722_vm2 = vcmp.lt.s32.totalorder %v7992_v15, 1  ;;  %vm3723_vm10 = vcmp.lt.s32.totalorder %v7992_v15, 2  ;;  %v3562_v42 = vand.u32 2147483647, %v3561_v4  ;;  %vm3724_vm11 = vcmp.lt.s32.totalorder %v7992_v15, 3 }
 0x513   : > { %v3721_v13 = vor.u32 %v3720_v41, %v3719_v32  ;;  %vm3725_vm12 = vcmp.lt.s32.totalorder %v7992_v15, 4  ;;  %v8018_v56 = vsub.s32 %v3854_v29, %v3857_v26  ;;  %v3730_v44 = vsel %vm3722_vm2, %v3709_v35, %v3712_v27 }
 0x514   : > { %v3727_v43 = vsel %vm3725_vm12, %v3715_v58, 2102212464  ;;  %v3731_v1 = vsel %vm3725_vm12, %v3718_v12, 920167782  ;;  %v3565_v3 = vmul.f32 %v3564_v60, %v3562_v42  ;;  %v3726_v51 = vsel %vm3722_vm2, %v3706_v2, %v3709_v35 }
 0x515   : > { %v3732_v49 = vsel %vm3724_vm11, %v3715_v58, %v3731_v1  ;;  %v3734_v47 = vsel %vm3722_vm2, %v3712_v27, %v3715_v58  ;;  %v3860_v34 = vsub.s32 0, %v8018_v56  ;;  %v3728_v48 = vsel %vm3724_vm11, %v3712_v27, %v3727_v43 }
 0x516   : > { %v3733_v33 = vsel %vm3723_vm10, %v3730_v44, %v3732_v49  ;;  %v3735_v41 = vsel %vm3725_vm12, %v3721_v13, 1326507024  ;;  %v3566_v32 = vxor.u32 2147483648, %v3565_v3  ;;  %v4006_v2 = vshrl.u32 %v4005_v6, 23 }
 0x517   : > { %v3736_v28 = vsel %vm3724_vm11, %v3718_v12, %v3735_v41  ;;  %v8024_v4 = vmul.u32.u64.low %v7981_v25, %v3733_v33  ;;  %v8025_v29 = vmul.u32.u64.high %v7981_v25, %v3733_v33, %v8024_v4  ;;  %v4786_v26 = vmin.u32 %v3860_v34, %v8018_v56 }
 0x518   : > { %v3737_v60 = vsel %vm3723_vm10, %v3734_v47, %v3736_v28  ;;  %v9184_v35 = vand.u32 2147483647, %v7949_v7  ;;  %5300 = vsinq.f32 %v7961_v24  ;;  %v8887_v12 = vand.u32 2147483647, %v7977_v52 }
 0x519   : > { %v8035_v58 = vmul.u32.u64.low %v7981_v25, %v3737_v60  ;;  %v8036_v42 = vmul.u32.u64.high %v7981_v25, %v3737_v60, %v8035_v58  ;;  %v3567_v13 = vsel %vm8895_vm6, %v3566_v32, %v3565_v3  ;;  %v3862_v43 = vclz %v4786_v26 }
 0x51a   : > { %v4009_v27 = vand.u32 8388607, %v9184_v35  ;;  %v3729_v44 = vsel %vm3723_vm10, %v3726_v51, %v3728_v48  ;;  %v4793_v1 = vadd.s32 4294967169, %v4006_v2  ;;  %5302 = vcosq.f32 %v7986_v54 }
 0x51b   : > { %v9185_v24 = vand.u32 2147483647, %v7653_v30  ;;  %v9186_v49 = vmov 0  ;;  %v3748_v47 = vadd.s32 1, %v8025_v29  ;;  %5304 = vsinq.f32 %v7986_v54 }
 0x51c   : > { %v4787_v3 = vadd.s32 4294967294, %v3862_v43  ;;  %v4010_v15 = vor.u32 8388608, %v4009_v27  ;;  %v4012_v51 = vadd.s32 1, %v4793_v1  ;;  %v3745_v48 = vmul.u32 %v7981_v25, %v3729_v44 }
 0x51d   : > { %vm8049_vm12 = vcmp.le.f32.partialorder %v9185_v24, 0.7853982  ;;  %vm3747_vm2 = vc.u32 %v8036_v42, %v8024_v4  ;;  %v3901_v33 = vand.u32 2139095040, %v7977_v52  ;;  %v8067_v54 = vand.u32 8388607, %v8887_v12 }
 0x51e   : > { %v9187_v49 = vsel %vm8049_vm12, 4294967295, %v9186_v49  ;;  %v8058_v34 = vsel %vm8049_vm12, %v7653_v30, %v3567_v13  ;;  %vm4788_vm10 = vcmp.lt.s32.totalorder %v4787_v3, 0  ;;  %v3749_v41 = vsel %vm3747_vm2, %v3748_v47, %v8025_v29 }
 0x51f   : > { %9188 = vst [vmem:[#allocation15_spill] sm:$0xff] %v9187_v49  ;;  %vm4013_vm11 = vcmp.gt.s32.totalorder %v4012_v51, 0  ;;  %v3850_v32 = vadd.s32 %v7953_v5, %v7969_v63  ;;  %v3865_v28 = vsel %vm4788_vm10, 0, %v4787_v3  ;;  %v3750_v26 = vadd.s32 %v3749_v41, %v3745_v48 }
 0x520   : > { %v4014_v60 = vsel %vm4013_vm11, %v4012_v51, 0  ;;  %5306 = vcosq.f32 %v8058_v34  ;;  %v3866_v25 = vsub.s32 32, %v3865_v28  ;;  %v3870_v2 = vsub.s32 4294967266, %v3865_v28 }
 0x521   : > { %v8072_v35 = vshll.u32 %v4010_v15, 8  ;;  %v3751_v27 = vadd.s32 536870912, %v3750_v26  ;;  %v4016_v58 = vand.u32 31, %v4014_v60  ;;  %v3902_v29 = vshrl.u32 %v3901_v33, 23 }
 0x522   : > { %v8076_v13 = vadd.f32 %v7621_v11, %v7641_v21  ;;  %v3867_v43 = vshll.u32 %v8018_v56, %v3865_v28  ;;  %v3868_v44 = vshrl.u32 %v3850_v32, %v3866_v25  ;;  %v3871_v5 = vadd.s32 127, %v3870_v2  ;;  %v8080_v1 = vpop.eup %5300 }
 0x523   : > { %v8082_v24 = vshrl.u32 %v3751_v27, 30  ;;  %v4015_v47 = vshrl.u32 %v4014_v60, 5  ;;  %v4017_v3 = vsub.s32 32, %v4016_v58  ;;  %v4019_v15 = vshll.u32 %v9124_v46, %v4016_v58 }
 0x524   : > { %v3869_v51 = vor.u32 %v3868_v44, %v3867_v43  ;;  %v3872_v48 = vshll.u32 %v3871_v5, 23  ;;  %v4022_v33 = vshll.u32 %v9125_v37, %v4016_v58  ;;  %v4025_v11 = vshll.u32 %v9126_v22, %v4016_v58  ;;  %v8087_v21 = vpop.eup %5302 }
 0x525   : > { %9189 = vst [vmem:[#allocation13_spill] sm:$0xff] %v8082_v24  ;;  %9190 = vst [vmem:[#allocation37_spill] sm:$0xff] %v8087_v21  ;;  %v3753_v56 = vshll.u32 %v8082_v24, 30  ;;  %v4020_v41 = vshrl.u32 %v9125_v37, %v4017_v3  ;;  %v4023_v32 = vshrl.u32 %v9126_v22, %v4017_v3  ;;  %v4028_v28 = vshll.u32 %v9127_v17, %v4016_v58  ;;  %v8093_v60 = vpop.eup %5304 }
 0x526   : > { %9191 = vst [vmem:[#allocation8_spill] sm:$0xff] %v8093_v60  ;;  %v3873_v25 = vor.u32 4788187, %v3872_v48  ;;  %v3876_v2 = vcvt.s32.f32 %v3869_v51  ;;  %v4026_v27 = vshrl.u32 %v9127_v17, %v4017_v3  ;;  %v4029_v43 = vshrl.u32 %v9128_v20, %v4017_v3 }
 0x527   : > { %v8097_v44 = vsub.s32 %v3750_v26, %v3753_v56  ;;  %v4021_v5 = vor.u32 %v4020_v41, %v4019_v15  ;;  %v4024_v12 = vor.u32 %v4023_v32, %v4022_v33  ;;  %v4031_v6 = vshll.u32 %v9128_v20, %v4016_v58 }
 0x528   : > { %v3874_v63 = vand.u32 2147483647, %v3873_v25  ;;  %v4027_v0 = vor.u32 %v4026_v27, %v4025_v11  ;;  %v4030_v21 = vor.u32 %v4029_v43, %v4028_v28  ;;  %v4032_v24 = vshrl.u32 %v9129_v50, %v4017_v3 }
 0x529   : > { %v3756_v49 = vsub.s32 0, %v8097_v44  ;;  %v4018_v48 = vshrl.u32 %v9124_v46, %v4017_v3  ;;  %vm4034_vm2 = vcmp.lt.s32.totalorder %v4015_v47, 1  ;;  %vm4036_vm10 = vcmp.lt.s32.totalorder %v4015_v47, 3 }
 0x52a   : > { %v8103_v51 = vpop.eup %5306  ;;  %v3877_v60 = vmul.f32 %v3876_v2, %v3874_v63  ;;  %v4033_v26 = vor.u32 %v4032_v24, %v4031_v6  ;;  %vm4037_vm11 = vcmp.lt.s32.totalorder %v4015_v47, 4  ;;  %v4042_v15 = vsel %vm4034_vm2, %v4021_v5, %v4024_v12 }
 0x52b   : > { %9192 = vst [vmem:[#allocation2_spill] sm:$0xff] %v8103_v51  ;;  %v4782_v58 = vmin.u32 %v3756_v49, %v8097_v44  ;;  %v4039_v33 = vsel %vm4037_vm11, %v4027_v0, 2102212464  ;;  %v4043_v11 = vsel %vm4037_vm11, %v4030_v21, 920167782  ;;  %v4046_v56 = vsel %vm4034_vm2, %v4024_v12, %v4027_v0 }
 0x52c   : > { %vm4035_vm6 = vcmp.lt.s32.totalorder %v4015_v47, 2  ;;  %v4044_v41 = vsel %vm4036_vm10, %v4027_v0, %v4043_v11  ;;  %v4047_v32 = vsel %vm4037_vm11, %v4033_v26, 1326507024  ;;  %v4789_v3 = vadd.s32 4294967169, %v3902_v29 }
 0x52d   : > { %v3758_v28 = vclz %v4782_v58  ;;  %v4038_v25 = vsel %vm4034_vm2, %v4018_v48, %v4021_v5  ;;  %v4045_v63 = vsel %vm4035_vm6, %v4042_v15, %v4044_v41  ;;  %v4048_v6 = vsel %vm4036_vm10, %v4030_v21, %v4047_v32 }
 0x52e   : > { %v4040_v24 = vsel %vm4036_vm10, %v4024_v12, %v4039_v33  ;;  %v4049_v49 = vsel %vm4035_vm6, %v4046_v56, %v4048_v6  ;;  %v8115_v2 = vmul.u32.u64.low %v8072_v35, %v4045_v63  ;;  %v8116_v27 = vmul.u32.u64.high %v8072_v35, %v4045_v63, %v8115_v2 }
 0x52f   : > { %v3878_v43 = vxor.u32 2147483648, %v3877_v60  ;;  %v4783_v0 = vadd.s32 4294967294, %v3758_v28  ;;  %v8120_v29 = vmul.u32.u64.low %v8072_v35, %v4049_v49  ;;  %v8121_v26 = vmul.u32.u64.high %v8072_v35, %v4049_v49, %v8120_v29 }
 0x530   : > { %5308 = vsinq.f32 %v8058_v34  ;;  %v9193_v5 = vand.u32 2147483647, %v7663_v16  ;;  %v9194_v21 = vmov 0  ;;  %vm8897_vm10 = vcmp.lt.s32.totalorder %v7663_v16, 0 }
 0x531   : > { %v3908_v12 = vadd.s32 1, %v4789_v3  ;;  %v3746_v48 = vadd.s32 %v8024_v4, %v8036_v42  ;;  %vm4784_vm11 = vcmp.lt.s32.totalorder %v4783_v0, 0  ;;  %v4041_v15 = vsel %vm4035_vm6, %v4038_v25, %v4040_v24 }
 0x532   : > { %vm8126_vm2 = vcmp.le.f32.partialorder %v9193_v5, 0.7853982  ;;  %v9197_v58 = vor.u32 8388608, %v8067_v54  ;;  %v3761_v34 = vsel %vm4784_vm11, 0, %v4783_v0  ;;  %v4060_v11 = vadd.s32 1, %v8116_v27 }
 0x533   : > { %v9195_v21 = vsel %vm8126_vm2, 4294967295, %v9194_v21  ;;  %vm3909_vm0 = vcmp.gt.s32.totalorder %v3908_v12, 0  ;;  %v4213_v56 = vand.u32 2139095040, %v8076_v13  ;;  %v3879_v41 = vsel %vm8897_vm10, %v3878_v43, %v3877_v60 }
 0x534   : > { %9196 = vst [vmem:[#allocation5_spill] sm:$0xff] %v9195_v21  ;;  %v8136_v33 = vshll.u32 %v9197_v58, 8  ;;  %v3762_v32 = vsub.s32 32, %v3761_v34  ;;  %v3766_v3 = vsub.s32 4294967266, %v3761_v34  ;;  %v8898_v4 = vand.u32 2147483647, %v8076_v13 }
 0x535   : > { %v3763_v42 = vshll.u32 %v8097_v44, %v3761_v34  ;;  %v4057_v47 = vmul.u32 %v8072_v35, %v4041_v15  ;;  %vm4059_vm6 = vc.u32 %v8121_v26, %v8115_v2  ;;  %v3910_v54 = vsel %vm3909_vm0, %v3908_v12, 0 }
 0x536   : > { %v3764_v28 = vshrl.u32 %v3746_v48, %v3762_v32  ;;  %v3767_v25 = vadd.s32 127, %v3766_v3  ;;  %v4061_v63 = vsel %vm4059_vm6, %v4060_v11, %v8116_v27  ;;  %v3911_v6 = vshrl.u32 %v3910_v54, 5 }
 0x537   : > { %v8151_v60 = vsel %vm8126_vm2, %v7663_v16, %v3879_v41  ;;  %v4062_v24 = vadd.s32 %v4061_v63, %v4057_v47  ;;  %v3912_v49 = vand.u32 31, %v3910_v54  ;;  %v4214_v43 = vshrl.u32 %v4213_v56, 23  ;;  %v9273_v63 = vld [vmem:[#allocation27_spill] sm:$0xff] }
 0x538   : > { %v3765_v44 = vor.u32 %v3764_v28, %v3763_v42  ;;  %v3768_v0 = vshll.u32 %v3767_v25, 23  ;;  %vm3930_vm11 = vcmp.lt.s32.totalorder %v3911_v6, 1  ;;  %v8155_v35 = vand.u32 8388607, %v8898_v4 }
 0x539   : > { %v4063_v29 = vadd.s32 536870912, %v4062_v24  ;;  %v3913_v5 = vsub.s32 32, %v3912_v49  ;;  %v3915_v27 = vshll.u32 %v9124_v46, %v3912_v49  ;;  %v3918_v12 = vshll.u32 %v9125_v37, %v3912_v49 }
 0x53a   : > { %vm3931_vm0 = vcmp.lt.s32.totalorder %v3911_v6, 2  ;;  %v3769_v48 = vor.u32 4788187, %v3768_v0  ;;  %v3772_v15 = vcvt.s32.f32 %v3765_v44  ;;  %v3921_v58 = vshll.u32 %v9126_v22, %v3912_v49  ;;  %v8162_v11 = vpop.eup %5308 }
 0x53b   : > { %v3924_v34 = vshll.u32 %v9127_v17, %v3912_v49  ;;  %9198 = vst [vmem:[#allocation17_spill] sm:$0xff] %v8162_v11  ;;  %v8164_v56 = vshrl.u32 %v4063_v29, 30  ;;  %v3914_v41 = vshrl.u32 %v9124_v46, %v3913_v5  ;;  %v3916_v32 = vshrl.u32 %v9125_v37, %v3913_v5 }
 0x53c   : > { %v3919_v3 = vshrl.u32 %v9126_v22, %v3913_v5  ;;  %v3770_v42 = vand.u32 2147483647, %v3769_v48  ;;  %v3922_v47 = vshrl.u32 %v9127_v17, %v3913_v5  ;;  %v3925_v54 = vshrl.u32 %v9128_v20, %v3913_v5 }
 0x53d   : > { %v3927_v28 = vshll.u32 %v9128_v20, %v3912_v49  ;;  %v9199_v25 = vand.u32 2147483647, %v7806_v53  ;;  %v4065_v44 = vshll.u32 %v8164_v56, 30  ;;  %v3917_v0 = vor.u32 %v3916_v32, %v3915_v27 }
 0x53e   : > { %v3920_v29 = vor.u32 %v3919_v3, %v3918_v12  ;;  %v3928_v4 = vshrl.u32 %v9129_v50, %v3913_v5  ;;  %v3773_v21 = vmul.f32 %v3772_v15, %v3770_v42  ;;  %v3923_v48 = vor.u32 %v3922_v47, %v3921_v58 }
 0x53f   : > { %vm8174_vm10 = vcmp.le.f32.partialorder %v9199_v25, 0.7853982  ;;  %v3926_v16 = vor.u32 %v3925_v54, %v3924_v34  ;;  %vm3932_vm1 = vcmp.lt.s32.totalorder %v3911_v6, 3  ;;  %v8180_v51 = vsub.s32 %v4062_v24, %v4065_v44  ;;  %v5336_v34 = vld [vmem:[%s8719_s6] ss:$0 sm:$0xff] }
 0x540   : > { %v3929_v11 = vor.u32 %v3928_v4, %v3927_v28  ;;  %vm3933_vm6 = vcmp.lt.s32.totalorder %v3911_v6, 4  ;;  %v3934_v49 = vsel %vm3930_vm11, %v3914_v41, %v3917_v0  ;;  %v3774_v25 = vxor.u32 2147483648, %v3773_v21 }
 0x541   : > { %v3935_v30 = vsel %vm3933_vm6, %v3923_v48, 2102212464  ;;  %v3938_v38 = vsel %vm3930_vm11, %v3917_v0, %v3920_v29  ;;  %v3939_v10 = vsel %vm3933_vm6, %v3926_v16, 920167782  ;;  %v4068_v27 = vsub.s32 0, %v8180_v51 }
 0x542   : > { %v3936_v12 = vsel %vm3932_vm1, %v3920_v29, %v3935_v30  ;;  %v3940_v5 = vsel %vm3932_vm1, %v3923_v48, %v3939_v10  ;;  %v3942_v15 = vsel %vm3930_vm11, %v3920_v29, %v3923_v48  ;;  %v3943_v58 = vsel %vm3933_vm6, %v3929_v11, 1326507024 }
 0x543   : > { %v3941_v24 = vsel %vm3931_vm0, %v3938_v38, %v3940_v5  ;;  %v4801_v4 = vadd.s32 4294967169, %v4214_v43  ;;  %v8193_v41 = vadd.f32 %v5336_v34, %v7710_v9  ;;  %vm9202_vm2 = vcmp.lt.s32.totalorder %v7806_v53, 0  ;;  %v351_v38 = vld [vmem:[%s8720_s7] sm:$0xff] }
 0x544   : > { %v3775_v32 = vsel %vm9202_vm2, %v3774_v25, %v3773_v21  ;;  %v4794_v30 = vmin.u32 %v4068_v27, %v8180_v51  ;;  %v3944_v10 = vsel %vm3932_vm1, %v3926_v16, %v3943_v58  ;;  %v4218_v3 = vor.u32 8388608, %v8155_v35  ;;  %v352_v21 = vld [vmem:[%s8720_s7 + $0x8] sm:$0xff]  ;;  %v353_v16 = vld [vmem:[%s8720_s7 + $0x10] sm:$0xff]  ;;  %v354_v35 = vld [vmem:[%s8720_s7 + $0x18] sm:$0xff] }
 0x545   : > { %v3937_v43 = vsel %vm3931_vm0, %v3934_v49, %v3936_v12  ;;  %v3945_v11 = vsel %vm3931_vm0, %v3942_v15, %v3944_v10  ;;  %v8206_v9 = vmul.u32.u64.low %v8136_v33, %v3941_v24  ;;  %v8207_v42 = vmul.u32.u64.high %v8136_v33, %v3941_v24, %v8206_v9 }
 0x546   : > { %5310 = vcosq.f32 %v8151_v60  ;;  %v4070_v6 = vclz %v4794_v30  ;;  %v8221_v47 = vmul.u32.u64.low %v8136_v33, %v3945_v11  ;;  %v8222_v54 = vmul.u32.u64.high %v8136_v33, %v3945_v11, %v8221_v47 }
 0x547   : > { %5312 = vsinq.f32 %v8151_v60  ;;  %v8228_v28 = vsel %vm8174_vm10, %v7806_v53, %v3775_v32  ;;  %v4058_v44 = vadd.s32 %v8115_v2, %v8121_v26  ;;  %v4220_v0 = vadd.s32 1, %v4801_v4 }
 0x548   : > { %v4795_v29 = vadd.s32 4294967294, %v4070_v6  ;;  %v3953_v48 = vmul.u32 %v8136_v33, %v3937_v43  ;;  %v5056_v49 = vpack.c.bf16 %v352_v21, %v351_v38  ;;  %v5060_v25 = vpack.c.bf16 %v354_v35, %v353_v16 }
 0x549   : > { %v3956_v27 = vadd.s32 1, %v8207_v42  ;;  %vm4221_vm1 = vcmp.gt.s32.totalorder %v4220_v0, 0  ;;  %v8234_v12 = vshll.u32 %v4218_v3, 8  ;;  %v4106_v60 = vand.u32 2147483647, %v8193_v41 }
 0x54a   : > { %vm4796_vm2 = vcmp.lt.s32.totalorder %v4795_v29, 0  ;;  %vm3955_vm11 = vc.u32 %v8222_v54, %v8206_v9  ;;  %v4222_v5 = vsel %vm4221_vm1, %v4220_v0, 0  ;;  %5057 = vmatprep.subr.bf16.mxu1 %v5056_v49  ;;  %vm8911_vm0 = vcmp.lt.s32.totalorder %v7949_v7, 0 }
 0x54b   : > { %v4073_v26 = vsel %vm4796_vm2, 0, %v4795_v29  ;;  %v3957_v33 = vsel %vm3955_vm11, %v3956_v27, %v8207_v42  ;;  %v4223_v15 = vshrl.u32 %v4222_v5, 5  ;;  %v4224_v24 = vand.u32 31, %v4222_v5  ;;  %5059 = vmatpush3.bf16.msra.mxu1 %v5056_v49 }
 0x54c   : > { %v4074_v58 = vsub.s32 32, %v4073_v26  ;;  %v4075_v4 = vshll.u32 %v8180_v51, %v4073_v26  ;;  %v4078_v34 = vsub.s32 4294967266, %v4073_v26  ;;  %v3958_v32 = vadd.s32 %v3957_v33, %v3953_v48  ;;  %5061 = vmatprep.subr.bf16.mxu1 %v5060_v25 }
 0x54d   : > { %v4225_v30 = vsub.s32 32, %v4224_v24  ;;  %v4227_v10 = vshll.u32 %v9124_v46, %v4224_v24  ;;  %v4230_v3 = vshll.u32 %v9125_v37, %v4224_v24  ;;  %v4233_v38 = vshll.u32 %v9126_v22, %v4224_v24 }
 0x54e   : > { %v4076_v43 = vshrl.u32 %v4058_v44, %v4074_v58  ;;  %v4079_v11 = vadd.s32 127, %v4078_v34  ;;  %v3959_v21 = vadd.s32 536870912, %v3958_v32  ;;  %v4236_v42 = vshll.u32 %v9127_v17, %v4224_v24 }
 0x54f   : > { %v4226_v16 = vshrl.u32 %v9124_v46, %v4225_v30  ;;  %v4228_v35 = vshrl.u32 %v9125_v37, %v4225_v30  ;;  %v4231_v51 = vshrl.u32 %v9126_v22, %v4225_v30  ;;  %v4234_v6 = vshrl.u32 %v9127_v17, %v4225_v30  ;;  %5063 = vmatpush3.bf16.msra.mxu1 %v5060_v25 }
 0x550   : > { %v8250_v47 = vpop.eup %5310  ;;  %v4077_v0 = vor.u32 %v4076_v43, %v4075_v4  ;;  %v4080_v29 = vshll.u32 %v4079_v11, 23  ;;  %v8252_v48 = vshrl.u32 %v3959_v21, 30  ;;  %v4237_v44 = vshrl.u32 %v9128_v20, %v4225_v30 }
 0x551   : > { %v8255_v49 = vpop.eup %5312  ;;  %v4229_v27 = vor.u32 %v4228_v35, %v4227_v10  ;;  %v4232_v5 = vor.u32 %v4231_v51, %v4230_v3  ;;  %v4235_v26 = vor.u32 %v4234_v6, %v4233_v38  ;;  %v4239_v33 = vshll.u32 %v9128_v20, %v4224_v24 }
 0x552   : > { %v4081_v58 = vor.u32 4788187, %v4080_v29  ;;  %v4084_v34 = vcvt.s32.f32 %v4077_v0  ;;  %v3961_v25 = vshll.u32 %v8252_v48, 30  ;;  %v4238_v2 = vor.u32 %v4237_v44, %v4236_v42 }
 0x553   : > { %v4240_v4 = vshrl.u32 %v9129_v50, %v4225_v30  ;;  %vm4242_vm6 = vcmp.lt.s32.totalorder %v4223_v15, 1  ;;  %vm4243_vm1 = vcmp.lt.s32.totalorder %v4223_v15, 2  ;;  %vm4244_vm2 = vcmp.lt.s32.totalorder %v4223_v15, 3 }
 0x554   : > { %v4082_v43 = vand.u32 2147483647, %v4081_v58  ;;  %v8261_v11 = vsub.s32 %v3958_v32, %v3961_v25  ;;  %vm4245_vm11 = vcmp.lt.s32.totalorder %v4223_v15, 4  ;;  %v4246_v10 = vsel %vm4242_vm6, %v4226_v16, %v4229_v27 }
 0x555   : > { %v4241_v3 = vor.u32 %v4240_v4, %v4239_v33  ;;  %v4247_v38 = vsel %vm4245_vm11, %v4235_v26, 2102212464  ;;  %v4250_v24 = vsel %vm4242_vm6, %v4229_v27, %v4232_v5  ;;  %v4251_v21 = vsel %vm4245_vm11, %v4238_v2, 920167782 }
 0x556   : > { %v4085_v35 = vmul.f32 %v4084_v34, %v4082_v43  ;;  %v3964_v51 = vsub.s32 0, %v8261_v11  ;;  %v4248_v42 = vsel %vm4244_vm2, %v4232_v5, %v4247_v38  ;;  %v4252_v30 = vsel %vm4244_vm2, %v4235_v26, %v4251_v21 }
 0x557   : > { %v4253_v6 = vsel %vm4243_vm1, %v4250_v24, %v4252_v30  ;;  %v4254_v32 = vsel %vm4242_vm6, %v4232_v5, %v4235_v26  ;;  %v4255_v0 = vsel %vm4245_vm11, %v4241_v3, 1326507024  ;;  %v4113_v16 = vand.u32 8388607, %v4106_v60 }
 0x558   : > { %v4086_v29 = vxor.u32 2147483648, %v4085_v35  ;;  %v4790_v44 = vmin.u32 %v3964_v51, %v8261_v11  ;;  %v4249_v27 = vsel %vm4243_vm1, %v4246_v10, %v4248_v42  ;;  %v4256_v33 = vsel %vm4244_vm2, %v4238_v2, %v4255_v0 }
 0x559   : > { %v4257_v58 = vsel %vm4243_vm1, %v4254_v32, %v4256_v33  ;;  %v8277_v34 = vmul.u32.u64.low %v8234_v12, %v4253_v6  ;;  %v8278_v25 = vmul.u32.u64.high %v8234_v12, %v4253_v6, %v8277_v34  ;;  %v9203_v5 = vand.u32 2139095040, %v8193_v41 }
 0x55a   : > { %v4087_v4 = vsel %vm8911_vm0, %v4086_v29, %v4085_v35  ;;  %v3966_v43 = vclz %v4790_v44  ;;  %v8286_v3 = vmul.u32.u64.low %v8234_v12, %v4257_v58  ;;  %v8287_v38 = vmul.u32.u64.high %v8234_v12, %v4257_v58, %v8286_v3 }
 0x55b   : > { %v4110_v26 = vshrl.u32 %v9203_v5, 23  ;;  %5314 = vcosq.f32 %v8228_v28  ;;  %v2736_v15 = vsub.s32 4, %v7304_v57  ;;  %v9204_v10 = vsel %vm7391_vm8, 0, %v7882_v55 }
 0x55c   : > { %v8295_v24 = vadd.s32 3, %v9204_v10  ;;  %5316 = vsinq.f32 %v8228_v28  ;;  %v9205_v21 = vand.u32 2147483647, %v7949_v7  ;;  %v9206_v35 = vmov 0 }
 0x55d   : > { %v4797_v2 = vadd.s32 4294967169, %v4110_v26  ;;  %v4791_v51 = vadd.s32 4294967294, %v3966_v43  ;;  %v4265_v30 = vmul.u32 %v8234_v12, %v4249_v27  ;;  %v4268_v59 = vadd.s32 1, %v8278_v25 }
 0x55e   : > { %vm8300_vm6 = vcmp.le.f32.partialorder %v9205_v21, 0.7853982  ;;  %vm4267_vm1 = vc.u32 %v8287_v38, %v8277_v34  ;;  %v4114_v28 = vor.u32 8388608, %v4113_v16  ;;  %vm9208_vm2 = vcmp.lt.s32.totalorder %v7175_v19, 0 }
 0x55f   : > { %v9207_v35 = vsel %vm8300_vm6, 4294967295, %v9206_v35  ;;  %v4090_v42 = vsel %vm8300_vm6, %v7949_v7, %v4087_v4  ;;  %v4116_v55 = vadd.s32 1, %v4797_v2  ;;  %vm4792_vm8 = vcmp.lt.s32.totalorder %v4791_v51, 0 }
 0x560   : > { %v2737_v6 = vsel %vm9208_vm2, %v2736_v15, %v7304_v57  ;;  %v3969_v32 = vsel %vm4792_vm8, 0, %v4791_v51  ;;  %v4269_v0 = vsel %vm4267_vm1, %v4268_v59, %v8278_v25  ;;  %v3954_v12 = vadd.s32 %v8206_v9, %v8222_v54 }
 0x561   : > { %vm4117_vm11 = vcmp.gt.s32.totalorder %v4116_v55, 0  ;;  %v2739_v29 = vsel %vm7403_vm7, 0, %v2737_v6  ;;  %v3970_v44 = vsub.s32 32, %v3969_v32  ;;  %v3974_v27 = vsub.s32 4294967266, %v3969_v32 }
 0x562   : > { %v4270_v33 = vadd.s32 %v4269_v0, %v4265_v30  ;;  %5318 = vcosq.f32 %v4090_v42  ;;  %v4118_v58 = vsel %vm4117_vm11, %v4116_v55, 0  ;;  %v2743_v16 = vadd.s32 3, %v2739_v29 }
 0x563   : > { %v2747_v5 = vxor.u32 2147483648, %v7586_v31  ;;  %v3971_v57 = vshll.u32 %v8261_v11, %v3969_v32  ;;  %v3972_v26 = vshrl.u32 %v3954_v12, %v3970_v44  ;;  %v3975_v4 = vadd.s32 127, %v3974_v27 }
 0x564   : > { %v4271_v25 = vadd.s32 536870912, %v4270_v33  ;;  %5320 = vsinq.f32 %v4090_v42  ;;  %v8321_v43 = vshrl.u32 %v4118_v58, 5  ;;  %v4120_v61 = vand.u32 31, %v4118_v58 }
 0x565   : > { %v8323_v3 = vshll.u32 %v4114_v28, 8  ;;  %v3973_v9 = vor.u32 %v3972_v26, %v3971_v57  ;;  %v3976_v54 = vshll.u32 %v3975_v4, 23  ;;  %v8327_v15 = vand.u32 3, %v2743_v16  ;;  %v8329_v10 = vpop.eup %5314 }
 0x566   : > { %v8325_v2 = vshrl.u32 %v4271_v25, 30  ;;  %v4121_v21 = vsub.s32 32, %v4120_v61  ;;  %v4123_v11 = vshll.u32 %v9124_v46, %v4120_v61  ;;  %v4126_v51 = vshll.u32 %v9125_v37, %v4120_v61  ;;  %v8334_v30 = vpop.eup %5316 }
 0x567   : > { %v4129_v42 = vshll.u32 %v9126_v22, %v4120_v61  ;;  %v3977_v59 = vor.u32 4788187, %v3976_v54  ;;  %v3980_v55 = vcvt.s32.f32 %v3973_v9  ;;  %v4132_v6 = vshll.u32 %v9127_v17, %v4120_v61 }
 0x568   : > { %v4273_v28 = vshll.u32 %v8325_v2, 30  ;;  %v4122_v32 = vshrl.u32 %v9124_v46, %v4121_v21  ;;  %v4124_v0 = vshrl.u32 %v9125_v37, %v4121_v21  ;;  %v4127_v29 = vshrl.u32 %v9126_v22, %v4121_v21 }
 0x569   : > { %v4130_v12 = vshrl.u32 %v9127_v17, %v4121_v21  ;;  %v3978_v44 = vand.u32 2147483647, %v3977_v59  ;;  %v4133_v58 = vshrl.u32 %v9128_v20, %v4121_v21  ;;  %v4135_v16 = vshll.u32 %v9128_v20, %v4120_v61 }
 0x56a   : > { %v8343_v27 = vsub.s32 %v4270_v33, %v4273_v28  ;;  %v4125_v57 = vor.u32 %v4124_v0, %v4123_v11  ;;  %v4128_v26 = vor.u32 %v4127_v29, %v4126_v51  ;;  %v4136_v25 = vshrl.u32 %v9129_v50, %v4121_v21 }
 0x56b   : > { %v4131_v4 = vor.u32 %v4130_v12, %v4129_v42  ;;  %v9209_v46 = vand.u32 2147483647, %v7977_v52  ;;  %v3981_v22 = vmul.f32 %v3980_v55, %v3978_v44  ;;  %v4134_v33 = vor.u32 %v4133_v58, %v4132_v6 }
 0x56c   : > { %v4276_v17 = vsub.s32 0, %v8343_v27  ;;  %vm4138_vm1 = vcmp.lt.s32.totalorder %v8321_v43, 1  ;;  %v8356_v9 = vpop.eup %5318  ;;  %v4137_v20 = vor.u32 %v4136_v25, %v4135_v16  ;;  %vm4140_vm2 = vcmp.lt.s32.totalorder %v8321_v43, 3 }
 0x56d   : > { %vm8350_vm8 = vcmp.le.f32.partialorder %v9209_v46, 0.7853982  ;;  %vm4141_vm11 = vcmp.lt.s32.totalorder %v8321_v43, 4  ;;  %v4142_v50 = vsel %vm4138_vm1, %v4122_v32, %v4125_v57  ;;  %v3982_v61 = vxor.u32 2147483648, %v3981_v22 }
 0x56e   : > { %v4802_v54 = vmin.u32 %v4276_v17, %v8343_v27  ;;  %v4143_v21 = vsel %vm4141_vm11, %v4131_v4, 2102212464  ;;  %v4146_v11 = vsel %vm4138_vm1, %v4125_v57, %v4128_v26  ;;  %v8361_v51 = vpop.eup %5320  ;;  %v4147_v59 = vsel %vm4141_vm11, %v4134_v33, 920167782 }
 0x56f   : > { %v4144_v42 = vsel %vm4140_vm2, %v4128_v26, %v4143_v21  ;;  %v4150_v55 = vsel %vm4138_vm1, %v4128_v26, %v4131_v4  ;;  %v4151_v28 = vsel %vm4141_vm11, %v4137_v20, 1326507024  ;;  %v4266_v6 = vadd.s32 %v8277_v34, %v8287_v38 }
 0x570   : > { %v4278_v0 = vclz %v4802_v54  ;;  %vm4139_vm7 = vcmp.lt.s32.totalorder %v8321_v43, 2  ;;  %v4148_v32 = vsel %vm4140_vm2, %v4131_v4, %v4147_v59  ;;  %v4152_v12 = vsel %vm4140_vm2, %v4134_v33, %v4151_v28 }
 0x571   : > { %v4149_v29 = vsel %vm4139_vm7, %v4146_v11, %v4148_v32  ;;  %v2750_v44 = vxor.u32 2147483648, %v7579_v14  ;;  %v2848_v58 = vand.u32 3, %v8295_v24  ;;  %vm9212_vm1 = vcmp.lt.s32.totalorder %v7977_v52, 0 }
 0x572   : > { %v3983_v16 = vsel %vm9212_vm1, %v3982_v61, %v3981_v22  ;;  %v4803_v57 = vadd.s32 4294967294, %v4278_v0  ;;  %v4145_v26 = vsel %vm4139_vm7, %v4142_v50, %v4144_v42  ;;  %v4153_v34 = vsel %vm4139_vm7, %v4150_v55, %v4152_v12 }
 0x573   : > { %v8378_v38 = vmul.u32.u64.low %v8323_v3, %v4153_v34  ;;  %v8379_v25 = vmul.u32.u64.high %v8323_v3, %v4153_v34, %v8378_v38  ;;  %vm2746_vm11 = vcmp.eq.s32.totalorder %v8327_v15, 0  ;;  %v2851_v4 = vxor.u32 2147483648, %v7461_v36 }
 0x574   : > { %vm4804_vm0 = vcmp.lt.s32.totalorder %v4803_v57, 0  ;;  %v8384_v43 = vmul.u32.u64.low %v8323_v3, %v4149_v29  ;;  %v8385_v46 = vmul.u32.u64.high %v8323_v3, %v4149_v29, %v8384_v43  ;;  %v2748_v24 = vsel %vm2746_vm11, %v7579_v14, %v2747_v5 }
 0x575   : > { %v3986_v22 = vsel %vm8350_vm8, %v7977_v52, %v3983_v16  ;;  %v4281_v17 = vsel %vm4804_vm0, 0, %v4803_v57  ;;  %v4161_v33 = vmul.u32 %v8323_v3, %v4145_v26  ;;  %vm2749_vm2 = vcmp.eq.s32.totalorder %v8327_v15, 2 }
 0x576   : > { %v4282_v20 = vsub.s32 32, %v4281_v17  ;;  %v4286_v50 = vsub.s32 4294967266, %v4281_v17  ;;  %vm2745_vm1 = vcmp.lt.s32.totalorder %v8327_v15, 2  ;;  %v2751_v61 = vsel %vm2749_vm2, %v2750_v44, %v7586_v31 }
 0x577   : > { %v4283_v54 = vshll.u32 %v8343_v27, %v4281_v17  ;;  %vm4163_vm11 = vc.u32 %v8379_v25, %v8384_v43  ;;  %v2752_v14 = vsel %vm2745_vm1, %v2748_v24, %v2751_v61  ;;  %vm2850_vm7 = vcmp.eq.s32.totalorder %v2848_v58, 0  ;;  %v9223_v17 = vld [vmem:[#allocation4_spill] sm:$0xff] }
 0x578   : > { %v4284_v5 = vshrl.u32 %v4266_v6, %v4282_v20  ;;  %v4287_v21 = vadd.s32 127, %v4286_v50  ;;  %v4164_v11 = vadd.s32 1, %v8385_v46  ;;  %vm9213_vm0 = vweird.f32 %v7175_v19  ;;  %v9215_v19 = vld [vmem:[#allocation7_spill] sm:$0xff] }
 0x579   : > { %v2753_v3 = vsel %vm9213_vm0, nan, %v2752_v14  ;;  %5322 = vcosq.f32 %v3986_v22  ;;  %vm9214_vm6 = vcmask 261120   ;;  %v2852_v15 = vsel %vm2850_vm7, %v7457_v39, %v2851_v4  ;;  %v9222_v4 = vld [vmem:[#allocation16_spill] sm:$0xff] }
 0x57a   : > { %5008 = vmatprep.mubr.msk.f32.mxu1 %vm9214_vm6, %v2753_v3  ;;  %v2854_v31 = vxor.u32 2147483648, %v7457_v39  ;;  %v2944_v27 = vsub.s32 4, %v7423_v40  ;;  %v4285_v42 = vor.u32 %v4284_v5, %v4283_v54  ;;  %v4288_v59 = vshll.u32 %v4287_v21, 23  ;;  %v9230_v21 = vld [vmem:[#allocation11_spill] sm:$0xff] }
 0x57b   : > { %v4165_v55 = vsel %vm4163_vm11, %v4164_v11, %v8385_v46  ;;  %vm2853_vm2 = vcmp.eq.s32.totalorder %v2848_v58, 2  ;;  %vm2849_vm1 = vcmp.lt.s32.totalorder %v2848_v58, 2  ;;  %vm9216_vm0 = vcmp.lt.s32.totalorder %v9215_v19, 0  ;;  %v9219_v58 = vld [vmem:[#allocation22_spill] sm:$0xff] }
 0x57c   : > { %v4166_v28 = vadd.s32 %v4165_v55, %v4161_v33  ;;  %v2855_v6 = vsel %vm2853_vm2, %v2854_v31, %v7461_v36  ;;  %v2945_v0 = vsel %vm9216_vm0, %v2944_v27, %v7423_v40  ;;  %5324 = vsinq.f32 %v3986_v22  ;;  %v9221_v40 = vld [vmem:[#allocation38_spill] sm:$0xff] }
 0x57d   : > { %v4289_v32 = vor.u32 4788187, %v4288_v59  ;;  %v2856_v29 = vsel %vm2849_vm1, %v2852_v15, %v2855_v6  ;;  %v2947_v39 = vsel %vm7554_vm3, 0, %v2945_v0  ;;  %vm4212_vm6 = vcmp.lt.s32.totalorder %v8076_v13, 0  ;;  %v9231_v0 = vld [vmem:[#allocation12_spill] sm:$0xff] }
 0x57e   : > { %v4167_v44 = vadd.s32 536870912, %v4166_v28  ;;  %vm9218_vm7 = vweird.f32 %v7172_v62  ;;  %v2951_v57 = vadd.s32 3, %v2947_v39  ;;  %v3048_v26 = vsub.s32 4, %v9219_v58  ;;  %v9225_v62 = vld [vmem:[#allocation14_spill] sm:$0xff] }
 0x57f   : > { %v2857_v16 = vsel %vm9218_vm7, nan, %v2856_v29  ;;  %v4290_v36 = vand.u32 2147483647, %v4289_v32  ;;  %v4292_v34 = vcvt.s32.f32 %v4285_v42  ;;  %vm9220_vm11 = vcmask 261120   ;;  %v9232_v29 = vld [vmem:[#allocation3_spill] sm:$0xff] }
 0x580   : > { %5009 = vmatmul.mubr.msk.f32.vlgmr.msra.gmra.mrb[16].mxu1 %vm9220_vm11, %v2857_v16  ;;  %v2955_v38 = vxor.u32 2147483648, %v9221_v40  ;;  %v2958_v46 = vxor.u32 2147483648, %v9222_v4  ;;  %v8423_v24 = vshrl.u32 %v4167_v44, 30  ;;  %v2952_v22 = vand.u32 3, %v2951_v57 }
 0x581   : > { %vm9224_vm3 = vcmp.lt.s32.totalorder %v9223_v17, 0  ;;  %v3152_v20 = vsub.s32 4, %v9225_v62  ;;  %v9226_v50 = vand.u32 2147483647, %v8076_v13  ;;  %v4293_v54 = vmul.f32 %v4292_v34, %v4290_v36  ;;  %v9236_v36 = vld [vmem:[#allocation25_spill] sm:$0xff] }
 0x582   : > { %v3049_v33 = vsel %vm9224_vm3, %v3048_v26, %v9219_v58  ;;  %vm2950_vm1 = vweird.f32 %v9215_v19  ;;  %v3059_v11 = vxor.u32 2147483648, %v9230_v21  ;;  %v4169_v3 = vshll.u32 %v8423_v24, 30 }
 0x583   : > { %vm8431_vm2 = vcmp.le.f32.partialorder %v9226_v50, 0.7853982  ;;  %v3051_v5 = vsel %vm7505_vm13, 0, %v3049_v33  ;;  %vm2953_vm0 = vcmp.lt.s32.totalorder %v2952_v22, 2  ;;  %vm2954_vm7 = vcmp.eq.s32.totalorder %v2952_v22, 0  ;;  %v8442_v59 = vpop.eup %5322  ;;  %v9238_v50 = vld [vmem:[#allocation19_spill] sm:$0xff] }
 0x584   : > { %vm2957_vm11 = vcmp.eq.s32.totalorder %v2952_v22, 2  ;;  %v4294_v15 = vxor.u32 2147483648, %v4293_v54  ;;  %v2956_v31 = vsel %vm2954_vm7, %v9222_v4, %v2955_v38  ;;  %v3055_v42 = vadd.s32 3, %v3051_v5  ;;  %v9237_v38 = vld [vmem:[#allocation29_spill] sm:$0xff] }
 0x585   : > { %v2959_v27 = vsel %vm2957_vm11, %v2958_v46, %v9221_v40  ;;  %v8444_v55 = vsub.s32 %v4166_v28, %v4169_v3  ;;  %v3062_v32 = vxor.u32 2147483648, %v9231_v0  ;;  %vm9233_vm13 = vcmp.lt.s32.totalorder %v9232_v29, 0 }
 0x586   : > { %v2960_v6 = vsel %vm2953_vm0, %v2956_v31, %v2959_v27  ;;  %v3153_v12 = vsel %vm9233_vm13, %v3152_v20, %v9225_v62  ;;  %vm3054_vm3 = vweird.f32 %v9223_v17  ;;  %v3056_v44 = vand.u32 3, %v3055_v42  ;;  %v8459_v40 = vpop.eup %5324  ;;  %v9241_v31 = vld [vmem:[#allocation30_spill] sm:$0xff]  ;;  %v9242_v17 = vld [vmem:[#allocation31_spill] sm:$0xff] }
 0x587   : > { %v2961_v39 = vsel %vm2950_vm1, nan, %v2960_v6  ;;  %v3155_v57 = vsel %vm7703_vm14, 0, %v3153_v12  ;;  %v4172_v58 = vsub.s32 0, %v8444_v55  ;;  %vm9235_vm7 = vcmask 261120  }
 0x588   : > { %5011 = vmatprep.mubr.msk.f32.mxu1 %vm9235_vm7, %v2961_v39  ;;  %v3159_v28 = vadd.s32 3, %v3155_v57  ;;  %v3163_v26 = vxor.u32 2147483648, %v7851_v18  ;;  %v3256_v34 = vsub.s32 4, %v9236_v36  ;;  %v4295_v19 = vsel %vm4212_vm6, %v4294_v15, %v4293_v54 }
 0x589   : > { %vm3058_vm1 = vcmp.eq.s32.totalorder %v3056_v44, 0  ;;  %vm3061_vm0 = vcmp.eq.s32.totalorder %v3056_v44, 2  ;;  %v3166_v4 = vxor.u32 2147483648, %v9237_v38  ;;  %v4798_v46 = vmin.u32 %v4172_v58, %v8444_v55 }
 0x58a   : > { %vm3057_vm14 = vcmp.lt.s32.totalorder %v3056_v44, 2  ;;  %v3060_v22 = vsel %vm3058_vm1, %v9231_v0, %v3059_v11  ;;  %v3063_v33 = vsel %vm3061_vm0, %v3062_v32, %v9230_v21  ;;  %vm3158_vm11 = vweird.f32 %v9232_v29  ;;  %v9243_v44 = vld [vmem:[#allocation10_spill] sm:$0xff]  ;;  %v9246_v29 = vld [vmem:[#allocation20_spill] sm:$0xff] }
 0x58b   : > { %v3064_v62 = vsel %vm3057_vm14, %v3060_v22, %v3063_v33  ;;  %v3160_v20 = vand.u32 3, %v3159_v28  ;;  %vm9239_vm13 = vcmp.lt.s32.totalorder %v9238_v50, 0  ;;  %v8474_v54 = vsel %vm8431_vm2, %v8076_v13, %v4295_v19 }
 0x58c   : > { %v3257_v14 = vsel %vm9239_vm13, %v3256_v34, %v9236_v36  ;;  %v4174_v5 = vclz %v4798_v46  ;;  %v3065_v3 = vsel %vm3054_vm3, nan, %v3064_v62  ;;  %v3267_v27 = vxor.u32 2147483648, %v9241_v31  ;;  %vm9244_vm3 = vmmov %vm9235_vm7 }
 0x58d   : > { %v3259_v21 = vsel %vm7635_vm9, 0, %v3257_v14  ;;  %5012 = vmatmul.mubr.msk.f32.gmra.mrb[18].mxu1 %vm9235_vm7, %v3065_v3  ;;  %vm3162_vm1 = vcmp.eq.s32.totalorder %v3160_v20, 0  ;;  %vm3165_vm0 = vcmp.eq.s32.totalorder %v3160_v20, 2  ;;  %vm3161_vm14 = vcmp.lt.s32.totalorder %v3160_v20, 2 }
 0x58e   : > { %v3263_v15 = vadd.s32 3, %v3259_v21  ;;  %v4799_v42 = vadd.s32 4294967294, %v4174_v5  ;;  %v3164_v6 = vsel %vm3162_vm1, %v9237_v38, %v3163_v26  ;;  %v3167_v0 = vsel %vm3165_vm0, %v3166_v4, %v7851_v18 }
 0x58f   : > { %v3168_v32 = vsel %vm3161_vm14, %v3164_v6, %v3167_v0  ;;  %v3270_v39 = vxor.u32 2147483648, %v9242_v17  ;;  %v3360_v16 = vsub.s32 4, %v9243_v44  ;;  %5326 = vcosq.f32 %v8474_v54  ;;  %v9252_v0 = vld [vmem:[#allocation40_spill] sm:$0xff] }
 0x590   : > { %v3264_v12 = vand.u32 3, %v3263_v15  ;;  %v4162_v57 = vadd.s32 %v8384_v43, %v8379_v25  ;;  %vm4800_vm9 = vcmp.lt.s32.totalorder %v4799_v42, 0  ;;  %v3169_v58 = vsel %vm3158_vm11, nan, %v3168_v32 }
 0x591   : > { %v4177_v28 = vsel %vm4800_vm9, 0, %v4799_v42  ;;  %5014 = vmatprep.mubr.msk.f32.mxu1 %vm9244_vm3, %v3169_v58  ;;  %vm3262_vm13 = vweird.f32 %v9238_v50  ;;  %vm9245_vm14 = vcmp.lt.s32.totalorder %v7592_v45, 0  ;;  %v3464_v19 = vsub.s32 4, %v9246_v29  ;;  %vm9249_vm9 = vmmov %vm9244_vm3 }
 0x592   : > { %vm3265_vm7 = vcmp.lt.s32.totalorder %v3264_v12, 2  ;;  %vm3266_vm1 = vcmp.eq.s32.totalorder %v3264_v12, 0  ;;  %v4178_v18 = vsub.s32 32, %v4177_v28  ;;  %v4182_v26 = vsub.s32 4294967266, %v4177_v28 }
 0x593   : > { %v3268_v36 = vsel %vm3266_vm1, %v9242_v17, %v3267_v27  ;;  %vm3269_vm0 = vcmp.eq.s32.totalorder %v3264_v12, 2  ;;  %v4179_v34 = vshll.u32 %v8444_v55, %v4177_v28  ;;  %v3361_v43 = vsel %vm9245_vm14, %v3360_v16, %v9243_v44  ;;  %v9247_v55 = vld [vmem:[#allocation21_spill] sm:$0xff]  ;;  %v9253_v12 = vld [vmem:[#allocation28_spill] sm:$0xff]  ;;  %v9254_v28 = vld [vmem:[#allocation23_spill] sm:$0xff] }
 0x594   : > { %v3271_v25 = vsel %vm3269_vm0, %v3270_v39, %v9241_v31  ;;  %v4180_v38 = vshrl.u32 %v4162_v57, %v4178_v18  ;;  %v4183_v4 = vadd.s32 127, %v4182_v26  ;;  %v3363_v22 = vsel %vm7922_vm4, 0, %v3361_v43  ;;  %v9251_v31 = vld [vmem:[#allocation36_spill] sm:$0xff] }
 0x595   : > { %v3272_v46 = vsel %vm3265_vm7, %v3268_v36, %v3271_v25  ;;  %v3367_v62 = vadd.s32 3, %v3363_v22  ;;  %v3371_v20 = vxor.u32 2147483648, %v8080_v1  ;;  %vm9248_vm11 = vcmp.lt.s32.totalorder %v9247_v55, 0  ;;  %v9262_v22 = vld [vmem:[#allocation17_spill] sm:$0xff] }
 0x596   : > { %v3273_v33 = vsel %vm3262_vm13, nan, %v3272_v46  ;;  %v3465_v50 = vsel %vm9248_vm11, %v3464_v19, %v9246_v29  ;;  %v4181_v14 = vor.u32 %v4180_v38, %v4179_v34  ;;  %v4184_v5 = vshll.u32 %v4183_v4, 23  ;;  %v9260_v19 = vld [vmem:[#allocation32_spill] sm:$0xff] }
 0x597   : > { %5015 = vmatmul.mubr.msk.f32.gmra.mrb[20].mxu1 %vm9249_vm9, %v3273_v33  ;;  %v3374_v3 = vxor.u32 2147483648, %v8011_v8  ;;  %v3467_v21 = vsel %vm7787_vm5, 0, %v3465_v50  ;;  %vm3366_vm3 = vweird.f32 %v7592_v45  ;;  %v3368_v23 = vand.u32 3, %v3367_v62  ;;  %v9263_v62 = vld [vmem:[#allocation2_spill] sm:$0xff] }
 0x598   : > { %v3471_v15 = vadd.s32 3, %v3467_v21  ;;  %v3568_v27 = vsub.s32 4, %v9251_v31  ;;  %vm4108_vm4 = vcmp.lt.s32.totalorder %v8193_v41, 0  ;;  %v4185_v42 = vor.u32 4788187, %v4184_v5  ;;  %v9264_v50 = vld [vmem:[#allocation6_spill] sm:$0xff] }
 0x599   : > { %v4188_v6 = vcvt.s32.f32 %v4181_v14  ;;  %v3475_v32 = vxor.u32 2147483648, %v9252_v0  ;;  %v3478_v17 = vxor.u32 2147483648, %v9253_v12  ;;  %vm3369_vm13 = vcmp.lt.s32.totalorder %v3368_v23, 2  ;;  %v8515_v44 = vpop.eup %5326  ;;  %v9266_v14 = vld [vmem:[#allocation13_spill] sm:$0xff] }
 0x59a   : > { %vm3370_vm7 = vcmp.eq.s32.totalorder %v3368_v23, 0  ;;  %vm3373_vm1 = vcmp.eq.s32.totalorder %v3368_v23, 2  ;;  %v3472_v39 = vand.u32 3, %v3471_v15  ;;  %v4186_v16 = vand.u32 2147483647, %v4185_v42  ;;  %v9268_v15 = vld [vmem:[#allocation8_spill] sm:$0xff] }
 0x59b   : > { %v3372_v57 = vsel %vm3370_vm7, %v8011_v8, %v3371_v20  ;;  %v3375_v58 = vsel %vm3373_vm1, %v3374_v3, %v8080_v1  ;;  %vm9255_vm5 = vcmp.lt.s32.totalorder %v9254_v28, 0  ;;  %vm8524_vm0 = vcmp.le.f32.partialorder %v4106_v60, 0.7853982  ;;  %v9270_v42 = vld [vmem:[#allocation37_spill] sm:$0xff] }
 0x59c   : > { %v3569_v18 = vsel %vm9255_vm5, %v3568_v27, %v9251_v31  ;;  %v3376_v36 = vsel %vm3369_vm13, %v3372_v57, %v3375_v58  ;;  %vm3473_vm14 = vcmp.lt.s32.totalorder %v3472_v39, 2  ;;  %vm3474_vm11 = vcmp.eq.s32.totalorder %v3472_v39, 0  ;;  %v9271_v58 = vld [vmem:[#allocation33_spill] sm:$0xff] }
 0x59d   : > { %vm3477_vm9 = vcmp.eq.s32.totalorder %v3472_v39, 2  ;;  %v4189_v34 = vmul.f32 %v4188_v6, %v4186_v16  ;;  %v3377_v8 = vsel %vm3366_vm3, nan, %v3376_v36  ;;  %v3476_v1 = vsel %vm3474_vm11, %v9253_v12, %v3475_v32 }
 0x59e   : > { %v3479_v25 = vsel %vm3477_vm9, %v3478_v17, %v9252_v0  ;;  %vm9258_vm7 = vcmask 261120   ;;  %vm3470_vm1 = vweird.f32 %v9247_v55  ;;  %v3571_v29 = vsel %vm8049_vm12, 0, %v3569_v18 }
 0x59f   : > { %5017 = vmatprep.mubr.msk.f32.mxu1 %vm9258_vm7, %v3377_v8  ;;  %v3480_v60 = vsel %vm3473_vm14, %v3476_v1, %v3479_v25  ;;  %v3672_v38 = vsub.s32 4, %v9260_v19  ;;  %5328 = vsinq.f32 %v8474_v54  ;;  %v4190_v4 = vxor.u32 2147483648, %v4189_v34  ;;  %vm9261_vm3 = vmmov %vm9258_vm7 }
 0x5a0   : > { %v3481_v46 = vsel %vm3470_vm1, nan, %v3480_v60  ;;  %v3575_v45 = vadd.s32 3, %v3571_v29  ;;  %v3579_v33 = vxor.u32 2147483648, %v9262_v22  ;;  %v3582_v20 = vxor.u32 2147483648, %v9263_v62 }
 0x5a1   : > { %5018 = vmatmul.mubr.msk.f32.gmra.mrb[22].mxu1 %vm9261_vm3, %v3481_v46  ;;  %vm9265_vm13 = vcmp.lt.s32.totalorder %v9264_v50, 0  ;;  %v3776_v5 = vsub.s32 4, %v9266_v14  ;;  %vm3574_vm12 = vweird.f32 %v9254_v28  ;;  %vm3678_vm5 = vweird.f32 %v9264_v50  ;;  %v9275_v28 = vld [vmem:[#allocation5_spill] sm:$0xff] }
 0x5a2   : > { %v3673_v55 = vsel %vm9265_vm13, %v3672_v38, %v9260_v19  ;;  %v3576_v3 = vand.u32 3, %v3575_v45  ;;  %v4191_v21 = vsel %vm4108_vm4, %v4190_v4, %v4189_v34  ;;  %v3683_v31 = vxor.u32 2147483648, %v9268_v15 }
 0x5a3   : > { %v3675_v54 = vsel %vm7938_vm15, 0, %v3673_v55  ;;  %vm9269_vm14 = vcmp.lt.s32.totalorder %v7806_v53, 0  ;;  %v3686_v6 = vxor.u32 2147483648, %v9270_v42  ;;  %v3787_v0 = vxor.u32 2147483648, %v8334_v30 }
 0x5a4   : > { %v3679_v23 = vadd.s32 3, %v3675_v54  ;;  %v3777_v27 = vsel %vm9269_vm14, %v3776_v5, %v9266_v14  ;;  %vm3578_vm11 = vcmp.eq.s32.totalorder %v3576_v3, 0  ;;  %vm3581_vm9 = vcmp.eq.s32.totalorder %v3576_v3, 2 }
 0x5a5   : > { %vm3577_vm7 = vcmp.lt.s32.totalorder %v3576_v3, 2  ;;  %v3580_v32 = vsel %vm3578_vm11, %v9263_v62, %v3579_v33  ;;  %v3583_v12 = vsel %vm3581_vm9, %v3582_v20, %v9262_v22  ;;  %v4194_v39 = vsel %vm8524_vm0, %v8193_v41, %v4191_v21 }
 0x5a6   : > { %v3680_v17 = vand.u32 3, %v3679_v23  ;;  %v3584_v16 = vsel %vm3577_vm7, %v3580_v32, %v3583_v12  ;;  %v3779_v57 = vsel %vm8174_vm10, 0, %v3777_v27  ;;  %vm3782_vm15 = vweird.f32 %v7806_v53 }
 0x5a7   : > { %v3880_v18 = vsub.s32 4, %v9271_v58  ;;  %v3585_v36 = vsel %vm3574_vm12, nan, %v3584_v16  ;;  %vm9272_vm14 = vcmask 261120   ;;  %v3783_v1 = vadd.s32 3, %v3779_v57 }
 0x5a8   : > { %vm3681_vm1 = vcmp.lt.s32.totalorder %v3680_v17, 2  ;;  %vm3682_vm3 = vcmp.eq.s32.totalorder %v3680_v17, 0  ;;  %vm3685_vm13 = vcmp.eq.s32.totalorder %v3680_v17, 2  ;;  %5020 = vmatprep.mubr.msk.f32.mxu1 %vm9272_vm14, %v3585_v36  ;;  %vm9274_vm10 = vcmp.lt.s32.totalorder %v9273_v63, 0  ;;  %vm9277_vm11 = vmmov %vm9272_vm14 }
 0x5a9   : > { %v3684_v34 = vsel %vm3682_vm3, %v9270_v42, %v3683_v31  ;;  %v3687_v8 = vsel %vm3685_vm13, %v3686_v6, %v9268_v15  ;;  %v3881_v25 = vsel %vm9274_vm10, %v3880_v18, %v9271_v58  ;;  %5330 = vcosq.f32 %v4194_v39  ;;  %v8577_v19 = vpop.eup %5328 }
 0x5aa   : > { %v3688_v60 = vsel %vm3681_vm1, %v3684_v34, %v3687_v8  ;;  %v3790_v43 = vxor.u32 2147483648, %v8329_v10  ;;  %vm9276_vm12 = vnez %v9275_v28  ;;  %v3784_v4 = vand.u32 3, %v3783_v1 }
 0x5ab   : > { %v3883_v29 = vsel %vm9276_vm12, 0, %v3881_v25  ;;  %v3689_v38 = vsel %vm3678_vm5, nan, %v3688_v60  ;;  %v3984_v45 = vsub.s32 4, %v8252_v48  ;;  %5332 = vsinq.f32 %v4194_v39  ;;  %vm9280_vm12 = vmmov %vm9277_vm11 }
 0x5ac   : > { %v3887_v46 = vadd.s32 3, %v3883_v29  ;;  %5021 = vmatmul.mubr.msk.f32.gmra.mrb[24].mxu1 %vm9277_vm11, %v3689_v38  ;;  %v3891_v22 = vxor.u32 2147483648, %v8255_v49  ;;  %v3894_v33 = vxor.u32 2147483648, %v8250_v47  ;;  %v4088_v62 = vsub.s32 4, %v8164_v56  ;;  %v4514_v38 = vld [vmem:[%s5429_s26 + $0x8] sm:$0xff] }
 0x5ad   : > { %vm3785_vm9 = vcmp.lt.s32.totalorder %v3784_v4, 2  ;;  %vm3786_vm7 = vcmp.eq.s32.totalorder %v3784_v4, 0  ;;  %vm3789_vm1 = vcmp.eq.s32.totalorder %v3784_v4, 2  ;;  %vm9278_vm5 = vcmp.lt.s32.totalorder %v7977_v52, 0 }
 0x5ae   : > { %v3888_v20 = vand.u32 3, %v3887_v46  ;;  %v3788_v50 = vsel %vm3786_vm7, %v8329_v10, %v3787_v0  ;;  %v3791_v55 = vsel %vm3789_vm1, %v3790_v43, %v8334_v30  ;;  %v3985_v14 = vsel %vm9278_vm5, %v3984_v45, %v8252_v48  ;;  %v4513_v46 = vld [vmem:[%s5429_s26] sm:$0xff] }
 0x5af   : > { %vm9279_vm3 = vcmp.lt.s32.totalorder %v7949_v7, 0  ;;  %v3792_v3 = vsel %vm3785_vm9, %v3788_v50, %v3791_v55  ;;  %v3987_v30 = vsel %vm8350_vm8, 0, %v3985_v14  ;;  %vm3886_vm11 = vweird.f32 %v9273_v63  ;;  %v4515_v55 = vld [vmem:[%s5429_s26 + $0x10] sm:$0xff] }
 0x5b0   : > { %v4089_v5 = vsel %vm9279_vm3, %v4088_v62, %v8164_v56  ;;  %vm3889_vm13 = vcmp.lt.s32.totalorder %v3888_v20, 2  ;;  %vm3890_vm14 = vcmp.eq.s32.totalorder %v3888_v20, 0  ;;  %vm3893_vm10 = vcmp.eq.s32.totalorder %v3888_v20, 2  ;;  %v4516_v62 = vld [vmem:[%s5429_s26 + $0x18] sm:$0xff] }
 0x5b1   : > { %v3793_v11 = vsel %vm3782_vm15, nan, %v3792_v3  ;;  %v3892_v54 = vsel %vm3890_vm14, %v8250_v47, %v3891_v22  ;;  %v3895_v10 = vsel %vm3893_vm10, %v3894_v33, %v8255_v49  ;;  %v3991_v56 = vadd.s32 3, %v3987_v30  ;;  %vm9282_vm15 = vmmov %vm9280_vm12 }
 0x5b2   : > { %5023 = vmatprep.mubr.msk.f32.mxu1 %vm9280_vm12, %v3793_v11  ;;  %v3896_v48 = vsel %vm3889_vm13, %v3892_v54, %v3895_v10  ;;  %vm9281_vm9 = vnez %v9207_v35  ;;  %v3995_v53 = vxor.u32 2147483648, %v8459_v40  ;;  %v3998_v15 = vxor.u32 2147483648, %v8442_v59  ;;  %v4518_v54 = vld [vmem:[%s5429_s26 + $0x28] sm:$0xff] }
 0x5b3   : > { %v4091_v21 = vsel %vm9281_vm9, 0, %v4089_v5  ;;  %v3897_v23 = vsel %vm3886_vm11, nan, %v3896_v48  ;;  %vm3990_vm7 = vweird.f32 %v7977_v52  ;;  %v3992_v49 = vand.u32 3, %v3991_v56  ;;  %v5331_v27 = vpop.eup %5330  ;;  %v4517_v48 = vld [vmem:[%s5429_s26 + $0x20] sm:$0xff] }
 0x5b4   : > { %v4095_v47 = vadd.s32 3, %v4091_v21  ;;  %5024 = vmatmul.mubr.msk.f32.gmra.mrb[26].mxu1 %vm9282_vm15, %v3897_v23  ;;  %v4099_v37 = vxor.u32 2147483648, %v8361_v51  ;;  %v4192_v31 = vsub.s32 4, %v8423_v24  ;;  %vm4094_vm8 = vweird.f32 %v7949_v7 }
 0x5b5   : > { %v4102_v42 = vxor.u32 2147483648, %v8356_v9  ;;  %v4296_v6 = vsub.s32 4, %v8325_v2  ;;  %vm3993_vm1 = vcmp.lt.s32.totalorder %v3992_v49, 2  ;;  %vm3994_vm5 = vcmp.eq.s32.totalorder %v3992_v49, 0  ;;  %v5333_v32 = vpop.eup %5332 }
 0x5b6   : > { %v4096_v35 = vand.u32 3, %v4095_v47  ;;  %vm3997_vm3 = vcmp.eq.s32.totalorder %v3992_v49, 2  ;;  %v4193_v0 = vsel %vm4108_vm4, %v4192_v31, %v8423_v24  ;;  %v3996_v12 = vsel %vm3994_vm5, %v8442_v59, %v3995_v53  ;;  %vm9283_vm4 = vmmov %vm9280_vm12 }
 0x5b7   : > { %v3999_v17 = vsel %vm3997_vm3, %v3998_v15, %v8459_v40  ;;  %v4195_v57 = vsel %vm8524_vm0, 0, %v4193_v0  ;;  %v4297_v59 = vsel %vm4212_vm6, %v4296_v6, %v8325_v2  ;;  %v4203_v36 = vxor.u32 2147483648, %v5333_v32  ;;  %vm9284_vm0 = vmmov %vm9283_vm4  ;;  %v4520_v15 = vld [vmem:[%s5429_s26 + $0x38] sm:$0xff]  ;;  %v4522_v6 = vld [vmem:[%s5429_s26 + $0x48] sm:$0xff] }
 0x5b8   : > { %vm4097_vm13 = vcmp.lt.s32.totalorder %v4096_v35, 2  ;;  %vm4098_vm14 = vcmp.eq.s32.totalorder %v4096_v35, 0  ;;  %v4000_v39 = vsel %vm3993_vm1, %v3996_v12, %v3999_v17  ;;  %vm4101_vm10 = vcmp.eq.s32.totalorder %v4096_v35, 2  ;;  %vm9286_vm5 = vmmov %vm9284_vm0  ;;  %v4521_v12 = vld [vmem:[%s5429_s26 + $0x40] sm:$0xff] }
 0x5b9   : > { %v4100_v16 = vsel %vm4098_vm14, %v8356_v9, %v4099_v37  ;;  %v4001_v58 = vsel %vm3990_vm7, nan, %v4000_v39  ;;  %v4103_v18 = vsel %vm4101_vm10, %v4102_v42, %v8361_v51  ;;  %v4199_v24 = vadd.s32 3, %v4195_v57  ;;  %vm9287_vm3 = vmmov %vm9284_vm0  ;;  %v4519_v37 = vld [vmem:[%s5429_s26 + $0x30] sm:$0xff] }
 0x5ba   : > { %5026 = vmatprep.mubr.msk.f32.mxu1 %vm9283_vm4, %v4001_v58  ;;  %v4104_v40 = vsel %vm4097_vm13, %v4100_v16, %v4103_v18  ;;  %v4206_v34 = vxor.u32 2147483648, %v5331_v27  ;;  %v4299_v9 = vsel %vm8431_vm2, 0, %v4297_v59  ;;  %v4307_v51 = vxor.u32 2147483648, %v8577_v19  ;;  %vm9288_vm13 = vmmov %vm9284_vm0  ;;  %v4524_v58 = vld [vmem:[%s5429_s26 + $0x58] sm:$0xff]  ;;  %v4523_v59 = vld [vmem:[%s5429_s26 + $0x50] sm:$0xff] }
 0x5bb   : > { %v4105_v26 = vsel %vm4094_vm8, nan, %v4104_v40  ;;  %v4200_v52 = vand.u32 3, %v4199_v24  ;;  %v4303_v8 = vadd.s32 3, %v4299_v9  ;;  %v4310_v1 = vxor.u32 2147483648, %v8515_v44  ;;  %vm9285_vm8 = vmmov %vm9284_vm0 }
 0x5bc   : > { %5027 = vmatmul.mubr.msk.f32.gmra.mrb[28].mxu1 %vm9284_vm0, %v4105_v26  ;;  %vm4198_vm2 = vweird.f32 %v8193_v41  ;;  %vm4302_vm1 = vweird.f32 %v8076_v13  ;;  %v8644_v41 = vld [vmem:[%s8721_s8] ss:$0 sm:$0xff]  ;;  %vm9289_vm14 = vmmov %vm9284_vm0  ;;  %v4526_v26 = vld [vmem:[%s5429_s26 + $0x68] sm:$0xff] }
 0x5bd   : > { %vm4202_vm6 = vcmp.eq.s32.totalorder %v4200_v52, 0  ;;  %vm4205_vm12 = vcmp.eq.s32.totalorder %v4200_v52, 2  ;;  %v4304_v2 = vand.u32 3, %v4303_v8  ;;  %vm4201_vm11 = vcmp.lt.s32.totalorder %v4200_v52, 2  ;;  %vm9290_vm10 = vmmov %vm9284_vm0 }
 0x5be   : > { %v4204_v63 = vsel %vm4202_vm6, %v5331_v27, %v4203_v36  ;;  %v4207_v25 = vsel %vm4205_vm12, %v4206_v34, %v5333_v32  ;;  %vm9291_vm4 = vmmov %vm9284_vm0 }
 0x5bf   : > { %v4208_v61 = vsel %vm4201_vm11, %v4204_v63, %v4207_v25  ;;  %vm4306_vm9 = vcmp.eq.s32.totalorder %v4304_v2, 0  ;;  %vm4309_vm15 = vcmp.eq.s32.totalorder %v4304_v2, 2  ;;  %vm4305_vm7 = vcmp.lt.s32.totalorder %v4304_v2, 2  ;;  %vm9292_vm6 = vmmov %vm9284_vm0 }
 0x5c0   : > { %v4209_v7 = vsel %vm4198_vm2, nan, %v4208_v61  ;;  %v4308_v60 = vsel %vm4306_vm9, %v8515_v44, %v4307_v51  ;;  %v4311_v43 = vsel %vm4309_vm15, %v4310_v1, %v8577_v19  ;;  %vm9293_vm12 = vmmov %vm9284_vm0  ;;  %v4525_v51 = vld [vmem:[%s5429_s26 + $0x60] sm:$0xff]  ;;  %v4528_v61 = vld [vmem:[%s5429_s26 + $0x78] sm:$0xff] }
 0x5c1   : > { %5029 = vmatprep.mubr.msk.f32.mxu1 %vm9285_vm8, %v4209_v7  ;;  %v4312_v28 = vsel %vm4305_vm7, %v4308_v60, %v4311_v43  ;;  %vm9294_vm11 = vmmov %vm9284_vm0  ;;  %v4527_v43 = vld [vmem:[%s5429_s26 + $0x70] sm:$0xff] }
 0x5c2   : > { %v4313_v29 = vsel %vm4302_vm1, nan, %v4312_v28  ;;  %vm9295_vm2 = vmmov %vm9284_vm0 }
 0x5c3   : > { %5030 = vmatmul.mubr.msk.f32.gmra.mrb[30].mxu1 %vm9286_vm5, %v4313_v29  ;;  %vm9296_vm9 = vmmov %vm9284_vm0 }
 0x5c4   : > { %vm9297_vm15 = vmmov %vm9284_vm0 }
 0x5c5   : > { %vm9298_vm7 = vmmov %vm9284_vm0 }
 0x5c6   : > { %vm9299_vm8 = vmmov %vm9284_vm0 }
 0x5c7   : > { %vm9300_vm1 = vmmov %vm9284_vm0 }
 0x5c8   : > { %vm9301_vm5 = vmmov %vm9284_vm0 }
 0x653   : > { %v5010_v44 = vpop.f32.mrb[16].mxu1 }
 0x654   : > { %v4440_v19 = vadd.f32 %v5010_v44, %v8644_v41  ;;  %v4434_v4 = vpop.f32.mrb[17].mxu1 }
 0x655   : > { %v4435_v13 = vadd.f32 %v8644_v41, %v4434_v4 }
 0x656   : > { %v4530_v45 = vadd.f32 %v4514_v38, %v4440_v19 }
 0x657   : > { %v4529_v22 = vadd.f32 %v4513_v46, %v4435_v13 }
 0x658   : > { %4546 = vst.msk [vmem:[%s5429_s26 + $0x8] sm:$0xff] %vm9287_vm3, %v4530_v45 }
 0x659   : > { %4545 = vst.msk [vmem:[%s5429_s26] sm:$0xff] %vm9288_vm13, %v4529_v22 }
 0x660   : > { %v5013_v33 = vpop.f32.mrb[18].mxu1 }
 0x661   : > { %v4450_v20 = vadd.f32 %v5013_v33, %v8644_v41  ;;  %v4444_v50 = vpop.f32.mrb[19].mxu1 }
 0x662   : > { %v4445_v14 = vadd.f32 %v8644_v41, %v4444_v50 }
 0x663   : > { %v4532_v5 = vadd.f32 %v4516_v62, %v4450_v20 }
 0x664   : > { %v4531_v3 = vadd.f32 %v4515_v55, %v4445_v14 }
 0x665   : > { %4548 = vst.msk [vmem:[%s5429_s26 + $0x18] sm:$0xff] %vm9289_vm14, %v4532_v5 }
 0x666   : > { %4547 = vst.msk [vmem:[%s5429_s26 + $0x10] sm:$0xff] %vm9290_vm10, %v4531_v3 }
 0x66a   : > { %v5016_v11 = vpop.f32.mrb[20].mxu1 }
 0x66b   : > { %v4460_v10 = vadd.f32 %v5016_v11, %v8644_v41  ;;  %v4454_v30 = vpop.f32.mrb[21].mxu1 }
 0x66c   : > { %v4455_v56 = vadd.f32 %v8644_v41, %v4454_v30 }
 0x66d   : > { %v4534_v21 = vadd.f32 %v4518_v54, %v4460_v10 }
 0x66e   : > { %v4533_v23 = vadd.f32 %v4517_v48, %v4455_v56 }
 0x66f   : > { %4550 = vst.msk [vmem:[%s5429_s26 + $0x28] sm:$0xff] %vm9291_vm4, %v4534_v21 }
 0x670   : > { %4549 = vst.msk [vmem:[%s5429_s26 + $0x20] sm:$0xff] %vm9284_vm0, %v4533_v23 }
 0x674   : > { %v5019_v53 = vpop.f32.mrb[22].mxu1 }
 0x675   : > { %v4470_v47 = vadd.f32 %v5019_v53, %v8644_v41  ;;  %v4464_v49 = vpop.f32.mrb[23].mxu1 }
 0x676   : > { %v4465_v31 = vadd.f32 %v8644_v41, %v4464_v49 }
 0x677   : > { %v4536_v27 = vadd.f32 %v4520_v15, %v4470_v47 }
 0x678   : > { %v4535_v35 = vadd.f32 %v4519_v37, %v4465_v31 }
 0x679   : > { %4552 = vst.msk [vmem:[%s5429_s26 + $0x38] sm:$0xff] %vm9292_vm6, %v4536_v27 }
 0x67a   : > { %4551 = vst.msk [vmem:[%s5429_s26 + $0x30] sm:$0xff] %vm9293_vm12, %v4535_v35 }
 0x67f   : > { %v5022_v42 = vpop.f32.mrb[24].mxu1 }
 0x680   : > { %v4480_v0 = vadd.f32 %v5022_v42, %v8644_v41  ;;  %v4474_v32 = vpop.f32.mrb[25].mxu1 }
 0x681   : > { %v4475_v17 = vadd.f32 %v8644_v41, %v4474_v32 }
 0x682   : > { %v4538_v39 = vadd.f32 %v4522_v6, %v4480_v0 }
 0x683   : > { %v4537_v16 = vadd.f32 %v4521_v12, %v4475_v17 }
 0x684   : > { %4554 = vst.msk [vmem:[%s5429_s26 + $0x48] sm:$0xff] %vm9294_vm11, %v4538_v39 }
 0x685   : > { %4553 = vst.msk [vmem:[%s5429_s26 + $0x40] sm:$0xff] %vm9295_vm2, %v4537_v16 }
 0x687   : > { %v5025_v57 = vpop.f32.mrb[26].mxu1 }
 0x688   : > { %v4490_v18 = vadd.f32 %v5025_v57, %v8644_v41  ;;  %v4484_v24 = vpop.f32.mrb[27].mxu1 }
 0x689   : > { %v4485_v40 = vadd.f32 %v8644_v41, %v4484_v24 }
 0x68a   : > { %v4540_v36 = vadd.f32 %v4524_v58, %v4490_v18 }
 0x68b   : > { %v4539_v34 = vadd.f32 %v4523_v59, %v4485_v40 }
 0x68c   : > { %4556 = vst.msk [vmem:[%s5429_s26 + $0x58] sm:$0xff] %vm9296_vm9, %v4540_v36 }
 0x68d   : > { %4555 = vst.msk [vmem:[%s5429_s26 + $0x50] sm:$0xff] %vm9297_vm15, %v4539_v34 }
 0x68f   : > { %v5028_v9 = vpop.f32.mrb[28].mxu1 }
 0x690   : > { %v4500_v52 = vadd.f32 %v5028_v9, %v8644_v41  ;;  %v4494_v8 = vpop.f32.mrb[29].mxu1 }
 0x691   : > { %v4495_v1 = vadd.f32 %v8644_v41, %v4494_v8 }
 0x692   : > { %v4542_v2 = vadd.f32 %v4526_v26, %v4500_v52 }
 0x693   : > { %v4541_v63 = vadd.f32 %v4525_v51, %v4495_v1 }
 0x694   : > { %4558 = vst.msk [vmem:[%s5429_s26 + $0x68] sm:$0xff] %vm9298_vm7, %v4542_v2 }
 0x695   : > { %4557 = vst.msk [vmem:[%s5429_s26 + $0x60] sm:$0xff] %vm9299_vm8, %v4541_v63 }
 0x696   : > { %v5031_v25 = vpop.f32.mrb[30].mxu1 }
 0x697   : > { %v4510_v7 = vadd.f32 %v5031_v25, %v8644_v41  ;;  %v4504_v60 = vpop.f32.mrb[31].mxu1 }
 0x698   : > { %v4505_v28 = vadd.f32 %v8644_v41, %v4504_v60 }
 0x699   : > { %v4544_v29 = vadd.f32 %v4528_v61, %v4510_v7 }
 0x69a   : > { %v4543_v44 = vadd.f32 %v4527_v43, %v4505_v28 }
 0x69b   : > { %4560 = vst.msk [vmem:[%s5429_s26 + $0x78] sm:$0xff] %vm9300_vm1, %v4544_v29 }
 0x69c   : > { %4559 = vst.msk [vmem:[%s5429_s26 + $0x70] sm:$0xff] %vm9301_vm5, %v4543_v44 }
 0x69d PF: > { %s19_s30 = sadd.s32 1, %s5343_s30  }
 0x69e   : > { %p16_p4 = scmp.ge.s32.totalorder %s19_s30, 4  }
 0x6a0   :  { %18 = sbr.rel (!%p16_p4) target bundleno = 1 (0x1), region = 86 }

</bundles_post_ra>
